<compile_context>
chip_gen: v7x
topology: tpu7x:2x2x1
jax: 0.10.0
libtpu: 0.0.40
codegen_flags: <defaults>
</compile_context>

<pallas_src>
import functools
import math

import jax
import jax.numpy as jnp
from jax.experimental import pallas as pl
from jax.experimental.pallas import tpu as pltpu

NUM_CLASSES = 21
OUT_PAD = 128          # lane-dense padded width of the classifier head output


def _layernorm(x, gamma, beta, eps=1e-5):
    # PyTorch nn.LayerNorm over last dim, biased variance, eps=1e-5 (all f32)
    mean = jnp.mean(x, axis=-1, keepdims=True)
    xc = x - mean
    var = jnp.mean(xc * xc, axis=-1, keepdims=True)
    return xc * jax.lax.rsqrt(var + eps) * gamma + beta


# --------------------------------------------------------------------------- #
# Single fused kernel: embed + pos-enc + L encoder layers + avg-pool + head
# --------------------------------------------------------------------------- #
def fused_transformer_kernel(
        x_ref, kbias_ref,
        emb_w_ref, emb_b_ref, pos_ref,
        wqkv_ref, bqkv_ref, wo_ref, bo_ref,
        g1_ref, be1_ref, w1_ref, b1_ref, w2_ref, b2_ref, g2_ref, be2_ref,
        featw_ref, featb_ref,
        o_ref, *, num_heads, num_layers, compute_dtype, unroll):
    Bt, S, Din = x_ref.shape
    E = emb_w_ref.shape[1]
    H = num_heads
    d = E // H
    scale = 1.0 / math.sqrt(d)
    M = Bt * S
    cd = compute_dtype

    def mm(a, w):
        # Activations cast to compute dtype; weights are pre-cast by the wrapper.
        return jnp.dot(a.astype(cd), w, preferred_element_type=jnp.float32)

    # ---- embedding + positional encoding (broadcast add, no tile) ----
    h = mm(x_ref[...].reshape(M, Din), emb_w_ref[...]) + emb_b_ref[...]     # (M, E) f32
    h = (h.reshape(Bt, S, E) + pos_ref[...]).reshape(M, E)

    # Additive key-padding bias 0 / -1e30, broadcast over heads and query positions.
    kbias = kbias_ref[...].reshape(Bt, 1, 1, S)                             # f32

    def layer_body(l, h):
        # --- fused QKV projection: one (M, E) @ (E, 3E) matmul ---
        qkv = mm(h, wqkv_ref[l]) + bqkv_ref[l]                              # (M, 3E) f32

        # --- head split: ONE reshape+transpose per tensor (head-major, batch-minor) ---
        def split_heads(c0):
            t = qkv[:, c0:c0 + E].reshape(Bt, S, H, d)
            return jnp.transpose(t, (0, 2, 1, 3)).reshape(Bt * H, S, d).astype(cd)

        qh = split_heads(0)
        kh = split_heads(E)
        vh = split_heads(2 * E)

        # --- scaled dot-product attention, all heads batched in the leading dim ---
        s = jnp.einsum("bqd,bkd->bqk", qh, kh,
                       preferred_element_type=jnp.float32) * scale          # (Bt*H, S, S)
        s = (s.reshape(Bt, H, S, S) + kbias).reshape(Bt * H, S, S)          # broadcast mask
        s = s - jnp.max(s, axis=-1, keepdims=True)
        p = jnp.exp(s)
        p = p * pl.reciprocal(jnp.sum(p, axis=-1, keepdims=True), approx=True)
        ctx = jnp.einsum("bqk,bkd->bqd", p.astype(cd), vh,
                         preferred_element_type=jnp.float32)                # (Bt*H, S, d)

        # --- reassemble heads into lanes -> single full-K output projection ---
        ctx2d = jnp.transpose(ctx.reshape(Bt, H, S, d), (0, 2, 1, 3)).reshape(M, E)
        attn = mm(ctx2d, wo_ref[l]) + bo_ref[l]

        # --- residual + LayerNorm 1 (f32) ---
        x1 = _layernorm(h + attn, g1_ref[l], be1_ref[l])

        # --- FFN: Linear -> ReLU -> Linear ---
        hid = jnp.maximum(mm(x1, w1_ref[l]) + b1_ref[l], 0.0)
        ffn = mm(hid, w2_ref[l]) + b2_ref[l]

        # --- residual + LayerNorm 2 (f32) ---
        return _layernorm(x1 + ffn, g2_ref[l], be2_ref[l])

    h = jax.lax.fori_loop(0, num_layers, layer_body, h, unroll=unroll)

    # ---- AdaptiveAvgPool1d(1) over sequence + lane-dense padded feature head ----
    pooled = jnp.mean(h.reshape(Bt, S, E), axis=1)                          # (Bt, E)
    out = mm(pooled, featw_ref[...]) + featb_ref[...]                       # (Bt, OUT_PAD)
    o_ref[...] = out.reshape(Bt, 1, OUT_PAD)


# --------------------------------------------------------------------------- #
# Parameter construction (stacked per-layer weights, pre-transposed to (in, out))
# --------------------------------------------------------------------------- #
def make_positional_encoding(seq_length, embed_dim):
    position = jnp.arange(seq_length, dtype=jnp.float32)[:, None]
    div_term = jnp.exp(jnp.arange(0, embed_dim, 2, dtype=jnp.float32)
                       * (-math.log(10000.0) / embed_dim))
    pe = jnp.zeros((seq_length, embed_dim), jnp.float32)
    pe = pe.at[:, 0::2].set(jnp.sin(position * div_term))
    pe = pe.at[:, 1::2].set(jnp.cos(position * div_term))
    return pe                                                               # (S, E)


def init_params(key, input_dim, seq_length, embed_dim, num_heads,
                ffn_hidden_dim, num_layers):
    def lin(k, fan_in, fan_out):
        kw, kb = jax.random.split(k)
        w = jax.random.normal(kw, (fan_in, fan_out), jnp.float32) * 0.05
        b = jax.random.normal(kb, (1, fan_out), jnp.float32) * 0.05
        return w, b

    keys = jax.random.split(key, 2 + num_layers)
    p = {}
    p["emb_w"], p["emb_b"] = lin(keys[0], input_dim, embed_dim)
    p["feat_w"], p["feat_b"] = lin(keys[1], embed_dim, NUM_CLASSES)
    p["pos"] = make_positional_encoding(seq_length, embed_dim)

    wqkv, bqkv, wo, bo = [], [], [], []
    w1, b1, w2, b2 = [], [], [], []
    g1, be1, g2, be2 = [], [], [], []
    for li in range(num_layers):
        lk = jax.random.split(keys[2 + li], 6)
        wq, bq = lin(lk[0], embed_dim, embed_dim)
        wk, bk = lin(lk[1], embed_dim, embed_dim)
        wv, bv = lin(lk[2], embed_dim, embed_dim)
        wqkv.append(jnp.concatenate([wq, wk, wv], axis=1))       # (E, 3E) fused QKV
        bqkv.append(jnp.concatenate([bq, bk, bv], axis=1))       # (1, 3E)
        w, b = lin(lk[3], embed_dim, embed_dim); wo.append(w); bo.append(b)
        w, b = lin(lk[4], embed_dim, ffn_hidden_dim); w1.append(w); b1.append(b)
        w, b = lin(lk[5], ffn_hidden_dim, embed_dim); w2.append(w); b2.append(b)
        g1.append(jnp.ones((1, embed_dim), jnp.float32))
        be1.append(jnp.zeros((1, embed_dim), jnp.float32))
        g2.append(jnp.ones((1, embed_dim), jnp.float32))
        be2.append(jnp.zeros((1, embed_dim), jnp.float32))

    stack = lambda xs: jnp.stack(xs, axis=0)
    p.update(wqkv=stack(wqkv), bqkv=stack(bqkv), wo=stack(wo), bo=stack(bo),
             w1=stack(w1), b1=stack(b1), w2=stack(w2), b2=stack(b2),
             g1=stack(g1), be1=stack(be1), g2=stack(g2), be2=stack(be2))
    return p


# --------------------------------------------------------------------------- #
# Wrapper: single pallas_call, batch-tiled grid ("parallel" -> both TCs on v7x)
# --------------------------------------------------------------------------- #
def transformer_classifier_forward(params, x, masks, *, num_heads,
                                   compute_dtype=jnp.bfloat16, batch_tile=None):
    B, S, Din = x.shape
    E = params["emb_w"].shape[1]
    F = params["w1"].shape[2]
    L = params["wqkv"].shape[0]
    H = num_heads
    cd = compute_dtype

    # --- batch tiling: aim for M = Bt*S >= 256 MXU rows per step, but keep >= 2 grid
    #     steps when the batch allows so v7x's two TensorCores both get work. ---
    if batch_tile is None:
        bt = max(1, min(B, pl.cdiv(256, S)))
        if pl.cdiv(B, bt) < 2 and B >= 2:
            bt = pl.cdiv(B, 2)
    else:
        bt = batch_tile
    n_steps = pl.cdiv(B, bt)
    B_pad = n_steps * bt
    if B_pad != B:
        x = jnp.pad(x, ((0, B_pad - B), (0, 0), (0, 0)))
        masks = jnp.pad(masks, ((0, B_pad - B), (0, 0)))   # padded rows fully masked

    # key_padding_mask = (1 - masks).bool() -> additive bias 0 (valid) / -1e30 (ignore),
    # computed ONCE per forward; broadcast (never tiled over heads) inside the kernel.
    kbias = jnp.where(masks > 0.5, 0.0, -1e30).astype(jnp.float32).reshape(B_pad, 1, S)

    # --- matmul weights pre-cast to compute_dtype (halves DMA bytes + VMEM residency);
    #     biases / LayerNorm params / pos enc stay f32 and are added to f32 accumulators ---
    emb_w = params["emb_w"].astype(cd)
    wqkv = params["wqkv"].astype(cd)
    wo = params["wo"].astype(cd)
    w1 = params["w1"].astype(cd)
    w2 = params["w2"].astype(cd)
    featw_pad = jnp.zeros((E, OUT_PAD), cd).at[:, :NUM_CLASSES].set(
        params["feat_w"].astype(cd))
    featb_pad = jnp.zeros((1, OUT_PAD), jnp.float32).at[:, :NUM_CLASSES].set(
        params["feat_b"])

    unroll = True if L <= 4 else 2    # partial unroll for deep stacks (limit vreg pressure)
    kernel = functools.partial(fused_transformer_kernel, num_heads=H,
                               num_layers=L, compute_dtype=cd, unroll=unroll)

    # --- specs: weights are grid-invariant -> single-buffer them (Buffered(1)). ---
    def weight_spec(shape, single_buffer):
        idx = lambda b: (0,) * len(shape)
        if single_buffer:
            try:
                return pl.BlockSpec(shape, idx, pipeline_mode=pl.Buffered(1))
            except (TypeError, AttributeError):
                return pl.BlockSpec(shape, idx)
        return pl.BlockSpec(shape, idx)

    def build_specs(single_buffer):
        return [
            pl.BlockSpec((bt, S, Din), lambda b: (b, 0, 0)),       # x
            pl.BlockSpec((bt, 1, S), lambda b: (b, 0, 0)),         # key-padding bias
            weight_spec((Din, E), single_buffer),                  # emb_w
            weight_spec((1, E), single_buffer),                    # emb_b
            weight_spec((S, E), single_buffer),                    # pos
            weight_spec((L, E, 3 * E), single_buffer),             # wqkv
            weight_spec((L, 1, 3 * E), single_buffer),             # bqkv
            weight_spec((L, E, E), single_buffer),                 # wo
            weight_spec((L, 1, E), single_buffer),                 # bo
            weight_spec((L, 1, E), single_buffer),                 # g1
            weight_spec((L, 1, E), single_buffer),                 # be1
            weight_spec((L, E, F), single_buffer),                 # w1
            weight_spec((L, 1, F), single_buffer),                 # b1
            weight_spec((L, F, E), single_buffer),                 # w2
            weight_spec((L, 1, E), single_buffer),                 # b2
            weight_spec((L, 1, E), single_buffer),                 # g2
            weight_spec((L, 1, E), single_buffer),                 # be2
            weight_spec((E, OUT_PAD), single_buffer),              # feat_w (padded)
            weight_spec((1, OUT_PAD), single_buffer),              # feat_b (padded)
        ]

    out_spec = pl.BlockSpec((bt, 1, OUT_PAD), lambda b: (b, 0, 0))

    # --- VMEM budget (v5e default scoped limit is only 16 MiB) ---
    wbytes = int((emb_w.size + wqkv.size + wo.size + w1.size + w2.size
                  + featw_pad.size) * jnp.dtype(cd).itemsize
                 + (params["bqkv"].size + params["bo"].size + params["b1"].size
                    + params["b2"].size + 4 * L * E + params["emb_b"].size
                    + params["pos"].size + OUT_PAD) * 4)
    act_bytes = bt * S * (3 * E + F + 4 * E) * 4
    attn_bytes = 2 * H * bt * S * S * 4
    io_bytes = 2 * (bt * S * Din + bt * S + bt * OUT_PAD) * 4
    vmem_limit = int(min(max(2 * wbytes + act_bytes + attn_bytes + io_bytes + (4 << 20),
                             32 << 20), 64 << 20))

    # --- cost estimate: lets XLA schedule surrounding ops around this long fused kernel ---
    Mtot = B_pad * S
    flops = (2 * Mtot * (Din * E + L * (3 * E * E + E * E + 2 * E * F))
             + 2 * L * B_pad * S * S * 2 * E + 2 * B_pad * E * OUT_PAD)
    cost = pl.CostEstimate(flops=int(flops),
                           transcendentals=int(L * B_pad * H * S * S),
                           bytes_accessed=int(wbytes + x.size * 4 + kbias.size * 4
                                              + B_pad * OUT_PAD * 4))

    def call(in_specs):
        return pl.pallas_call(
            kernel,
            out_shape=jax.ShapeDtypeStruct((B_pad, 1, OUT_PAD), jnp.float32),
            grid=(n_steps,),
            in_specs=in_specs,
            out_specs=out_spec,
            compiler_params=pltpu.CompilerParams(
                dimension_semantics=("parallel",),     # v7x: the two TCs split the batch
                vmem_limit_bytes=vmem_limit),
            cost_estimate=cost,
        )(x, kbias, emb_w, params["emb_b"], params["pos"],
          wqkv, params["bqkv"], wo, params["bo"],
          params["g1"], params["be1"], w1, params["b1"],
          w2, params["b2"], params["g2"], params["be2"],
          featw_pad, featb_pad)

    try:
        out = call(build_specs(single_buffer=True))
    except Exception:
        # Fallback if this JAX build rejects pipeline_mode=pl.Buffered(1) on weight specs.
        out = call(build_specs(single_buffer=False))

    return out.reshape(B_pad, OUT_PAD)[:B, :NUM_CLASSES]


if __name__ == "__main__":
    # Small shapes consistent with the module's forward
    B, S, D_IN = 2, 8, 16
    EMBED, HEADS, FFN, LAYERS = 32, 4, 64, 2

    key = jax.random.PRNGKey(0)
    k_x, k_p = jax.random.split(key)

    x = jax.random.normal(k_x, (B, S, D_IN), jnp.float32)
    # masks: 1 = valid token, 0 = padding (key_padding_mask = (1 - masks).bool())
    masks = jnp.ones((B, S), jnp.float32)
    masks = masks.at[0, -2:].set(0.0)   # pad the last two positions of batch 0

    params = init_params(k_p, D_IN, S, EMBED, HEADS, FFN, LAYERS)

    # compute_dtype defaults to bf16 (MXU peak path; f32 accumulation / LN / softmax stats).
    out = transformer_classifier_forward(params, x, masks, num_heads=HEADS)
    jax.block_until_ready(out)
    assert out.shape == (B, NUM_CLASSES) and out.dtype == jnp.float32
    assert bool(jnp.all(jnp.isfinite(out)))
    print("KERNEL_OK")
</pallas_src>

<mosaic_0001>
module attributes {stable_mosaic.version = 11 : i64} {
  func.func @fused_transformer_kernel(%arg0: i32, %arg1: memref<1x8x16xf32, #tpu.memory_space<vmem>>, %arg2: memref<1x1x8xf32, #tpu.memory_space<vmem>>, %arg3: memref<16x32xbf16, #tpu.memory_space<vmem>>, %arg4: memref<1x32xf32, #tpu.memory_space<vmem>>, %arg5: memref<8x32xf32, #tpu.memory_space<vmem>>, %arg6: memref<2x32x96xbf16, #tpu.memory_space<vmem>>, %arg7: memref<2x1x96xf32, #tpu.memory_space<vmem>>, %arg8: memref<2x32x32xbf16, #tpu.memory_space<vmem>>, %arg9: memref<2x1x32xf32, #tpu.memory_space<vmem>>, %arg10: memref<2x1x32xf32, #tpu.memory_space<vmem>>, %arg11: memref<2x1x32xf32, #tpu.memory_space<vmem>>, %arg12: memref<2x32x64xbf16, #tpu.memory_space<vmem>>, %arg13: memref<2x1x64xf32, #tpu.memory_space<vmem>>, %arg14: memref<2x64x32xbf16, #tpu.memory_space<vmem>>, %arg15: memref<2x1x32xf32, #tpu.memory_space<vmem>>, %arg16: memref<2x1x32xf32, #tpu.memory_space<vmem>>, %arg17: memref<2x1x32xf32, #tpu.memory_space<vmem>>, %arg18: memref<32x128xbf16, #tpu.memory_space<vmem>>, %arg19: memref<1x128xf32, #tpu.memory_space<vmem>>, %arg20: memref<1x1x128xf32, #tpu.memory_space<vmem>>) attributes {dimension_semantics = [#tpu.dimension_semantics<parallel>], iteration_bounds = array<i64: 2>, scalar_prefetch = 0 : i64, scratch_operands = 0 : i64, tpu.core_type = #tpu.core_type<tc>, window_params = [{transform_indices = @transform_0, window_bounds = array<i64: 1, 8, 16>}, {transform_indices = @transform_1, window_bounds = array<i64: 1, 1, 8>}, {pipeline_mode = #tpu.pipeline_mode<synchronous>, transform_indices = @transform_2, window_bounds = array<i64: 16, 32>}, {pipeline_mode = #tpu.pipeline_mode<synchronous>, transform_indices = @transform_3, window_bounds = array<i64: 1, 32>}, {pipeline_mode = #tpu.pipeline_mode<synchronous>, transform_indices = @transform_4, window_bounds = array<i64: 8, 32>}, {pipeline_mode = #tpu.pipeline_mode<synchronous>, transform_indices = @transform_5, window_bounds = array<i64: 2, 32, 96>}, {pipeline_mode = #tpu.pipeline_mode<synchronous>, transform_indices = @transform_6, window_bounds = array<i64: 2, 1, 96>}, {pipeline_mode = #tpu.pipeline_mode<synchronous>, transform_indices = @transform_7, window_bounds = array<i64: 2, 32, 32>}, {pipeline_mode = #tpu.pipeline_mode<synchronous>, transform_indices = @transform_8, window_bounds = array<i64: 2, 1, 32>}, {pipeline_mode = #tpu.pipeline_mode<synchronous>, transform_indices = @transform_9, window_bounds = array<i64: 2, 1, 32>}, {pipeline_mode = #tpu.pipeline_mode<synchronous>, transform_indices = @transform_10, window_bounds = array<i64: 2, 1, 32>}, {pipeline_mode = #tpu.pipeline_mode<synchronous>, transform_indices = @transform_11, window_bounds = array<i64: 2, 32, 64>}, {pipeline_mode = #tpu.pipeline_mode<synchronous>, transform_indices = @transform_12, window_bounds = array<i64: 2, 1, 64>}, {pipeline_mode = #tpu.pipeline_mode<synchronous>, transform_indices = @transform_13, window_bounds = array<i64: 2, 64, 32>}, {pipeline_mode = #tpu.pipeline_mode<synchronous>, transform_indices = @transform_14, window_bounds = array<i64: 2, 1, 32>}, {pipeline_mode = #tpu.pipeline_mode<synchronous>, transform_indices = @transform_15, window_bounds = array<i64: 2, 1, 32>}, {pipeline_mode = #tpu.pipeline_mode<synchronous>, transform_indices = @transform_16, window_bounds = array<i64: 2, 1, 32>}, {pipeline_mode = #tpu.pipeline_mode<synchronous>, transform_indices = @transform_17, window_bounds = array<i64: 32, 128>}, {pipeline_mode = #tpu.pipeline_mode<synchronous>, transform_indices = @transform_18, window_bounds = array<i64: 1, 128>}, {transform_indices = @transform_19, window_bounds = array<i64: 1, 1, 128>}]} {
    %c0 = arith.constant 0 : index
    %c0_0 = arith.constant 0 : index
    %c0_1 = arith.constant 0 : index
    %0 = vector.load %arg1[%c0, %c0_0, %c0_1] : memref<1x8x16xf32, #tpu.memory_space<vmem>>, vector<1x8x16xf32>
    %1 = vector.shape_cast %0 : vector<1x8x16xf32> to vector<8x16xf32>
    %c0_2 = arith.constant 0 : index
    %c0_3 = arith.constant 0 : index
    %2 = vector.load %arg3[%c0_2, %c0_3] : memref<16x32xbf16, #tpu.memory_space<vmem>>, vector<16x32xbf16>
    %3 = arith.truncf %1 : vector<8x16xf32> to vector<8x16xbf16>
    %cst = arith.constant dense<0.000000e+00> : vector<8x32xf32>
    %4 = tpu.matmul %3, %2, %cst {dimension_numbers = #tpu.dot_dimension_numbers<[1], [0], [0], [1], [0, 0, 1, 1], [], []>} : vector<8x16xbf16>, vector<16x32xbf16>, vector<8x32xf32> -> vector<8x32xf32>
    %c0_4 = arith.constant 0 : index
    %c0_5 = arith.constant 0 : index
    %5 = vector.load %arg4[%c0_4, %c0_5] : memref<1x32xf32, #tpu.memory_space<vmem>>, vector<1x32xf32>
    %6 = vector.broadcast %5 : vector<1x32xf32> to vector<8x32xf32>
    %7 = arith.addf %4, %6 : vector<8x32xf32>
    %8 = vector.shape_cast %7 : vector<8x32xf32> to vector<1x8x32xf32>
    %c0_6 = arith.constant 0 : index
    %c0_7 = arith.constant 0 : index
    %9 = vector.load %arg5[%c0_6, %c0_7] : memref<8x32xf32, #tpu.memory_space<vmem>>, vector<8x32xf32>
    %10 = vector.shape_cast %9 : vector<8x32xf32> to vector<1x8x32xf32>
    %11 = arith.addf %8, %10 : vector<1x8x32xf32>
    %12 = vector.shape_cast %11 : vector<1x8x32xf32> to vector<8x32xf32>
    %c0_8 = arith.constant 0 : index
    %c0_9 = arith.constant 0 : index
    %c0_10 = arith.constant 0 : index
    %13 = vector.load %arg2[%c0_8, %c0_9, %c0_10] : memref<1x1x8xf32, #tpu.memory_space<vmem>>, vector<1x1x8xf32>
    %14 = vector.shape_cast %13 : vector<1x1x8xf32> to vector<1x1x1x8xf32>
    %c0_i32 = arith.constant 0 : i32
    %15 = arith.index_cast %c0_i32 : i32 to index
    %c0_11 = arith.constant 0 : index
    %c0_12 = arith.constant 0 : index
    %16 = vector.load %arg6[%15, %c0_11, %c0_12] : memref<2x32x96xbf16, #tpu.memory_space<vmem>>, vector<1x32x96xbf16>
    %17 = vector.shape_cast %16 : vector<1x32x96xbf16> to vector<32x96xbf16>
    %18 = arith.truncf %12 : vector<8x32xf32> to vector<8x32xbf16>
    %cst_13 = arith.constant dense<0.000000e+00> : vector<8x96xf32>
    %19 = tpu.matmul %18, %17, %cst_13 {dimension_numbers = #tpu.dot_dimension_numbers<[1], [0], [0], [1], [0, 0, 1, 1], [], []>} : vector<8x32xbf16>, vector<32x96xbf16>, vector<8x96xf32> -> vector<8x96xf32>
    %20 = arith.index_cast %c0_i32 : i32 to index
    %c0_14 = arith.constant 0 : index
    %c0_15 = arith.constant 0 : index
    %21 = vector.load %arg7[%20, %c0_14, %c0_15] : memref<2x1x96xf32, #tpu.memory_space<vmem>>, vector<1x1x96xf32>
    %22 = vector.shape_cast %21 : vector<1x1x96xf32> to vector<1x96xf32>
    %23 = vector.broadcast %22 : vector<1x96xf32> to vector<8x96xf32>
    %24 = arith.addf %19, %23 : vector<8x96xf32>
    %25 = vector.extract_strided_slice %24 {offsets = [0, 0], sizes = [8, 32], strides = [1, 1]} : vector<8x96xf32> to vector<8x32xf32>
    %26 = vector.shape_cast %25 : vector<8x32xf32> to vector<1x8x4x8xf32>
    %27 = tpu.transpose %26, [0, 2, 1, 3] : vector<1x8x4x8xf32> -> vector<1x4x8x8xf32>
    %28 = vector.shape_cast %27 : vector<1x4x8x8xf32> to vector<4x8x8xf32>
    %29 = arith.truncf %28 : vector<4x8x8xf32> to vector<4x8x8xbf16>
    %30 = vector.extract_strided_slice %24 {offsets = [0, 32], sizes = [8, 32], strides = [1, 1]} : vector<8x96xf32> to vector<8x32xf32>
    %31 = vector.shape_cast %30 : vector<8x32xf32> to vector<1x8x4x8xf32>
    %32 = tpu.transpose %31, [0, 2, 1, 3] : vector<1x8x4x8xf32> -> vector<1x4x8x8xf32>
    %33 = vector.shape_cast %32 : vector<1x4x8x8xf32> to vector<4x8x8xf32>
    %34 = arith.truncf %33 : vector<4x8x8xf32> to vector<4x8x8xbf16>
    %35 = vector.extract_strided_slice %24 {offsets = [0, 64], sizes = [8, 32], strides = [1, 1]} : vector<8x96xf32> to vector<8x32xf32>
    %36 = vector.shape_cast %35 : vector<8x32xf32> to vector<1x8x4x8xf32>
    %37 = tpu.transpose %36, [0, 2, 1, 3] : vector<1x8x4x8xf32> -> vector<1x4x8x8xf32>
    %38 = vector.shape_cast %37 : vector<1x4x8x8xf32> to vector<4x8x8xf32>
    %39 = arith.truncf %38 : vector<4x8x8xf32> to vector<4x8x8xbf16>
    "tpu.trace_start"() <{level = 10 : i32, message = "bqd,bkd->bqk"}> : () -> ()
    %cst_16 = arith.constant dense<0.000000e+00> : vector<4x8x8xf32>
    %40 = tpu.matmul %29, %34, %cst_16 {dimension_numbers = #tpu.dot_dimension_numbers<[2], [2], [1], [1], [0, 0, 0, 1, 1, 1], [0], [0]>} : vector<4x8x8xbf16>, vector<4x8x8xbf16>, vector<4x8x8xf32> -> vector<4x8x8xf32>
    "tpu.trace_stop"() : () -> ()
    %cst_17 = arith.constant 0.353553385 : f32
    %41 = vector.broadcast %cst_17 : f32 to vector<4x8x8xf32>
    %42 = arith.mulf %40, %41 : vector<4x8x8xf32>
    %43 = vector.shape_cast %42 : vector<4x8x8xf32> to vector<1x4x8x8xf32>
    %44 = vector.broadcast %14 : vector<1x1x1x8xf32> to vector<1x4x8x8xf32>
    %45 = arith.addf %43, %44 : vector<1x4x8x8xf32>
    %46 = vector.shape_cast %45 : vector<1x4x8x8xf32> to vector<4x8x8xf32>
    %cst_18 = arith.constant dense<0xFF800000> : vector<4x8xf32>
    %47 = vector.multi_reduction <maximumf>, %46, %cst_18 [2] : vector<4x8x8xf32> to vector<4x8xf32>
    %48 = vector.shape_cast %47 : vector<4x8xf32> to vector<4x8x1xf32>
    %49 = vector.broadcast %48 : vector<4x8x1xf32> to vector<4x8x8xf32>
    %50 = arith.subf %46, %49 : vector<4x8x8xf32>
    %51 = math.exp %50 : vector<4x8x8xf32>
    %cst_19 = arith.constant dense<0.000000e+00> : vector<4x8xf32>
    %52 = vector.multi_reduction <add>, %51, %cst_19 [2] : vector<4x8x8xf32> to vector<4x8xf32>
    %53 = vector.shape_cast %52 : vector<4x8xf32> to vector<4x8x1xf32>
    %54 = tpu.reciprocal %53 {approx = true} : vector<4x8x1xf32> -> vector<4x8x1xf32>
    %55 = vector.broadcast %54 : vector<4x8x1xf32> to vector<4x8x8xf32>
    %56 = arith.mulf %51, %55 : vector<4x8x8xf32>
    %57 = arith.truncf %56 : vector<4x8x8xf32> to vector<4x8x8xbf16>
    "tpu.trace_start"() <{level = 10 : i32, message = "bqk,bkd->bqd"}> : () -> ()
    %cst_20 = arith.constant dense<0.000000e+00> : vector<4x8x8xf32>
    %58 = tpu.matmul %57, %39, %cst_20 {dimension_numbers = #tpu.dot_dimension_numbers<[2], [1], [1], [2], [0, 0, 0, 1, 1, 2], [0], [0]>} : vector<4x8x8xbf16>, vector<4x8x8xbf16>, vector<4x8x8xf32> -> vector<4x8x8xf32>
    "tpu.trace_stop"() : () -> ()
    %59 = vector.shape_cast %58 : vector<4x8x8xf32> to vector<1x4x8x8xf32>
    %60 = tpu.transpose %59, [0, 2, 1, 3] : vector<1x4x8x8xf32> -> vector<1x8x4x8xf32>
    %61 = vector.shape_cast %60 : vector<1x8x4x8xf32> to vector<8x32xf32>
    %62 = arith.index_cast %c0_i32 : i32 to index
    %c0_21 = arith.constant 0 : index
    %c0_22 = arith.constant 0 : index
    %63 = vector.load %arg8[%62, %c0_21, %c0_22] : memref<2x32x32xbf16, #tpu.memory_space<vmem>>, vector<1x32x32xbf16>
    %64 = vector.shape_cast %63 : vector<1x32x32xbf16> to vector<32x32xbf16>
    %65 = arith.truncf %61 : vector<8x32xf32> to vector<8x32xbf16>
    %cst_23 = arith.constant dense<0.000000e+00> : vector<8x32xf32>
    %66 = tpu.matmul %65, %64, %cst_23 {dimension_numbers = #tpu.dot_dimension_numbers<[1], [0], [0], [1], [0, 0, 1, 1], [], []>} : vector<8x32xbf16>, vector<32x32xbf16>, vector<8x32xf32> -> vector<8x32xf32>
    %67 = arith.index_cast %c0_i32 : i32 to index
    %c0_24 = arith.constant 0 : index
    %c0_25 = arith.constant 0 : index
    %68 = vector.load %arg9[%67, %c0_24, %c0_25] : memref<2x1x32xf32, #tpu.memory_space<vmem>>, vector<1x1x32xf32>
    %69 = vector.shape_cast %68 : vector<1x1x32xf32> to vector<1x32xf32>
    %70 = vector.broadcast %69 : vector<1x32xf32> to vector<8x32xf32>
    %71 = arith.addf %66, %70 : vector<8x32xf32>
    %72 = arith.addf %12, %71 : vector<8x32xf32>
    %73 = arith.index_cast %c0_i32 : i32 to index
    %c0_26 = arith.constant 0 : index
    %c0_27 = arith.constant 0 : index
    %74 = vector.load %arg10[%73, %c0_26, %c0_27] : memref<2x1x32xf32, #tpu.memory_space<vmem>>, vector<1x1x32xf32>
    %75 = vector.shape_cast %74 : vector<1x1x32xf32> to vector<1x32xf32>
    %76 = arith.index_cast %c0_i32 : i32 to index
    %c0_28 = arith.constant 0 : index
    %c0_29 = arith.constant 0 : index
    %77 = vector.load %arg11[%76, %c0_28, %c0_29] : memref<2x1x32xf32, #tpu.memory_space<vmem>>, vector<1x1x32xf32>
    %78 = vector.shape_cast %77 : vector<1x1x32xf32> to vector<1x32xf32>
    %cst_30 = arith.constant dense<0.000000e+00> : vector<8xf32>
    %79 = vector.multi_reduction <add>, %72, %cst_30 [1] : vector<8x32xf32> to vector<8xf32>
    %80 = vector.shape_cast %79 : vector<8xf32> to vector<8x1xf32>
    %cst_31 = arith.constant 3.200000e+01 : f32
    %81 = vector.broadcast %cst_31 : f32 to vector<8x1xf32>
    %82 = arith.divf %80, %81 : vector<8x1xf32>
    %83 = vector.broadcast %82 : vector<8x1xf32> to vector<8x32xf32>
    %84 = arith.subf %72, %83 : vector<8x32xf32>
    %85 = arith.mulf %84, %84 : vector<8x32xf32>
    %cst_32 = arith.constant dense<0.000000e+00> : vector<8xf32>
    %86 = vector.multi_reduction <add>, %85, %cst_32 [1] : vector<8x32xf32> to vector<8xf32>
    %87 = vector.shape_cast %86 : vector<8xf32> to vector<8x1xf32>
    %cst_33 = arith.constant 3.200000e+01 : f32
    %88 = vector.broadcast %cst_33 : f32 to vector<8x1xf32>
    %89 = arith.divf %87, %88 : vector<8x1xf32>
    %cst_34 = arith.constant 9.99999974E-6 : f32
    %90 = vector.broadcast %cst_34 : f32 to vector<8x1xf32>
    %91 = arith.addf %89, %90 : vector<8x1xf32>
    %92 = math.rsqrt %91 : vector<8x1xf32>
    %93 = vector.broadcast %92 : vector<8x1xf32> to vector<8x32xf32>
    %94 = arith.mulf %84, %93 : vector<8x32xf32>
    %95 = vector.broadcast %75 : vector<1x32xf32> to vector<8x32xf32>
    %96 = arith.mulf %94, %95 : vector<8x32xf32>
    %97 = vector.broadcast %78 : vector<1x32xf32> to vector<8x32xf32>
    %98 = arith.addf %96, %97 : vector<8x32xf32>
    %99 = arith.index_cast %c0_i32 : i32 to index
    %c0_35 = arith.constant 0 : index
    %c0_36 = arith.constant 0 : index
    %100 = vector.load %arg12[%99, %c0_35, %c0_36] : memref<2x32x64xbf16, #tpu.memory_space<vmem>>, vector<1x32x64xbf16>
    %101 = vector.shape_cast %100 : vector<1x32x64xbf16> to vector<32x64xbf16>
    %102 = arith.truncf %98 : vector<8x32xf32> to vector<8x32xbf16>
    %cst_37 = arith.constant dense<0.000000e+00> : vector<8x64xf32>
    %103 = tpu.matmul %102, %101, %cst_37 {dimension_numbers = #tpu.dot_dimension_numbers<[1], [0], [0], [1], [0, 0, 1, 1], [], []>} : vector<8x32xbf16>, vector<32x64xbf16>, vector<8x64xf32> -> vector<8x64xf32>
    %104 = arith.index_cast %c0_i32 : i32 to index
    %c0_38 = arith.constant 0 : index
    %c0_39 = arith.constant 0 : index
    %105 = vector.load %arg13[%104, %c0_38, %c0_39] : memref<2x1x64xf32, #tpu.memory_space<vmem>>, vector<1x1x64xf32>
    %106 = vector.shape_cast %105 : vector<1x1x64xf32> to vector<1x64xf32>
    %107 = vector.broadcast %106 : vector<1x64xf32> to vector<8x64xf32>
    %108 = arith.addf %103, %107 : vector<8x64xf32>
    %cst_40 = arith.constant 0.000000e+00 : f32
    %109 = vector.broadcast %cst_40 : f32 to vector<8x64xf32>
    %110 = arith.maximumf %108, %109 : vector<8x64xf32>
    %111 = arith.index_cast %c0_i32 : i32 to index
    %c0_41 = arith.constant 0 : index
    %c0_42 = arith.constant 0 : index
    %112 = vector.load %arg14[%111, %c0_41, %c0_42] : memref<2x64x32xbf16, #tpu.memory_space<vmem>>, vector<1x64x32xbf16>
    %113 = vector.shape_cast %112 : vector<1x64x32xbf16> to vector<64x32xbf16>
    %114 = arith.truncf %110 : vector<8x64xf32> to vector<8x64xbf16>
    %cst_43 = arith.constant dense<0.000000e+00> : vector<8x32xf32>
    %115 = tpu.matmul %114, %113, %cst_43 {dimension_numbers = #tpu.dot_dimension_numbers<[1], [0], [0], [1], [0, 0, 1, 1], [], []>} : vector<8x64xbf16>, vector<64x32xbf16>, vector<8x32xf32> -> vector<8x32xf32>
    %116 = arith.index_cast %c0_i32 : i32 to index
    %c0_44 = arith.constant 0 : index
    %c0_45 = arith.constant 0 : index
    %117 = vector.load %arg15[%116, %c0_44, %c0_45] : memref<2x1x32xf32, #tpu.memory_space<vmem>>, vector<1x1x32xf32>
    %118 = vector.shape_cast %117 : vector<1x1x32xf32> to vector<1x32xf32>
    %119 = vector.broadcast %118 : vector<1x32xf32> to vector<8x32xf32>
    %120 = arith.addf %115, %119 : vector<8x32xf32>
    %121 = arith.addf %98, %120 : vector<8x32xf32>
    %122 = arith.index_cast %c0_i32 : i32 to index
    %c0_46 = arith.constant 0 : index
    %c0_47 = arith.constant 0 : index
    %123 = vector.load %arg16[%122, %c0_46, %c0_47] : memref<2x1x32xf32, #tpu.memory_space<vmem>>, vector<1x1x32xf32>
    %124 = vector.shape_cast %123 : vector<1x1x32xf32> to vector<1x32xf32>
    %125 = arith.index_cast %c0_i32 : i32 to index
    %c0_48 = arith.constant 0 : index
    %c0_49 = arith.constant 0 : index
    %126 = vector.load %arg17[%125, %c0_48, %c0_49] : memref<2x1x32xf32, #tpu.memory_space<vmem>>, vector<1x1x32xf32>
    %127 = vector.shape_cast %126 : vector<1x1x32xf32> to vector<1x32xf32>
    %cst_50 = arith.constant dense<0.000000e+00> : vector<8xf32>
    %128 = vector.multi_reduction <add>, %121, %cst_50 [1] : vector<8x32xf32> to vector<8xf32>
    %129 = vector.shape_cast %128 : vector<8xf32> to vector<8x1xf32>
    %cst_51 = arith.constant 3.200000e+01 : f32
    %130 = vector.broadcast %cst_51 : f32 to vector<8x1xf32>
    %131 = arith.divf %129, %130 : vector<8x1xf32>
    %132 = vector.broadcast %131 : vector<8x1xf32> to vector<8x32xf32>
    %133 = arith.subf %121, %132 : vector<8x32xf32>
    %134 = arith.mulf %133, %133 : vector<8x32xf32>
    %cst_52 = arith.constant dense<0.000000e+00> : vector<8xf32>
    %135 = vector.multi_reduction <add>, %134, %cst_52 [1] : vector<8x32xf32> to vector<8xf32>
    %136 = vector.shape_cast %135 : vector<8xf32> to vector<8x1xf32>
    %cst_53 = arith.constant 3.200000e+01 : f32
    %137 = vector.broadcast %cst_53 : f32 to vector<8x1xf32>
    %138 = arith.divf %136, %137 : vector<8x1xf32>
    %cst_54 = arith.constant 9.99999974E-6 : f32
    %139 = vector.broadcast %cst_54 : f32 to vector<8x1xf32>
    %140 = arith.addf %138, %139 : vector<8x1xf32>
    %141 = math.rsqrt %140 : vector<8x1xf32>
    %142 = vector.broadcast %141 : vector<8x1xf32> to vector<8x32xf32>
    %143 = arith.mulf %133, %142 : vector<8x32xf32>
    %144 = vector.broadcast %124 : vector<1x32xf32> to vector<8x32xf32>
    %145 = arith.mulf %143, %144 : vector<8x32xf32>
    %146 = vector.broadcast %127 : vector<1x32xf32> to vector<8x32xf32>
    %147 = arith.addf %145, %146 : vector<8x32xf32>
    %c1_i32 = arith.constant 1 : i32
    %148 = arith.index_cast %c1_i32 : i32 to index
    %c0_55 = arith.constant 0 : index
    %c0_56 = arith.constant 0 : index
    %149 = vector.load %arg6[%148, %c0_55, %c0_56] : memref<2x32x96xbf16, #tpu.memory_space<vmem>>, vector<1x32x96xbf16>
    %150 = vector.shape_cast %149 : vector<1x32x96xbf16> to vector<32x96xbf16>
    %151 = arith.truncf %147 : vector<8x32xf32> to vector<8x32xbf16>
    %cst_57 = arith.constant dense<0.000000e+00> : vector<8x96xf32>
    %152 = tpu.matmul %151, %150, %cst_57 {dimension_numbers = #tpu.dot_dimension_numbers<[1], [0], [0], [1], [0, 0, 1, 1], [], []>} : vector<8x32xbf16>, vector<32x96xbf16>, vector<8x96xf32> -> vector<8x96xf32>
    %153 = arith.index_cast %c1_i32 : i32 to index
    %c0_58 = arith.constant 0 : index
    %c0_59 = arith.constant 0 : index
    %154 = vector.load %arg7[%153, %c0_58, %c0_59] : memref<2x1x96xf32, #tpu.memory_space<vmem>>, vector<1x1x96xf32>
    %155 = vector.shape_cast %154 : vector<1x1x96xf32> to vector<1x96xf32>
    %156 = vector.broadcast %155 : vector<1x96xf32> to vector<8x96xf32>
    %157 = arith.addf %152, %156 : vector<8x96xf32>
    %158 = vector.extract_strided_slice %157 {offsets = [0, 0], sizes = [8, 32], strides = [1, 1]} : vector<8x96xf32> to vector<8x32xf32>
    %159 = vector.shape_cast %158 : vector<8x32xf32> to vector<1x8x4x8xf32>
    %160 = tpu.transpose %159, [0, 2, 1, 3] : vector<1x8x4x8xf32> -> vector<1x4x8x8xf32>
    %161 = vector.shape_cast %160 : vector<1x4x8x8xf32> to vector<4x8x8xf32>
    %162 = arith.truncf %161 : vector<4x8x8xf32> to vector<4x8x8xbf16>
    %163 = vector.extract_strided_slice %157 {offsets = [0, 32], sizes = [8, 32], strides = [1, 1]} : vector<8x96xf32> to vector<8x32xf32>
    %164 = vector.shape_cast %163 : vector<8x32xf32> to vector<1x8x4x8xf32>
    %165 = tpu.transpose %164, [0, 2, 1, 3] : vector<1x8x4x8xf32> -> vector<1x4x8x8xf32>
    %166 = vector.shape_cast %165 : vector<1x4x8x8xf32> to vector<4x8x8xf32>
    %167 = arith.truncf %166 : vector<4x8x8xf32> to vector<4x8x8xbf16>
    %168 = vector.extract_strided_slice %157 {offsets = [0, 64], sizes = [8, 32], strides = [1, 1]} : vector<8x96xf32> to vector<8x32xf32>
    %169 = vector.shape_cast %168 : vector<8x32xf32> to vector<1x8x4x8xf32>
    %170 = tpu.transpose %169, [0, 2, 1, 3] : vector<1x8x4x8xf32> -> vector<1x4x8x8xf32>
    %171 = vector.shape_cast %170 : vector<1x4x8x8xf32> to vector<4x8x8xf32>
    %172 = arith.truncf %171 : vector<4x8x8xf32> to vector<4x8x8xbf16>
    "tpu.trace_start"() <{level = 10 : i32, message = "bqd,bkd->bqk"}> : () -> ()
    %cst_60 = arith.constant dense<0.000000e+00> : vector<4x8x8xf32>
    %173 = tpu.matmul %162, %167, %cst_60 {dimension_numbers = #tpu.dot_dimension_numbers<[2], [2], [1], [1], [0, 0, 0, 1, 1, 1], [0], [0]>} : vector<4x8x8xbf16>, vector<4x8x8xbf16>, vector<4x8x8xf32> -> vector<4x8x8xf32>
    "tpu.trace_stop"() : () -> ()
    %cst_61 = arith.constant 0.353553385 : f32
    %174 = vector.broadcast %cst_61 : f32 to vector<4x8x8xf32>
    %175 = arith.mulf %173, %174 : vector<4x8x8xf32>
    %176 = vector.shape_cast %175 : vector<4x8x8xf32> to vector<1x4x8x8xf32>
    %177 = vector.broadcast %14 : vector<1x1x1x8xf32> to vector<1x4x8x8xf32>
    %178 = arith.addf %176, %177 : vector<1x4x8x8xf32>
    %179 = vector.shape_cast %178 : vector<1x4x8x8xf32> to vector<4x8x8xf32>
    %cst_62 = arith.constant dense<0xFF800000> : vector<4x8xf32>
    %180 = vector.multi_reduction <maximumf>, %179, %cst_62 [2] : vector<4x8x8xf32> to vector<4x8xf32>
    %181 = vector.shape_cast %180 : vector<4x8xf32> to vector<4x8x1xf32>
    %182 = vector.broadcast %181 : vector<4x8x1xf32> to vector<4x8x8xf32>
    %183 = arith.subf %179, %182 : vector<4x8x8xf32>
    %184 = math.exp %183 : vector<4x8x8xf32>
    %cst_63 = arith.constant dense<0.000000e+00> : vector<4x8xf32>
    %185 = vector.multi_reduction <add>, %184, %cst_63 [2] : vector<4x8x8xf32> to vector<4x8xf32>
    %186 = vector.shape_cast %185 : vector<4x8xf32> to vector<4x8x1xf32>
    %187 = tpu.reciprocal %186 {approx = true} : vector<4x8x1xf32> -> vector<4x8x1xf32>
    %188 = vector.broadcast %187 : vector<4x8x1xf32> to vector<4x8x8xf32>
    %189 = arith.mulf %184, %188 : vector<4x8x8xf32>
    %190 = arith.truncf %189 : vector<4x8x8xf32> to vector<4x8x8xbf16>
    "tpu.trace_start"() <{level = 10 : i32, message = "bqk,bkd->bqd"}> : () -> ()
    %cst_64 = arith.constant dense<0.000000e+00> : vector<4x8x8xf32>
    %191 = tpu.matmul %190, %172, %cst_64 {dimension_numbers = #tpu.dot_dimension_numbers<[2], [1], [1], [2], [0, 0, 0, 1, 1, 2], [0], [0]>} : vector<4x8x8xbf16>, vector<4x8x8xbf16>, vector<4x8x8xf32> -> vector<4x8x8xf32>
    "tpu.trace_stop"() : () -> ()
    %192 = vector.shape_cast %191 : vector<4x8x8xf32> to vector<1x4x8x8xf32>
    %193 = tpu.transpose %192, [0, 2, 1, 3] : vector<1x4x8x8xf32> -> vector<1x8x4x8xf32>
    %194 = vector.shape_cast %193 : vector<1x8x4x8xf32> to vector<8x32xf32>
    %195 = arith.index_cast %c1_i32 : i32 to index
    %c0_65 = arith.constant 0 : index
    %c0_66 = arith.constant 0 : index
    %196 = vector.load %arg8[%195, %c0_65, %c0_66] : memref<2x32x32xbf16, #tpu.memory_space<vmem>>, vector<1x32x32xbf16>
    %197 = vector.shape_cast %196 : vector<1x32x32xbf16> to vector<32x32xbf16>
    %198 = arith.truncf %194 : vector<8x32xf32> to vector<8x32xbf16>
    %cst_67 = arith.constant dense<0.000000e+00> : vector<8x32xf32>
    %199 = tpu.matmul %198, %197, %cst_67 {dimension_numbers = #tpu.dot_dimension_numbers<[1], [0], [0], [1], [0, 0, 1, 1], [], []>} : vector<8x32xbf16>, vector<32x32xbf16>, vector<8x32xf32> -> vector<8x32xf32>
    %200 = arith.index_cast %c1_i32 : i32 to index
    %c0_68 = arith.constant 0 : index
    %c0_69 = arith.constant 0 : index
    %201 = vector.load %arg9[%200, %c0_68, %c0_69] : memref<2x1x32xf32, #tpu.memory_space<vmem>>, vector<1x1x32xf32>
    %202 = vector.shape_cast %201 : vector<1x1x32xf32> to vector<1x32xf32>
    %203 = vector.broadcast %202 : vector<1x32xf32> to vector<8x32xf32>
    %204 = arith.addf %199, %203 : vector<8x32xf32>
    %205 = arith.addf %147, %204 : vector<8x32xf32>
    %206 = arith.index_cast %c1_i32 : i32 to index
    %c0_70 = arith.constant 0 : index
    %c0_71 = arith.constant 0 : index
    %207 = vector.load %arg10[%206, %c0_70, %c0_71] : memref<2x1x32xf32, #tpu.memory_space<vmem>>, vector<1x1x32xf32>
    %208 = vector.shape_cast %207 : vector<1x1x32xf32> to vector<1x32xf32>
    %209 = arith.index_cast %c1_i32 : i32 to index
    %c0_72 = arith.constant 0 : index
    %c0_73 = arith.constant 0 : index
    %210 = vector.load %arg11[%209, %c0_72, %c0_73] : memref<2x1x32xf32, #tpu.memory_space<vmem>>, vector<1x1x32xf32>
    %211 = vector.shape_cast %210 : vector<1x1x32xf32> to vector<1x32xf32>
    %cst_74 = arith.constant dense<0.000000e+00> : vector<8xf32>
    %212 = vector.multi_reduction <add>, %205, %cst_74 [1] : vector<8x32xf32> to vector<8xf32>
    %213 = vector.shape_cast %212 : vector<8xf32> to vector<8x1xf32>
    %cst_75 = arith.constant 3.200000e+01 : f32
    %214 = vector.broadcast %cst_75 : f32 to vector<8x1xf32>
    %215 = arith.divf %213, %214 : vector<8x1xf32>
    %216 = vector.broadcast %215 : vector<8x1xf32> to vector<8x32xf32>
    %217 = arith.subf %205, %216 : vector<8x32xf32>
    %218 = arith.mulf %217, %217 : vector<8x32xf32>
    %cst_76 = arith.constant dense<0.000000e+00> : vector<8xf32>
    %219 = vector.multi_reduction <add>, %218, %cst_76 [1] : vector<8x32xf32> to vector<8xf32>
    %220 = vector.shape_cast %219 : vector<8xf32> to vector<8x1xf32>
    %cst_77 = arith.constant 3.200000e+01 : f32
    %221 = vector.broadcast %cst_77 : f32 to vector<8x1xf32>
    %222 = arith.divf %220, %221 : vector<8x1xf32>
    %cst_78 = arith.constant 9.99999974E-6 : f32
    %223 = vector.broadcast %cst_78 : f32 to vector<8x1xf32>
    %224 = arith.addf %222, %223 : vector<8x1xf32>
    %225 = math.rsqrt %224 : vector<8x1xf32>
    %226 = vector.broadcast %225 : vector<8x1xf32> to vector<8x32xf32>
    %227 = arith.mulf %217, %226 : vector<8x32xf32>
    %228 = vector.broadcast %208 : vector<1x32xf32> to vector<8x32xf32>
    %229 = arith.mulf %227, %228 : vector<8x32xf32>
    %230 = vector.broadcast %211 : vector<1x32xf32> to vector<8x32xf32>
    %231 = arith.addf %229, %230 : vector<8x32xf32>
    %232 = arith.index_cast %c1_i32 : i32 to index
    %c0_79 = arith.constant 0 : index
    %c0_80 = arith.constant 0 : index
    %233 = vector.load %arg12[%232, %c0_79, %c0_80] : memref<2x32x64xbf16, #tpu.memory_space<vmem>>, vector<1x32x64xbf16>
    %234 = vector.shape_cast %233 : vector<1x32x64xbf16> to vector<32x64xbf16>
    %235 = arith.truncf %231 : vector<8x32xf32> to vector<8x32xbf16>
    %cst_81 = arith.constant dense<0.000000e+00> : vector<8x64xf32>
    %236 = tpu.matmul %235, %234, %cst_81 {dimension_numbers = #tpu.dot_dimension_numbers<[1], [0], [0], [1], [0, 0, 1, 1], [], []>} : vector<8x32xbf16>, vector<32x64xbf16>, vector<8x64xf32> -> vector<8x64xf32>
    %237 = arith.index_cast %c1_i32 : i32 to index
    %c0_82 = arith.constant 0 : index
    %c0_83 = arith.constant 0 : index
    %238 = vector.load %arg13[%237, %c0_82, %c0_83] : memref<2x1x64xf32, #tpu.memory_space<vmem>>, vector<1x1x64xf32>
    %239 = vector.shape_cast %238 : vector<1x1x64xf32> to vector<1x64xf32>
    %240 = vector.broadcast %239 : vector<1x64xf32> to vector<8x64xf32>
    %241 = arith.addf %236, %240 : vector<8x64xf32>
    %cst_84 = arith.constant 0.000000e+00 : f32
    %242 = vector.broadcast %cst_84 : f32 to vector<8x64xf32>
    %243 = arith.maximumf %241, %242 : vector<8x64xf32>
    %244 = arith.index_cast %c1_i32 : i32 to index
    %c0_85 = arith.constant 0 : index
    %c0_86 = arith.constant 0 : index
    %245 = vector.load %arg14[%244, %c0_85, %c0_86] : memref<2x64x32xbf16, #tpu.memory_space<vmem>>, vector<1x64x32xbf16>
    %246 = vector.shape_cast %245 : vector<1x64x32xbf16> to vector<64x32xbf16>
    %247 = arith.truncf %243 : vector<8x64xf32> to vector<8x64xbf16>
    %cst_87 = arith.constant dense<0.000000e+00> : vector<8x32xf32>
    %248 = tpu.matmul %247, %246, %cst_87 {dimension_numbers = #tpu.dot_dimension_numbers<[1], [0], [0], [1], [0, 0, 1, 1], [], []>} : vector<8x64xbf16>, vector<64x32xbf16>, vector<8x32xf32> -> vector<8x32xf32>
    %249 = arith.index_cast %c1_i32 : i32 to index
    %c0_88 = arith.constant 0 : index
    %c0_89 = arith.constant 0 : index
    %250 = vector.load %arg15[%249, %c0_88, %c0_89] : memref<2x1x32xf32, #tpu.memory_space<vmem>>, vector<1x1x32xf32>
    %251 = vector.shape_cast %250 : vector<1x1x32xf32> to vector<1x32xf32>
    %252 = vector.broadcast %251 : vector<1x32xf32> to vector<8x32xf32>
    %253 = arith.addf %248, %252 : vector<8x32xf32>
    %254 = arith.addf %231, %253 : vector<8x32xf32>
    %255 = arith.index_cast %c1_i32 : i32 to index
    %c0_90 = arith.constant 0 : index
    %c0_91 = arith.constant 0 : index
    %256 = vector.load %arg16[%255, %c0_90, %c0_91] : memref<2x1x32xf32, #tpu.memory_space<vmem>>, vector<1x1x32xf32>
    %257 = vector.shape_cast %256 : vector<1x1x32xf32> to vector<1x32xf32>
    %258 = arith.index_cast %c1_i32 : i32 to index
    %c0_92 = arith.constant 0 : index
    %c0_93 = arith.constant 0 : index
    %259 = vector.load %arg17[%258, %c0_92, %c0_93] : memref<2x1x32xf32, #tpu.memory_space<vmem>>, vector<1x1x32xf32>
    %260 = vector.shape_cast %259 : vector<1x1x32xf32> to vector<1x32xf32>
    %cst_94 = arith.constant dense<0.000000e+00> : vector<8xf32>
    %261 = vector.multi_reduction <add>, %254, %cst_94 [1] : vector<8x32xf32> to vector<8xf32>
    %262 = vector.shape_cast %261 : vector<8xf32> to vector<8x1xf32>
    %cst_95 = arith.constant 3.200000e+01 : f32
    %263 = vector.broadcast %cst_95 : f32 to vector<8x1xf32>
    %264 = arith.divf %262, %263 : vector<8x1xf32>
    %265 = vector.broadcast %264 : vector<8x1xf32> to vector<8x32xf32>
    %266 = arith.subf %254, %265 : vector<8x32xf32>
    %267 = arith.mulf %266, %266 : vector<8x32xf32>
    %cst_96 = arith.constant dense<0.000000e+00> : vector<8xf32>
    %268 = vector.multi_reduction <add>, %267, %cst_96 [1] : vector<8x32xf32> to vector<8xf32>
    %269 = vector.shape_cast %268 : vector<8xf32> to vector<8x1xf32>
    %cst_97 = arith.constant 3.200000e+01 : f32
    %270 = vector.broadcast %cst_97 : f32 to vector<8x1xf32>
    %271 = arith.divf %269, %270 : vector<8x1xf32>
    %cst_98 = arith.constant 9.99999974E-6 : f32
    %272 = vector.broadcast %cst_98 : f32 to vector<8x1xf32>
    %273 = arith.addf %271, %272 : vector<8x1xf32>
    %274 = math.rsqrt %273 : vector<8x1xf32>
    %275 = vector.broadcast %274 : vector<8x1xf32> to vector<8x32xf32>
    %276 = arith.mulf %266, %275 : vector<8x32xf32>
    %277 = vector.broadcast %257 : vector<1x32xf32> to vector<8x32xf32>
    %278 = arith.mulf %276, %277 : vector<8x32xf32>
    %279 = vector.broadcast %260 : vector<1x32xf32> to vector<8x32xf32>
    %280 = arith.addf %278, %279 : vector<8x32xf32>
    %c2_i32 = arith.constant 2 : i32
    %281 = vector.shape_cast %280 : vector<8x32xf32> to vector<1x8x32xf32>
    %cst_99 = arith.constant dense<0.000000e+00> : vector<1x32xf32>
    %282 = vector.multi_reduction <add>, %281, %cst_99 [1] : vector<1x8x32xf32> to vector<1x32xf32>
    %cst_100 = arith.constant 8.000000e+00 : f32
    %283 = vector.broadcast %cst_100 : f32 to vector<1x32xf32>
    %284 = arith.divf %282, %283 : vector<1x32xf32>
    %c0_101 = arith.constant 0 : index
    %c0_102 = arith.constant 0 : index
    %285 = vector.load %arg18[%c0_101, %c0_102] : memref<32x128xbf16, #tpu.memory_space<vmem>>, vector<32x128xbf16>
    %286 = arith.truncf %284 : vector<1x32xf32> to vector<1x32xbf16>
    %cst_103 = arith.constant dense<0.000000e+00> : vector<1x128xf32>
    %287 = tpu.matmul %286, %285, %cst_103 {dimension_numbers = #tpu.dot_dimension_numbers<[1], [0], [0], [1], [0, 0, 1, 1], [], []>} : vector<1x32xbf16>, vector<32x128xbf16>, vector<1x128xf32> -> vector<1x128xf32>
    %c0_104 = arith.constant 0 : index
    %c0_105 = arith.constant 0 : index
    %288 = vector.load %arg19[%c0_104, %c0_105] : memref<1x128xf32, #tpu.memory_space<vmem>>, vector<1x128xf32>
    %289 = arith.addf %287, %288 : vector<1x128xf32>
    %290 = vector.shape_cast %289 : vector<1x128xf32> to vector<1x1x128xf32>
    %c0_106 = arith.constant 0 : index
    %c0_107 = arith.constant 0 : index
    %c0_108 = arith.constant 0 : index
    %291 = vector.load %arg20[%c0_106, %c0_107, %c0_108] : memref<1x1x128xf32, #tpu.memory_space<vmem>>, vector<1x1x128xf32>
    tpu.vector_store %arg20[%c0_106, %c0_107, %c0_108], %290 {strides = array<i32>} : memref<1x1x128xf32, #tpu.memory_space<vmem>>, vector<1x1x128xf32>,
    return
  }
  func.func @transform_0(%arg0: i32) -> (i32, i32, i32) {
    %c0_i32 = arith.constant 0 : i32
    %c0_i32_0 = arith.constant 0 : i32
    %c0_i32_1 = arith.constant 0 : i32
    return %arg0, %c0_i32, %c0_i32_0 : i32, i32, i32
  }
  func.func @transform_1(%arg0: i32) -> (i32, i32, i32) {
    %c0_i32 = arith.constant 0 : i32
    %c0_i32_0 = arith.constant 0 : i32
    %c0_i32_1 = arith.constant 0 : i32
    return %arg0, %c0_i32, %c0_i32_0 : i32, i32, i32
  }
  func.func @transform_2(%arg0: i32) -> (i32, i32) {
    %c0_i32 = arith.constant 0 : i32
    %c0_i32_0 = arith.constant 0 : i32
    %c0_i32_1 = arith.constant 0 : i32
    return %c0_i32, %c0_i32_0 : i32, i32
  }
  func.func @transform_3(%arg0: i32) -> (i32, i32) {
    %c0_i32 = arith.constant 0 : i32
    %c0_i32_0 = arith.constant 0 : i32
    %c0_i32_1 = arith.constant 0 : i32
    return %c0_i32, %c0_i32_0 : i32, i32
  }
  func.func @transform_4(%arg0: i32) -> (i32, i32) {
    %c0_i32 = arith.constant 0 : i32
    %c0_i32_0 = arith.constant 0 : i32
    %c0_i32_1 = arith.constant 0 : i32
    return %c0_i32, %c0_i32_0 : i32, i32
  }
  func.func @transform_5(%arg0: i32) -> (i32, i32, i32) {
    %c0_i32 = arith.constant 0 : i32
    %c0_i32_0 = arith.constant 0 : i32
    %c0_i32_1 = arith.constant 0 : i32
    %c0_i32_2 = arith.constant 0 : i32
    return %c0_i32, %c0_i32_0, %c0_i32_1 : i32, i32, i32
  }
  func.func @transform_6(%arg0: i32) -> (i32, i32, i32) {
    %c0_i32 = arith.constant 0 : i32
    %c0_i32_0 = arith.constant 0 : i32
    %c0_i32_1 = arith.constant 0 : i32
    %c0_i32_2 = arith.constant 0 : i32
    return %c0_i32, %c0_i32_0, %c0_i32_1 : i32, i32, i32
  }
  func.func @transform_7(%arg0: i32) -> (i32, i32, i32) {
    %c0_i32 = arith.constant 0 : i32
    %c0_i32_0 = arith.constant 0 : i32
    %c0_i32_1 = arith.constant 0 : i32
    %c0_i32_2 = arith.constant 0 : i32
    return %c0_i32, %c0_i32_0, %c0_i32_1 : i32, i32, i32
  }
  func.func @transform_8(%arg0: i32) -> (i32, i32, i32) {
    %c0_i32 = arith.constant 0 : i32
    %c0_i32_0 = arith.constant 0 : i32
    %c0_i32_1 = arith.constant 0 : i32
    %c0_i32_2 = arith.constant 0 : i32
    return %c0_i32, %c0_i32_0, %c0_i32_1 : i32, i32, i32
  }
  func.func @transform_9(%arg0: i32) -> (i32, i32, i32) {
    %c0_i32 = arith.constant 0 : i32
    %c0_i32_0 = arith.constant 0 : i32
    %c0_i32_1 = arith.constant 0 : i32
    %c0_i32_2 = arith.constant 0 : i32
    return %c0_i32, %c0_i32_0, %c0_i32_1 : i32, i32, i32
  }
  func.func @transform_10(%arg0: i32) -> (i32, i32, i32) {
    %c0_i32 = arith.constant 0 : i32
    %c0_i32_0 = arith.constant 0 : i32
    %c0_i32_1 = arith.constant 0 : i32
    %c0_i32_2 = arith.constant 0 : i32
    return %c0_i32, %c0_i32_0, %c0_i32_1 : i32, i32, i32
  }
  func.func @transform_11(%arg0: i32) -> (i32, i32, i32) {
    %c0_i32 = arith.constant 0 : i32
    %c0_i32_0 = arith.constant 0 : i32
    %c0_i32_1 = arith.constant 0 : i32
    %c0_i32_2 = arith.constant 0 : i32
    return %c0_i32, %c0_i32_0, %c0_i32_1 : i32, i32, i32
  }
  func.func @transform_12(%arg0: i32) -> (i32, i32, i32) {
    %c0_i32 = arith.constant 0 : i32
    %c0_i32_0 = arith.constant 0 : i32
    %c0_i32_1 = arith.constant 0 : i32
    %c0_i32_2 = arith.constant 0 : i32
    return %c0_i32, %c0_i32_0, %c0_i32_1 : i32, i32, i32
  }
  func.func @transform_13(%arg0: i32) -> (i32, i32, i32) {
    %c0_i32 = arith.constant 0 : i32
    %c0_i32_0 = arith.constant 0 : i32
    %c0_i32_1 = arith.constant 0 : i32
    %c0_i32_2 = arith.constant 0 : i32
    return %c0_i32, %c0_i32_0, %c0_i32_1 : i32, i32, i32
  }
  func.func @transform_14(%arg0: i32) -> (i32, i32, i32) {
    %c0_i32 = arith.constant 0 : i32
    %c0_i32_0 = arith.constant 0 : i32
    %c0_i32_1 = arith.constant 0 : i32
    %c0_i32_2 = arith.constant 0 : i32
    return %c0_i32, %c0_i32_0, %c0_i32_1 : i32, i32, i32
  }
  func.func @transform_15(%arg0: i32) -> (i32, i32, i32) {
    %c0_i32 = arith.constant 0 : i32
    %c0_i32_0 = arith.constant 0 : i32
    %c0_i32_1 = arith.constant 0 : i32
    %c0_i32_2 = arith.constant 0 : i32
    return %c0_i32, %c0_i32_0, %c0_i32_1 : i32, i32, i32
  }
  func.func @transform_16(%arg0: i32) -> (i32, i32, i32) {
    %c0_i32 = arith.constant 0 : i32
    %c0_i32_0 = arith.constant 0 : i32
    %c0_i32_1 = arith.constant 0 : i32
    %c0_i32_2 = arith.constant 0 : i32
    return %c0_i32, %c0_i32_0, %c0_i32_1 : i32, i32, i32
  }
  func.func @transform_17(%arg0: i32) -> (i32, i32) {
    %c0_i32 = arith.constant 0 : i32
    %c0_i32_0 = arith.constant 0 : i32
    %c0_i32_1 = arith.constant 0 : i32
    return %c0_i32, %c0_i32_0 : i32, i32
  }
  func.func @transform_18(%arg0: i32) -> (i32, i32) {
    %c0_i32 = arith.constant 0 : i32
    %c0_i32_0 = arith.constant 0 : i32
    %c0_i32_1 = arith.constant 0 : i32
    return %c0_i32, %c0_i32_0 : i32, i32
  }
  func.func @transform_19(%arg0: i32) -> (i32, i32, i32) {
    %c0_i32 = arith.constant 0 : i32
    %c0_i32_0 = arith.constant 0 : i32
    %c0_i32_1 = arith.constant 0 : i32
    return %arg0, %c0_i32, %c0_i32_0 : i32, i32, i32
  }
}

module attributes {stable_mosaic.version = 11 : i64} {
  func.func @fused_transformer_kernel(%arg0: i32, %arg1: memref<1x8x16xf32, #tpu.memory_space<vmem>>, %arg2: memref<1x1x8xf32, #tpu.memory_space<vmem>>, %arg3: memref<16x32xbf16, #tpu.memory_space<vmem>>, %arg4: memref<1x32xf32, #tpu.memory_space<vmem>>, %arg5: memref<8x32xf32, #tpu.memory_space<vmem>>, %arg6: memref<2x32x96xbf16, #tpu.memory_space<vmem>>, %arg7: memref<2x1x96xf32, #tpu.memory_space<vmem>>, %arg8: memref<2x32x32xbf16, #tpu.memory_space<vmem>>, %arg9: memref<2x1x32xf32, #tpu.memory_space<vmem>>, %arg10: memref<2x1x32xf32, #tpu.memory_space<vmem>>, %arg11: memref<2x1x32xf32, #tpu.memory_space<vmem>>, %arg12: memref<2x32x64xbf16, #tpu.memory_space<vmem>>, %arg13: memref<2x1x64xf32, #tpu.memory_space<vmem>>, %arg14: memref<2x64x32xbf16, #tpu.memory_space<vmem>>, %arg15: memref<2x1x32xf32, #tpu.memory_space<vmem>>, %arg16: memref<2x1x32xf32, #tpu.memory_space<vmem>>, %arg17: memref<2x1x32xf32, #tpu.memory_space<vmem>>, %arg18: memref<32x128xbf16, #tpu.memory_space<vmem>>, %arg19: memref<1x128xf32, #tpu.memory_space<vmem>>, %arg20: memref<1x1x128xf32, #tpu.memory_space<vmem>>) attributes {dimension_semantics = [#tpu.dimension_semantics<parallel>], iteration_bounds = array<i64: 2>, scalar_prefetch = 0 : i64, scratch_operands = 0 : i64, tpu.core_type = #tpu.core_type<tc>, window_params = [{transform_indices = @transform_0, window_bounds = array<i64: 1, 8, 16>}, {transform_indices = @transform_1, window_bounds = array<i64: 1, 1, 8>}, {pipeline_mode = #tpu.pipeline_mode<synchronous>, transform_indices = @transform_2, window_bounds = array<i64: 16, 32>}, {pipeline_mode = #tpu.pipeline_mode<synchronous>, transform_indices = @transform_3, window_bounds = array<i64: 1, 32>}, {pipeline_mode = #tpu.pipeline_mode<synchronous>, transform_indices = @transform_4, window_bounds = array<i64: 8, 32>}, {pipeline_mode = #tpu.pipeline_mode<synchronous>, transform_indices = @transform_5, window_bounds = array<i64: 2, 32, 96>}, {pipeline_mode = #tpu.pipeline_mode<synchronous>, transform_indices = @transform_6, window_bounds = array<i64: 2, 1, 96>}, {pipeline_mode = #tpu.pipeline_mode<synchronous>, transform_indices = @transform_7, window_bounds = array<i64: 2, 32, 32>}, {pipeline_mode = #tpu.pipeline_mode<synchronous>, transform_indices = @transform_8, window_bounds = array<i64: 2, 1, 32>}, {pipeline_mode = #tpu.pipeline_mode<synchronous>, transform_indices = @transform_9, window_bounds = array<i64: 2, 1, 32>}, {pipeline_mode = #tpu.pipeline_mode<synchronous>, transform_indices = @transform_10, window_bounds = array<i64: 2, 1, 32>}, {pipeline_mode = #tpu.pipeline_mode<synchronous>, transform_indices = @transform_11, window_bounds = array<i64: 2, 32, 64>}, {pipeline_mode = #tpu.pipeline_mode<synchronous>, transform_indices = @transform_12, window_bounds = array<i64: 2, 1, 64>}, {pipeline_mode = #tpu.pipeline_mode<synchronous>, transform_indices = @transform_13, window_bounds = array<i64: 2, 64, 32>}, {pipeline_mode = #tpu.pipeline_mode<synchronous>, transform_indices = @transform_14, window_bounds = array<i64: 2, 1, 32>}, {pipeline_mode = #tpu.pipeline_mode<synchronous>, transform_indices = @transform_15, window_bounds = array<i64: 2, 1, 32>}, {pipeline_mode = #tpu.pipeline_mode<synchronous>, transform_indices = @transform_16, window_bounds = array<i64: 2, 1, 32>}, {pipeline_mode = #tpu.pipeline_mode<synchronous>, transform_indices = @transform_17, window_bounds = array<i64: 32, 128>}, {pipeline_mode = #tpu.pipeline_mode<synchronous>, transform_indices = @transform_18, window_bounds = array<i64: 1, 128>}, {transform_indices = @transform_19, window_bounds = array<i64: 1, 1, 128>}]} {
    %c0 = arith.constant 0 : index
    %c0_0 = arith.constant 0 : index
    %c0_1 = arith.constant 0 : index
    %0 = vector.load %arg1[%c0, %c0_0, %c0_1] : memref<1x8x16xf32, #tpu.memory_space<vmem>>, vector<1x8x16xf32>
    %1 = vector.shape_cast %0 : vector<1x8x16xf32> to vector<8x16xf32>
    %c0_2 = arith.constant 0 : index
    %c0_3 = arith.constant 0 : index
    %2 = vector.load %arg3[%c0_2, %c0_3] : memref<16x32xbf16, #tpu.memory_space<vmem>>, vector<16x32xbf16>
    %3 = arith.truncf %1 : vector<8x16xf32> to vector<8x16xbf16>
    %cst = arith.constant dense<0.000000e+00> : vector<8x32xf32>
    %4 = tpu.matmul %3, %2, %cst {dimension_numbers = #tpu.dot_dimension_numbers<[1], [0], [0], [1], [0, 0, 1, 1], [], []>} : vector<8x16xbf16>, vector<16x32xbf16>, vector<8x32xf32> -> vector<8x32xf32>
    %c0_4 = arith.constant 0 : index
    %c0_5 = arith.constant 0 : index
    %5 = vector.load %arg4[%c0_4, %c0_5] : memref<1x32xf32, #tpu.memory_space<vmem>>, vector<1x32xf32>
    %6 = vector.broadcast %5 : vector<1x32xf32> to vector<8x32xf32>
    %7 = arith.addf %4, %6 : vector<8x32xf32>
    %8 = vector.shape_cast %7 : vector<8x32xf32> to vector<1x8x32xf32>
    %c0_6 = arith.constant 0 : index
    %c0_7 = arith.constant 0 : index
    %9 = vector.load %arg5[%c0_6, %c0_7] : memref<8x32xf32, #tpu.memory_space<vmem>>, vector<8x32xf32>
    %10 = vector.shape_cast %9 : vector<8x32xf32> to vector<1x8x32xf32>
    %11 = arith.addf %8, %10 : vector<1x8x32xf32>
    %12 = vector.shape_cast %11 : vector<1x8x32xf32> to vector<8x32xf32>
    %c0_8 = arith.constant 0 : index
    %c0_9 = arith.constant 0 : index
    %c0_10 = arith.constant 0 : index
    %13 = vector.load %arg2[%c0_8, %c0_9, %c0_10] : memref<1x1x8xf32, #tpu.memory_space<vmem>>, vector<1x1x8xf32>
    %14 = vector.shape_cast %13 : vector<1x1x8xf32> to vector<1x1x1x8xf32>
    %c0_i32 = arith.constant 0 : i32
    %15 = arith.index_cast %c0_i32 : i32 to index
    %c0_11 = arith.constant 0 : index
    %c0_12 = arith.constant 0 : index
    %16 = vector.load %arg6[%15, %c0_11, %c0_12] : memref<2x32x96xbf16, #tpu.memory_space<vmem>>, vector<1x32x96xbf16>
    %17 = vector.shape_cast %16 : vector<1x32x96xbf16> to vector<32x96xbf16>
    %18 = arith.truncf %12 : vector<8x32xf32> to vector<8x32xbf16>
    %cst_13 = arith.constant dense<0.000000e+00> : vector<8x96xf32>
    %19 = tpu.matmul %18, %17, %cst_13 {dimension_numbers = #tpu.dot_dimension_numbers<[1], [0], [0], [1], [0, 0, 1, 1], [], []>} : vector<8x32xbf16>, vector<32x96xbf16>, vector<8x96xf32> -> vector<8x96xf32>
    %20 = arith.index_cast %c0_i32 : i32 to index
    %c0_14 = arith.constant 0 : index
    %c0_15 = arith.constant 0 : index
    %21 = vector.load %arg7[%20, %c0_14, %c0_15] : memref<2x1x96xf32, #tpu.memory_space<vmem>>, vector<1x1x96xf32>
    %22 = vector.shape_cast %21 : vector<1x1x96xf32> to vector<1x96xf32>
    %23 = vector.broadcast %22 : vector<1x96xf32> to vector<8x96xf32>
    %24 = arith.addf %19, %23 : vector<8x96xf32>
    %25 = vector.extract_strided_slice %24 {offsets = [0, 0], sizes = [8, 32], strides = [1, 1]} : vector<8x96xf32> to vector<8x32xf32>
    %26 = vector.shape_cast %25 : vector<8x32xf32> to vector<1x8x4x8xf32>
    %27 = tpu.transpose %26, [0, 2, 1, 3] : vector<1x8x4x8xf32> -> vector<1x4x8x8xf32>
    %28 = vector.shape_cast %27 : vector<1x4x8x8xf32> to vector<4x8x8xf32>
    %29 = arith.truncf %28 : vector<4x8x8xf32> to vector<4x8x8xbf16>
    %30 = vector.extract_strided_slice %24 {offsets = [0, 32], sizes = [8, 32], strides = [1, 1]} : vector<8x96xf32> to vector<8x32xf32>
    %31 = vector.shape_cast %30 : vector<8x32xf32> to vector<1x8x4x8xf32>
    %32 = tpu.transpose %31, [0, 2, 1, 3] : vector<1x8x4x8xf32> -> vector<1x4x8x8xf32>
    %33 = vector.shape_cast %32 : vector<1x4x8x8xf32> to vector<4x8x8xf32>
    %34 = arith.truncf %33 : vector<4x8x8xf32> to vector<4x8x8xbf16>
    %35 = vector.extract_strided_slice %24 {offsets = [0, 64], sizes = [8, 32], strides = [1, 1]} : vector<8x96xf32> to vector<8x32xf32>
    %36 = vector.shape_cast %35 : vector<8x32xf32> to vector<1x8x4x8xf32>
    %37 = tpu.transpose %36, [0, 2, 1, 3] : vector<1x8x4x8xf32> -> vector<1x4x8x8xf32>
    %38 = vector.shape_cast %37 : vector<1x4x8x8xf32> to vector<4x8x8xf32>
    %39 = arith.truncf %38 : vector<4x8x8xf32> to vector<4x8x8xbf16>
    "tpu.trace_start"() <{level = 10 : i32, message = "bqd,bkd->bqk"}> : () -> ()
    %cst_16 = arith.constant dense<0.000000e+00> : vector<4x8x8xf32>
    %40 = tpu.matmul %29, %34, %cst_16 {dimension_numbers = #tpu.dot_dimension_numbers<[2], [2], [1], [1], [0, 0, 0, 1, 1, 1], [0], [0]>} : vector<4x8x8xbf16>, vector<4x8x8xbf16>, vector<4x8x8xf32> -> vector<4x8x8xf32>
    "tpu.trace_stop"() : () -> ()
    %cst_17 = arith.constant 0.353553385 : f32
    %41 = vector.broadcast %cst_17 : f32 to vector<4x8x8xf32>
    %42 = arith.mulf %40, %41 : vector<4x8x8xf32>
    %43 = vector.shape_cast %42 : vector<4x8x8xf32> to vector<1x4x8x8xf32>
    %44 = vector.broadcast %14 : vector<1x1x1x8xf32> to vector<1x4x8x8xf32>
    %45 = arith.addf %43, %44 : vector<1x4x8x8xf32>
    %46 = vector.shape_cast %45 : vector<1x4x8x8xf32> to vector<4x8x8xf32>
    %cst_18 = arith.constant dense<0xFF800000> : vector<4x8xf32>
    %47 = vector.multi_reduction <maximumf>, %46, %cst_18 [2] : vector<4x8x8xf32> to vector<4x8xf32>
    %48 = vector.shape_cast %47 : vector<4x8xf32> to vector<4x8x1xf32>
    %49 = vector.broadcast %48 : vector<4x8x1xf32> to vector<4x8x8xf32>
    %50 = arith.subf %46, %49 : vector<4x8x8xf32>
    %51 = math.exp %50 : vector<4x8x8xf32>
    %cst_19 = arith.constant dense<0.000000e+00> : vector<4x8xf32>
    %52 = vector.multi_reduction <add>, %51, %cst_19 [2] : vector<4x8x8xf32> to vector<4x8xf32>
    %53 = vector.shape_cast %52 : vector<4x8xf32> to vector<4x8x1xf32>
    %54 = tpu.reciprocal %53 {approx = true} : vector<4x8x1xf32> -> vector<4x8x1xf32>
    %55 = vector.broadcast %54 : vector<4x8x1xf32> to vector<4x8x8xf32>
    %56 = arith.mulf %51, %55 : vector<4x8x8xf32>
    %57 = arith.truncf %56 : vector<4x8x8xf32> to vector<4x8x8xbf16>
    "tpu.trace_start"() <{level = 10 : i32, message = "bqk,bkd->bqd"}> : () -> ()
    %cst_20 = arith.constant dense<0.000000e+00> : vector<4x8x8xf32>
    %58 = tpu.matmul %57, %39, %cst_20 {dimension_numbers = #tpu.dot_dimension_numbers<[2], [1], [1], [2], [0, 0, 0, 1, 1, 2], [0], [0]>} : vector<4x8x8xbf16>, vector<4x8x8xbf16>, vector<4x8x8xf32> -> vector<4x8x8xf32>
    "tpu.trace_stop"() : () -> ()
    %59 = vector.shape_cast %58 : vector<4x8x8xf32> to vector<1x4x8x8xf32>
    %60 = tpu.transpose %59, [0, 2, 1, 3] : vector<1x4x8x8xf32> -> vector<1x8x4x8xf32>
    %61 = vector.shape_cast %60 : vector<1x8x4x8xf32> to vector<8x32xf32>
    %62 = arith.index_cast %c0_i32 : i32 to index
    %c0_21 = arith.constant 0 : index
    %c0_22 = arith.constant 0 : index
    %63 = vector.load %arg8[%62, %c0_21, %c0_22] : memref<2x32x32xbf16, #tpu.memory_space<vmem>>, vector<1x32x32xbf16>
    %64 = vector.shape_cast %63 : vector<1x32x32xbf16> to vector<32x32xbf16>
    %65 = arith.truncf %61 : vector<8x32xf32> to vector<8x32xbf16>
    %cst_23 = arith.constant dense<0.000000e+00> : vector<8x32xf32>
    %66 = tpu.matmul %65, %64, %cst_23 {dimension_numbers = #tpu.dot_dimension_numbers<[1], [0], [0], [1], [0, 0, 1, 1], [], []>} : vector<8x32xbf16>, vector<32x32xbf16>, vector<8x32xf32> -> vector<8x32xf32>
    %67 = arith.index_cast %c0_i32 : i32 to index
    %c0_24 = arith.constant 0 : index
    %c0_25 = arith.constant 0 : index
    %68 = vector.load %arg9[%67, %c0_24, %c0_25] : memref<2x1x32xf32, #tpu.memory_space<vmem>>, vector<1x1x32xf32>
    %69 = vector.shape_cast %68 : vector<1x1x32xf32> to vector<1x32xf32>
    %70 = vector.broadcast %69 : vector<1x32xf32> to vector<8x32xf32>
    %71 = arith.addf %66, %70 : vector<8x32xf32>
    %72 = arith.addf %12, %71 : vector<8x32xf32>
    %73 = arith.index_cast %c0_i32 : i32 to index
    %c0_26 = arith.constant 0 : index
    %c0_27 = arith.constant 0 : index
    %74 = vector.load %arg10[%73, %c0_26, %c0_27] : memref<2x1x32xf32, #tpu.memory_space<vmem>>, vector<1x1x32xf32>
    %75 = vector.shape_cast %74 : vector<1x1x32xf32> to vector<1x32xf32>
    %76 = arith.index_cast %c0_i32 : i32 to index
    %c0_28 = arith.constant 0 : index
    %c0_29 = arith.constant 0 : index
    %77 = vector.load %arg11[%76, %c0_28, %c0_29] : memref<2x1x32xf32, #tpu.memory_space<vmem>>, vector<1x1x32xf32>
    %78 = vector.shape_cast %77 : vector<1x1x32xf32> to vector<1x32xf32>
    %cst_30 = arith.constant dense<0.000000e+00> : vector<8xf32>
    %79 = vector.multi_reduction <add>, %72, %cst_30 [1] : vector<8x32xf32> to vector<8xf32>
    %80 = vector.shape_cast %79 : vector<8xf32> to vector<8x1xf32>
    %cst_31 = arith.constant 3.200000e+01 : f32
    %81 = vector.broadcast %cst_31 : f32 to vector<8x1xf32>
    %82 = arith.divf %80, %81 : vector<8x1xf32>
    %83 = vector.broadcast %82 : vector<8x1xf32> to vector<8x32xf32>
    %84 = arith.subf %72, %83 : vector<8x32xf32>
    %85 = arith.mulf %84, %84 : vector<8x32xf32>
    %cst_32 = arith.constant dense<0.000000e+00> : vector<8xf32>
    %86 = vector.multi_reduction <add>, %85, %cst_32 [1] : vector<8x32xf32> to vector<8xf32>
    %87 = vector.shape_cast %86 : vector<8xf32> to vector<8x1xf32>
    %cst_33 = arith.constant 3.200000e+01 : f32
    %88 = vector.broadcast %cst_33 : f32 to vector<8x1xf32>
    %89 = arith.divf %87, %88 : vector<8x1xf32>
    %cst_34 = arith.constant 9.99999974E-6 : f32
    %90 = vector.broadcast %cst_34 : f32 to vector<8x1xf32>
    %91 = arith.addf %89, %90 : vector<8x1xf32>
    %92 = math.rsqrt %91 : vector<8x1xf32>
    %93 = vector.broadcast %92 : vector<8x1xf32> to vector<8x32xf32>
    %94 = arith.mulf %84, %93 : vector<8x32xf32>
    %95 = vector.broadcast %75 : vector<1x32xf32> to vector<8x32xf32>
    %96 = arith.mulf %94, %95 : vector<8x32xf32>
    %97 = vector.broadcast %78 : vector<1x32xf32> to vector<8x32xf32>
    %98 = arith.addf %96, %97 : vector<8x32xf32>
    %99 = arith.index_cast %c0_i32 : i32 to index
    %c0_35 = arith.constant 0 : index
    %c0_36 = arith.constant 0 : index
    %100 = vector.load %arg12[%99, %c0_35, %c0_36] : memref<2x32x64xbf16, #tpu.memory_space<vmem>>, vector<1x32x64xbf16>
    %101 = vector.shape_cast %100 : vector<1x32x64xbf16> to vector<32x64xbf16>
    %102 = arith.truncf %98 : vector<8x32xf32> to vector<8x32xbf16>
    %cst_37 = arith.constant dense<0.000000e+00> : vector<8x64xf32>
    %103 = tpu.matmul %102, %101, %cst_37 {dimension_numbers = #tpu.dot_dimension_numbers<[1], [0], [0], [1], [0, 0, 1, 1], [], []>} : vector<8x32xbf16>, vector<32x64xbf16>, vector<8x64xf32> -> vector<8x64xf32>
    %104 = arith.index_cast %c0_i32 : i32 to index
    %c0_38 = arith.constant 0 : index
    %c0_39 = arith.constant 0 : index
    %105 = vector.load %arg13[%104, %c0_38, %c0_39] : memref<2x1x64xf32, #tpu.memory_space<vmem>>, vector<1x1x64xf32>
    %106 = vector.shape_cast %105 : vector<1x1x64xf32> to vector<1x64xf32>
    %107 = vector.broadcast %106 : vector<1x64xf32> to vector<8x64xf32>
    %108 = arith.addf %103, %107 : vector<8x64xf32>
    %cst_40 = arith.constant 0.000000e+00 : f32
    %109 = vector.broadcast %cst_40 : f32 to vector<8x64xf32>
    %110 = arith.maximumf %108, %109 : vector<8x64xf32>
    %111 = arith.index_cast %c0_i32 : i32 to index
    %c0_41 = arith.constant 0 : index
    %c0_42 = arith.constant 0 : index
    %112 = vector.load %arg14[%111, %c0_41, %c0_42] : memref<2x64x32xbf16, #tpu.memory_space<vmem>>, vector<1x64x32xbf16>
    %113 = vector.shape_cast %112 : vector<1x64x32xbf16> to vector<64x32xbf16>
    %114 = arith.truncf %110 : vector<8x64xf32> to vector<8x64xbf16>
    %cst_43 = arith.constant dense<0.000000e+00> : vector<8x32xf32>
    %115 = tpu.matmul %114, %113, %cst_43 {dimension_numbers = #tpu.dot_dimension_numbers<[1], [0], [0], [1], [0, 0, 1, 1], [], []>} : vector<8x64xbf16>, vector<64x32xbf16>, vector<8x32xf32> -> vector<8x32xf32>
    %116 = arith.index_cast %c0_i32 : i32 to index
    %c0_44 = arith.constant 0 : index
    %c0_45 = arith.constant 0 : index
    %117 = vector.load %arg15[%116, %c0_44, %c0_45] : memref<2x1x32xf32, #tpu.memory_space<vmem>>, vector<1x1x32xf32>
    %118 = vector.shape_cast %117 : vector<1x1x32xf32> to vector<1x32xf32>
    %119 = vector.broadcast %118 : vector<1x32xf32> to vector<8x32xf32>
    %120 = arith.addf %115, %119 : vector<8x32xf32>
    %121 = arith.addf %98, %120 : vector<8x32xf32>
    %122 = arith.index_cast %c0_i32 : i32 to index
    %c0_46 = arith.constant 0 : index
    %c0_47 = arith.constant 0 : index
    %123 = vector.load %arg16[%122, %c0_46, %c0_47] : memref<2x1x32xf32, #tpu.memory_space<vmem>>, vector<1x1x32xf32>
    %124 = vector.shape_cast %123 : vector<1x1x32xf32> to vector<1x32xf32>
    %125 = arith.index_cast %c0_i32 : i32 to index
    %c0_48 = arith.constant 0 : index
    %c0_49 = arith.constant 0 : index
    %126 = vector.load %arg17[%125, %c0_48, %c0_49] : memref<2x1x32xf32, #tpu.memory_space<vmem>>, vector<1x1x32xf32>
    %127 = vector.shape_cast %126 : vector<1x1x32xf32> to vector<1x32xf32>
    %cst_50 = arith.constant dense<0.000000e+00> : vector<8xf32>
    %128 = vector.multi_reduction <add>, %121, %cst_50 [1] : vector<8x32xf32> to vector<8xf32>
    %129 = vector.shape_cast %128 : vector<8xf32> to vector<8x1xf32>
    %cst_51 = arith.constant 3.200000e+01 : f32
    %130 = vector.broadcast %cst_51 : f32 to vector<8x1xf32>
    %131 = arith.divf %129, %130 : vector<8x1xf32>
    %132 = vector.broadcast %131 : vector<8x1xf32> to vector<8x32xf32>
    %133 = arith.subf %121, %132 : vector<8x32xf32>
    %134 = arith.mulf %133, %133 : vector<8x32xf32>
    %cst_52 = arith.constant dense<0.000000e+00> : vector<8xf32>
    %135 = vector.multi_reduction <add>, %134, %cst_52 [1] : vector<8x32xf32> to vector<8xf32>
    %136 = vector.shape_cast %135 : vector<8xf32> to vector<8x1xf32>
    %cst_53 = arith.constant 3.200000e+01 : f32
    %137 = vector.broadcast %cst_53 : f32 to vector<8x1xf32>
    %138 = arith.divf %136, %137 : vector<8x1xf32>
    %cst_54 = arith.constant 9.99999974E-6 : f32
    %139 = vector.broadcast %cst_54 : f32 to vector<8x1xf32>
    %140 = arith.addf %138, %139 : vector<8x1xf32>
    %141 = math.rsqrt %140 : vector<8x1xf32>
    %142 = vector.broadcast %141 : vector<8x1xf32> to vector<8x32xf32>
    %143 = arith.mulf %133, %142 : vector<8x32xf32>
    %144 = vector.broadcast %124 : vector<1x32xf32> to vector<8x32xf32>
    %145 = arith.mulf %143, %144 : vector<8x32xf32>
    %146 = vector.broadcast %127 : vector<1x32xf32> to vector<8x32xf32>
    %147 = arith.addf %145, %146 : vector<8x32xf32>
    %c1_i32 = arith.constant 1 : i32
    %148 = arith.index_cast %c1_i32 : i32 to index
    %c0_55 = arith.constant 0 : index
    %c0_56 = arith.constant 0 : index
    %149 = vector.load %arg6[%148, %c0_55, %c0_56] : memref<2x32x96xbf16, #tpu.memory_space<vmem>>, vector<1x32x96xbf16>
    %150 = vector.shape_cast %149 : vector<1x32x96xbf16> to vector<32x96xbf16>
    %151 = arith.truncf %147 : vector<8x32xf32> to vector<8x32xbf16>
    %cst_57 = arith.constant dense<0.000000e+00> : vector<8x96xf32>
    %152 = tpu.matmul %151, %150, %cst_57 {dimension_numbers = #tpu.dot_dimension_numbers<[1], [0], [0], [1], [0, 0, 1, 1], [], []>} : vector<8x32xbf16>, vector<32x96xbf16>, vector<8x96xf32> -> vector<8x96xf32>
    %153 = arith.index_cast %c1_i32 : i32 to index
    %c0_58 = arith.constant 0 : index
    %c0_59 = arith.constant 0 : index
    %154 = vector.load %arg7[%153, %c0_58, %c0_59] : memref<2x1x96xf32, #tpu.memory_space<vmem>>, vector<1x1x96xf32>
    %155 = vector.shape_cast %154 : vector<1x1x96xf32> to vector<1x96xf32>
    %156 = vector.broadcast %155 : vector<1x96xf32> to vector<8x96xf32>
    %157 = arith.addf %152, %156 : vector<8x96xf32>
    %158 = vector.extract_strided_slice %157 {offsets = [0, 0], sizes = [8, 32], strides = [1, 1]} : vector<8x96xf32> to vector<8x32xf32>
    %159 = vector.shape_cast %158 : vector<8x32xf32> to vector<1x8x4x8xf32>
    %160 = tpu.transpose %159, [0, 2, 1, 3] : vector<1x8x4x8xf32> -> vector<1x4x8x8xf32>
    %161 = vector.shape_cast %160 : vector<1x4x8x8xf32> to vector<4x8x8xf32>
    %162 = arith.truncf %161 : vector<4x8x8xf32> to vector<4x8x8xbf16>
    %163 = vector.extract_strided_slice %157 {offsets = [0, 32], sizes = [8, 32], strides = [1, 1]} : vector<8x96xf32> to vector<8x32xf32>
    %164 = vector.shape_cast %163 : vector<8x32xf32> to vector<1x8x4x8xf32>
    %165 = tpu.transpose %164, [0, 2, 1, 3] : vector<1x8x4x8xf32> -> vector<1x4x8x8xf32>
    %166 = vector.shape_cast %165 : vector<1x4x8x8xf32> to vector<4x8x8xf32>
    %167 = arith.truncf %166 : vector<4x8x8xf32> to vector<4x8x8xbf16>
    %168 = vector.extract_strided_slice %157 {offsets = [0, 64], sizes = [8, 32], strides = [1, 1]} : vector<8x96xf32> to vector<8x32xf32>
    %169 = vector.shape_cast %168 : vector<8x32xf32> to vector<1x8x4x8xf32>
    %170 = tpu.transpose %169, [0, 2, 1, 3] : vector<1x8x4x8xf32> -> vector<1x4x8x8xf32>
    %171 = vector.shape_cast %170 : vector<1x4x8x8xf32> to vector<4x8x8xf32>
    %172 = arith.truncf %171 : vector<4x8x8xf32> to vector<4x8x8xbf16>
    "tpu.trace_start"() <{level = 10 : i32, message = "bqd,bkd->bqk"}> : () -> ()
    %cst_60 = arith.constant dense<0.000000e+00> : vector<4x8x8xf32>
    %173 = tpu.matmul %162, %167, %cst_60 {dimension_numbers = #tpu.dot_dimension_numbers<[2], [2], [1], [1], [0, 0, 0, 1, 1, 1], [0], [0]>} : vector<4x8x8xbf16>, vector<4x8x8xbf16>, vector<4x8x8xf32> -> vector<4x8x8xf32>
    "tpu.trace_stop"() : () -> ()
    %cst_61 = arith.constant 0.353553385 : f32
    %174 = vector.broadcast %cst_61 : f32 to vector<4x8x8xf32>
    %175 = arith.mulf %173, %174 : vector<4x8x8xf32>
    %176 = vector.shape_cast %175 : vector<4x8x8xf32> to vector<1x4x8x8xf32>
    %177 = vector.broadcast %14 : vector<1x1x1x8xf32> to vector<1x4x8x8xf32>
    %178 = arith.addf %176, %177 : vector<1x4x8x8xf32>
    %179 = vector.shape_cast %178 : vector<1x4x8x8xf32> to vector<4x8x8xf32>
    %cst_62 = arith.constant dense<0xFF800000> : vector<4x8xf32>
    %180 = vector.multi_reduction <maximumf>, %179, %cst_62 [2] : vector<4x8x8xf32> to vector<4x8xf32>
    %181 = vector.shape_cast %180 : vector<4x8xf32> to vector<4x8x1xf32>
    %182 = vector.broadcast %181 : vector<4x8x1xf32> to vector<4x8x8xf32>
    %183 = arith.subf %179, %182 : vector<4x8x8xf32>
    %184 = math.exp %183 : vector<4x8x8xf32>
    %cst_63 = arith.constant dense<0.000000e+00> : vector<4x8xf32>
    %185 = vector.multi_reduction <add>, %184, %cst_63 [2] : vector<4x8x8xf32> to vector<4x8xf32>
    %186 = vector.shape_cast %185 : vector<4x8xf32> to vector<4x8x1xf32>
    %187 = tpu.reciprocal %186 {approx = true} : vector<4x8x1xf32> -> vector<4x8x1xf32>
    %188 = vector.broadcast %187 : vector<4x8x1xf32> to vector<4x8x8xf32>
    %189 = arith.mulf %184, %188 : vector<4x8x8xf32>
    %190 = arith.truncf %189 : vector<4x8x8xf32> to vector<4x8x8xbf16>
    "tpu.trace_start"() <{level = 10 : i32, message = "bqk,bkd->bqd"}> : () -> ()
    %cst_64 = arith.constant dense<0.000000e+00> : vector<4x8x8xf32>
    %191 = tpu.matmul %190, %172, %cst_64 {dimension_numbers = #tpu.dot_dimension_numbers<[2], [1], [1], [2], [0, 0, 0, 1, 1, 2], [0], [0]>} : vector<4x8x8xbf16>, vector<4x8x8xbf16>, vector<4x8x8xf32> -> vector<4x8x8xf32>
    "tpu.trace_stop"() : () -> ()
    %192 = vector.shape_cast %191 : vector<4x8x8xf32> to vector<1x4x8x8xf32>
    %193 = tpu.transpose %192, [0, 2, 1, 3] : vector<1x4x8x8xf32> -> vector<1x8x4x8xf32>
    %194 = vector.shape_cast %193 : vector<1x8x4x8xf32> to vector<8x32xf32>
    %195 = arith.index_cast %c1_i32 : i32 to index
    %c0_65 = arith.constant 0 : index
    %c0_66 = arith.constant 0 : index
    %196 = vector.load %arg8[%195, %c0_65, %c0_66] : memref<2x32x32xbf16, #tpu.memory_space<vmem>>, vector<1x32x32xbf16>
    %197 = vector.shape_cast %196 : vector<1x32x32xbf16> to vector<32x32xbf16>
    %198 = arith.truncf %194 : vector<8x32xf32> to vector<8x32xbf16>
    %cst_67 = arith.constant dense<0.000000e+00> : vector<8x32xf32>
    %199 = tpu.matmul %198, %197, %cst_67 {dimension_numbers = #tpu.dot_dimension_numbers<[1], [0], [0], [1], [0, 0, 1, 1], [], []>} : vector<8x32xbf16>, vector<32x32xbf16>, vector<8x32xf32> -> vector<8x32xf32>
    %200 = arith.index_cast %c1_i32 : i32 to index
    %c0_68 = arith.constant 0 : index
    %c0_69 = arith.constant 0 : index
    %201 = vector.load %arg9[%200, %c0_68, %c0_69] : memref<2x1x32xf32, #tpu.memory_space<vmem>>, vector<1x1x32xf32>
    %202 = vector.shape_cast %201 : vector<1x1x32xf32> to vector<1x32xf32>
    %203 = vector.broadcast %202 : vector<1x32xf32> to vector<8x32xf32>
    %204 = arith.addf %199, %203 : vector<8x32xf32>
    %205 = arith.addf %147, %204 : vector<8x32xf32>
    %206 = arith.index_cast %c1_i32 : i32 to index
    %c0_70 = arith.constant 0 : index
    %c0_71 = arith.constant 0 : index
    %207 = vector.load %arg10[%206, %c0_70, %c0_71] : memref<2x1x32xf32, #tpu.memory_space<vmem>>, vector<1x1x32xf32>
    %208 = vector.shape_cast %207 : vector<1x1x32xf32> to vector<1x32xf32>
    %209 = arith.index_cast %c1_i32 : i32 to index
    %c0_72 = arith.constant 0 : index
    %c0_73 = arith.constant 0 : index
    %210 = vector.load %arg11[%209, %c0_72, %c0_73] : memref<2x1x32xf32, #tpu.memory_space<vmem>>, vector<1x1x32xf32>
    %211 = vector.shape_cast %210 : vector<1x1x32xf32> to vector<1x32xf32>
    %cst_74 = arith.constant dense<0.000000e+00> : vector<8xf32>
    %212 = vector.multi_reduction <add>, %205, %cst_74 [1] : vector<8x32xf32> to vector<8xf32>
    %213 = vector.shape_cast %212 : vector<8xf32> to vector<8x1xf32>
    %cst_75 = arith.constant 3.200000e+01 : f32
    %214 = vector.broadcast %cst_75 : f32 to vector<8x1xf32>
    %215 = arith.divf %213, %214 : vector<8x1xf32>
    %216 = vector.broadcast %215 : vector<8x1xf32> to vector<8x32xf32>
    %217 = arith.subf %205, %216 : vector<8x32xf32>
    %218 = arith.mulf %217, %217 : vector<8x32xf32>
    %cst_76 = arith.constant dense<0.000000e+00> : vector<8xf32>
    %219 = vector.multi_reduction <add>, %218, %cst_76 [1] : vector<8x32xf32> to vector<8xf32>
    %220 = vector.shape_cast %219 : vector<8xf32> to vector<8x1xf32>
    %cst_77 = arith.constant 3.200000e+01 : f32
    %221 = vector.broadcast %cst_77 : f32 to vector<8x1xf32>
    %222 = arith.divf %220, %221 : vector<8x1xf32>
    %cst_78 = arith.constant 9.99999974E-6 : f32
    %223 = vector.broadcast %cst_78 : f32 to vector<8x1xf32>
    %224 = arith.addf %222, %223 : vector<8x1xf32>
    %225 = math.rsqrt %224 : vector<8x1xf32>
    %226 = vector.broadcast %225 : vector<8x1xf32> to vector<8x32xf32>
    %227 = arith.mulf %217, %226 : vector<8x32xf32>
    %228 = vector.broadcast %208 : vector<1x32xf32> to vector<8x32xf32>
    %229 = arith.mulf %227, %228 : vector<8x32xf32>
    %230 = vector.broadcast %211 : vector<1x32xf32> to vector<8x32xf32>
    %231 = arith.addf %229, %230 : vector<8x32xf32>
    %232 = arith.index_cast %c1_i32 : i32 to index
    %c0_79 = arith.constant 0 : index
    %c0_80 = arith.constant 0 : index
    %233 = vector.load %arg12[%232, %c0_79, %c0_80] : memref<2x32x64xbf16, #tpu.memory_space<vmem>>, vector<1x32x64xbf16>
    %234 = vector.shape_cast %233 : vector<1x32x64xbf16> to vector<32x64xbf16>
    %235 = arith.truncf %231 : vector<8x32xf32> to vector<8x32xbf16>
    %cst_81 = arith.constant dense<0.000000e+00> : vector<8x64xf32>
    %236 = tpu.matmul %235, %234, %cst_81 {dimension_numbers = #tpu.dot_dimension_numbers<[1], [0], [0], [1], [0, 0, 1, 1], [], []>} : vector<8x32xbf16>, vector<32x64xbf16>, vector<8x64xf32> -> vector<8x64xf32>
    %237 = arith.index_cast %c1_i32 : i32 to index
    %c0_82 = arith.constant 0 : index
    %c0_83 = arith.constant 0 : index
    %238 = vector.load %arg13[%237, %c0_82, %c0_83] : memref<2x1x64xf32, #tpu.memory_space<vmem>>, vector<1x1x64xf32>
    %239 = vector.shape_cast %238 : vector<1x1x64xf32> to vector<1x64xf32>
    %240 = vector.broadcast %239 : vector<1x64xf32> to vector<8x64xf32>
    %241 = arith.addf %236, %240 : vector<8x64xf32>
    %cst_84 = arith.constant 0.000000e+00 : f32
    %242 = vector.broadcast %cst_84 : f32 to vector<8x64xf32>
    %243 = arith.maximumf %241, %242 : vector<8x64xf32>
    %244 = arith.index_cast %c1_i32 : i32 to index
    %c0_85 = arith.constant 0 : index
    %c0_86 = arith.constant 0 : index
    %245 = vector.load %arg14[%244, %c0_85, %c0_86] : memref<2x64x32xbf16, #tpu.memory_space<vmem>>, vector<1x64x32xbf16>
    %246 = vector.shape_cast %245 : vector<1x64x32xbf16> to vector<64x32xbf16>
    %247 = arith.truncf %243 : vector<8x64xf32> to vector<8x64xbf16>
    %cst_87 = arith.constant dense<0.000000e+00> : vector<8x32xf32>
    %248 = tpu.matmul %247, %246, %cst_87 {dimension_numbers = #tpu.dot_dimension_numbers<[1], [0], [0], [1], [0, 0, 1, 1], [], []>} : vector<8x64xbf16>, vector<64x32xbf16>, vector<8x32xf32> -> vector<8x32xf32>
    %249 = arith.index_cast %c1_i32 : i32 to index
    %c0_88 = arith.constant 0 : index
    %c0_89 = arith.constant 0 : index
    %250 = vector.load %arg15[%249, %c0_88, %c0_89] : memref<2x1x32xf32, #tpu.memory_space<vmem>>, vector<1x1x32xf32>
    %251 = vector.shape_cast %250 : vector<1x1x32xf32> to vector<1x32xf32>
    %252 = vector.broadcast %251 : vector<1x32xf32> to vector<8x32xf32>
    %253 = arith.addf %248, %252 : vector<8x32xf32>
    %254 = arith.addf %231, %253 : vector<8x32xf32>
    %255 = arith.index_cast %c1_i32 : i32 to index
    %c0_90 = arith.constant 0 : index
    %c0_91 = arith.constant 0 : index
    %256 = vector.load %arg16[%255, %c0_90, %c0_91] : memref<2x1x32xf32, #tpu.memory_space<vmem>>, vector<1x1x32xf32>
    %257 = vector.shape_cast %256 : vector<1x1x32xf32> to vector<1x32xf32>
    %258 = arith.index_cast %c1_i32 : i32 to index
    %c0_92 = arith.constant 0 : index
    %c0_93 = arith.constant 0 : index
    %259 = vector.load %arg17[%258, %c0_92, %c0_93] : memref<2x1x32xf32, #tpu.memory_space<vmem>>, vector<1x1x32xf32>
    %260 = vector.shape_cast %259 : vector<1x1x32xf32> to vector<1x32xf32>
    %cst_94 = arith.constant dense<0.000000e+00> : vector<8xf32>
    %261 = vector.multi_reduction <add>, %254, %cst_94 [1] : vector<8x32xf32> to vector<8xf32>
    %262 = vector.shape_cast %261 : vector<8xf32> to vector<8x1xf32>
    %cst_95 = arith.constant 3.200000e+01 : f32
    %263 = vector.broadcast %cst_95 : f32 to vector<8x1xf32>
    %264 = arith.divf %262, %263 : vector<8x1xf32>
    %265 = vector.broadcast %264 : vector<8x1xf32> to vector<8x32xf32>
    %266 = arith.subf %254, %265 : vector<8x32xf32>
    %267 = arith.mulf %266, %266 : vector<8x32xf32>
    %cst_96 = arith.constant dense<0.000000e+00> : vector<8xf32>
    %268 = vector.multi_reduction <add>, %267, %cst_96 [1] : vector<8x32xf32> to vector<8xf32>
    %269 = vector.shape_cast %268 : vector<8xf32> to vector<8x1xf32>
    %cst_97 = arith.constant 3.200000e+01 : f32
    %270 = vector.broadcast %cst_97 : f32 to vector<8x1xf32>
    %271 = arith.divf %269, %270 : vector<8x1xf32>
    %cst_98 = arith.constant 9.99999974E-6 : f32
    %272 = vector.broadcast %cst_98 : f32 to vector<8x1xf32>
    %273 = arith.addf %271, %272 : vector<8x1xf32>
    %274 = math.rsqrt %273 : vector<8x1xf32>
    %275 = vector.broadcast %274 : vector<8x1xf32> to vector<8x32xf32>
    %276 = arith.mulf %266, %275 : vector<8x32xf32>
    %277 = vector.broadcast %257 : vector<1x32xf32> to vector<8x32xf32>
    %278 = arith.mulf %276, %277 : vector<8x32xf32>
    %279 = vector.broadcast %260 : vector<1x32xf32> to vector<8x32xf32>
    %280 = arith.addf %278, %279 : vector<8x32xf32>
    %c2_i32 = arith.constant 2 : i32
    %281 = vector.shape_cast %280 : vector<8x32xf32> to vector<1x8x32xf32>
    %cst_99 = arith.constant dense<0.000000e+00> : vector<1x32xf32>
    %282 = vector.multi_reduction <add>, %281, %cst_99 [1] : vector<1x8x32xf32> to vector<1x32xf32>
    %cst_100 = arith.constant 8.000000e+00 : f32
    %283 = vector.broadcast %cst_100 : f32 to vector<1x32xf32>
    %284 = arith.divf %282, %283 : vector<1x32xf32>
    %c0_101 = arith.constant 0 : index
    %c0_102 = arith.constant 0 : index
    %285 = vector.load %arg18[%c0_101, %c0_102] : memref<32x128xbf16, #tpu.memory_space<vmem>>, vector<32x128xbf16>
    %286 = arith.truncf %284 : vector<1x32xf32> to vector<1x32xbf16>
    %cst_103 = arith.constant dense<0.000000e+00> : vector<1x128xf32>
    %287 = tpu.matmul %286, %285, %cst_103 {dimension_numbers = #tpu.dot_dimension_numbers<[1], [0], [0], [1], [0, 0, 1, 1], [], []>} : vector<1x32xbf16>, vector<32x128xbf16>, vector<1x128xf32> -> vector<1x128xf32>
    %c0_104 = arith.constant 0 : index
    %c0_105 = arith.constant 0 : index
    %288 = vector.load %arg19[%c0_104, %c0_105] : memref<1x128xf32, #tpu.memory_space<vmem>>, vector<1x128xf32>
    %289 = arith.addf %287, %288 : vector<1x128xf32>
    %290 = vector.shape_cast %289 : vector<1x128xf32> to vector<1x1x128xf32>
    %c0_106 = arith.constant 0 : index
    %c0_107 = arith.constant 0 : index
    %c0_108 = arith.constant 0 : index
    %291 = vector.load %arg20[%c0_106, %c0_107, %c0_108] : memref<1x1x128xf32, #tpu.memory_space<vmem>>, vector<1x1x128xf32>
    tpu.vector_store %arg20[%c0_106, %c0_107, %c0_108], %290 {strides = array<i32>} : memref<1x1x128xf32, #tpu.memory_space<vmem>>, vector<1x1x128xf32>,
    return
  }
  func.func @transform_0(%arg0: i32) -> (i32, i32, i32) {
    %c0_i32 = arith.constant 0 : i32
    %c0_i32_0 = arith.constant 0 : i32
    %c0_i32_1 = arith.constant 0 : i32
    return %arg0, %c0_i32, %c0_i32_0 : i32, i32, i32
  }
  func.func @transform_1(%arg0: i32) -> (i32, i32, i32) {
    %c0_i32 = arith.constant 0 : i32
    %c0_i32_0 = arith.constant 0 : i32
    %c0_i32_1 = arith.constant 0 : i32
    return %arg0, %c0_i32, %c0_i32_0 : i32, i32, i32
  }
  func.func @transform_2(%arg0: i32) -> (i32, i32) {
    %c0_i32 = arith.constant 0 : i32
    %c0_i32_0 = arith.constant 0 : i32
    %c0_i32_1 = arith.constant 0 : i32
    return %c0_i32, %c0_i32_0 : i32, i32
  }
  func.func @transform_3(%arg0: i32) -> (i32, i32) {
    %c0_i32 = arith.constant 0 : i32
    %c0_i32_0 = arith.constant 0 : i32
    %c0_i32_1 = arith.constant 0 : i32
    return %c0_i32, %c0_i32_0 : i32, i32
  }
  func.func @transform_4(%arg0: i32) -> (i32, i32) {
    %c0_i32 = arith.constant 0 : i32
    %c0_i32_0 = arith.constant 0 : i32
    %c0_i32_1 = arith.constant 0 : i32
    return %c0_i32, %c0_i32_0 : i32, i32
  }
  func.func @transform_5(%arg0: i32) -> (i32, i32, i32) {
    %c0_i32 = arith.constant 0 : i32
    %c0_i32_0 = arith.constant 0 : i32
    %c0_i32_1 = arith.constant 0 : i32
    %c0_i32_2 = arith.constant 0 : i32
    return %c0_i32, %c0_i32_0, %c0_i32_1 : i32, i32, i32
  }
  func.func @transform_6(%arg0: i32) -> (i32, i32, i32) {
    %c0_i32 = arith.constant 0 : i32
    %c0_i32_0 = arith.constant 0 : i32
    %c0_i32_1 = arith.constant 0 : i32
    %c0_i32_2 = arith.constant 0 : i32
    return %c0_i32, %c0_i32_0, %c0_i32_1 : i32, i32, i32
  }
  func.func @transform_7(%arg0: i32) -> (i32, i32, i32) {
    %c0_i32 = arith.constant 0 : i32
    %c0_i32_0 = arith.constant 0 : i32
    %c0_i32_1 = arith.constant 0 : i32
    %c0_i32_2 = arith.constant 0 : i32
    return %c0_i32, %c0_i32_0, %c0_i32_1 : i32, i32, i32
  }
  func.func @transform_8(%arg0: i32) -> (i32, i32, i32) {
    %c0_i32 = arith.constant 0 : i32
    %c0_i32_0 = arith.constant 0 : i32
    %c0_i32_1 = arith.constant 0 : i32
    %c0_i32_2 = arith.constant 0 : i32
    return %c0_i32, %c0_i32_0, %c0_i32_1 : i32, i32, i32
  }
  func.func @transform_9(%arg0: i32) -> (i32, i32, i32) {
    %c0_i32 = arith.constant 0 : i32
    %c0_i32_0 = arith.constant 0 : i32
    %c0_i32_1 = arith.constant 0 : i32
    %c0_i32_2 = arith.constant 0 : i32
    return %c0_i32, %c0_i32_0, %c0_i32_1 : i32, i32, i32
  }
  func.func @transform_10(%arg0: i32) -> (i32, i32, i32) {
    %c0_i32 = arith.constant 0 : i32
    %c0_i32_0 = arith.constant 0 : i32
    %c0_i32_1 = arith.constant 0 : i32
    %c0_i32_2 = arith.constant 0 : i32
    return %c0_i32, %c0_i32_0, %c0_i32_1 : i32, i32, i32
  }
  func.func @transform_11(%arg0: i32) -> (i32, i32, i32) {
    %c0_i32 = arith.constant 0 : i32
    %c0_i32_0 = arith.constant 0 : i32
    %c0_i32_1 = arith.constant 0 : i32
    %c0_i32_2 = arith.constant 0 : i32
    return %c0_i32, %c0_i32_0, %c0_i32_1 : i32, i32, i32
  }
  func.func @transform_12(%arg0: i32) -> (i32, i32, i32) {
    %c0_i32 = arith.constant 0 : i32
    %c0_i32_0 = arith.constant 0 : i32
    %c0_i32_1 = arith.constant 0 : i32
    %c0_i32_2 = arith.constant 0 : i32
    return %c0_i32, %c0_i32_0, %c0_i32_1 : i32, i32, i32
  }
  func.func @transform_13(%arg0: i32) -> (i32, i32, i32) {
    %c0_i32 = arith.constant 0 : i32
    %c0_i32_0 = arith.constant 0 : i32
    %c0_i32_1 = arith.constant 0 : i32
    %c0_i32_2 = arith.constant 0 : i32
    return %c0_i32, %c0_i32_0, %c0_i32_1 : i32, i32, i32
  }
  func.func @transform_14(%arg0: i32) -> (i32, i32, i32) {
    %c0_i32 = arith.constant 0 : i32
    %c0_i32_0 = arith.constant 0 : i32
    %c0_i32_1 = arith.constant 0 : i32
    %c0_i32_2 = arith.constant 0 : i32
    return %c0_i32, %c0_i32_0, %c0_i32_1 : i32, i32, i32
  }
  func.func @transform_15(%arg0: i32) -> (i32, i32, i32) {
    %c0_i32 = arith.constant 0 : i32
    %c0_i32_0 = arith.constant 0 : i32
    %c0_i32_1 = arith.constant 0 : i32
    %c0_i32_2 = arith.constant 0 : i32
    return %c0_i32, %c0_i32_0, %c0_i32_1 : i32, i32, i32
  }
  func.func @transform_16(%arg0: i32) -> (i32, i32, i32) {
    %c0_i32 = arith.constant 0 : i32
    %c0_i32_0 = arith.constant 0 : i32
    %c0_i32_1 = arith.constant 0 : i32
    %c0_i32_2 = arith.constant 0 : i32
    return %c0_i32, %c0_i32_0, %c0_i32_1 : i32, i32, i32
  }
  func.func @transform_17(%arg0: i32) -> (i32, i32) {
    %c0_i32 = arith.constant 0 : i32
    %c0_i32_0 = arith.constant 0 : i32
    %c0_i32_1 = arith.constant 0 : i32
    return %c0_i32, %c0_i32_0 : i32, i32
  }
  func.func @transform_18(%arg0: i32) -> (i32, i32) {
    %c0_i32 = arith.constant 0 : i32
    %c0_i32_0 = arith.constant 0 : i32
    %c0_i32_1 = arith.constant 0 : i32
    return %c0_i32, %c0_i32_0 : i32, i32
  }
  func.func @transform_19(%arg0: i32) -> (i32, i32, i32) {
    %c0_i32 = arith.constant 0 : i32
    %c0_i32_0 = arith.constant 0 : i32
    %c0_i32_1 = arith.constant 0 : i32
    return %arg0, %c0_i32, %c0_i32_0 : i32, i32, i32
  }
}

</mosaic_0001>

<bundles_post_ra>
// kernel: tpu_custom_call.1
= control target key start
LH: loop header
LB: loop body
LE: loop exit
PB: predicated region body
PF: predicated region fallthrough
CT: control target
= control target key end

     0   :  { %s5781_s0 = inlined_call_operand.hbm [shape: f32[2,8,16], index: 0, kind: input, shape index: {}]   ;;  %s5782_s1 = inlined_call_operand.hbm [shape: f32[2,1,8], index: 1, kind: input, shape index: {}]   ;;  %s5783_s2 = inlined_call_operand.hbm [shape: bf16[16,32], index: 2, kind: input, shape index: {}]   ;;  %s5784_s3 = inlined_call_operand.vmem [shape: f32[1,32], index: 3, kind: input, shape index: {}]   ;;  %s5785_s4 = inlined_call_operand.hbm [shape: f32[8,32], index: 4, kind: input, shape index: {}]   ;;  %s5786_s5 = inlined_call_operand.vmem [shape: bf16[2,32,96], index: 5, kind: input, shape index: {}]   ;;  %s5787_s6 = inlined_call_operand.hbm [shape: f32[2,1,96], index: 6, kind: input, shape index: {}]   ;;  %s5788_s7 = inlined_call_operand.vmem [shape: bf16[2,32,32], index: 7, kind: input, shape index: {}]   ;;  %s5789_s8 = inlined_call_operand.hbm [shape: f32[2,1,32], index: 8, kind: input, shape index: {}]   ;;  %s5790_s9 = inlined_call_operand.hbm [shape: f32[2,1,32], index: 9, kind: input, shape index: {}]   ;;  %s5791_s10 = inlined_call_operand.hbm [shape: f32[2,1,32], index: 10, kind: input, shape index: {}]   ;;  %s5792_s11 = inlined_call_operand.vmem [shape: bf16[2,32,64], index: 11, kind: input, shape index: {}]   ;;  %s5793_s12 = inlined_call_operand.hbm [shape: f32[2,1,64], index: 12, kind: input, shape index: {}]   ;;  %s5794_s13 = inlined_call_operand.vmem [shape: bf16[2,64,32], index: 13, kind: input, shape index: {}]   ;;  %s5795_s14 = inlined_call_operand.vmem [shape: f32[2,1,32], index: 14, kind: input, shape index: {}]   ;;  %s5796_s15 = inlined_call_operand.vmem [shape: f32[2,1,32], index: 15, kind: input, shape index: {}]   ;;  %s5797_s16 = inlined_call_operand.vmem [shape: f32[2,1,32], index: 16, kind: input, shape index: {}]   ;;  %s5798_s17 = inlined_call_operand.vmem [shape: bf16[32,128], index: 17, kind: input, shape index: {}]   ;;  %s5799_s18 = inlined_call_operand.vmem [shape: f32[1,128], index: 18, kind: input, shape index: {}]   ;;  %s5800_s19 = inlined_call_operand.hbm [shape: f32[2,1,128], index: 19, kind: output, shape index: {}]  }
   0x1   :  { %5822 = sst [smem:[#allocation25_spill]] %s5781_s0 }
   0x2   :  { %5823 = sst [smem:[#allocation26_spill]] %s5782_s1 }
   0x3   :  { %5824 = sst [smem:[#allocation27_spill]] %s5783_s2 }
   0x4   :  { %5825 = sst [smem:[#allocation28_spill]] %s5784_s3 }
   0x5   :  { %5826 = sst [smem:[#allocation29_spill]] %s5785_s4 }
   0x6   :  { %5827 = sst [smem:[#allocation30_spill]] %s5787_s6 }
   0x7   :  { %5828 = sst [smem:[#allocation31_spill]] %s5789_s8 }
   0x8   :  { %5829 = sst [smem:[#allocation32_spill]] %s5790_s9 }
   0x9   :  { %5830 = sst [smem:[#allocation33_spill]] %s5792_s11 }
   0xa   :  { %5831 = sst [smem:[#allocation34_spill]] %s5794_s13 }
   0xb   :  { %5832 = sst [smem:[#allocation35_spill]] %s5795_s14 }
   0xc   :  { %5833 = sst [smem:[#allocation36_spill]] %s5796_s15 }
   0xd   :  { %5834 = sst [smem:[#allocation37_spill]] %s5797_s16 }
   0xe   :  { %5835 = sst [smem:[#allocation38_spill]] %s5798_s17 }
   0xf   :  { %5836 = sst [smem:[#allocation39_spill]] %s5799_s18 }
  0x10   :  { %5837 = sst [smem:[#allocation40_spill]] %s5800_s19 }
  0x11   :  { %24 = vsyncpa [#allocation3], 0 }
  0x12   :  { %26 = vsyncpa [#allocation3 + $0x1], 0 }
  0x13   :  { %27 = vsyncpa [#allocation6], 0 }
  0x14   :  { %29 = vsyncpa [#allocation6 + $0x1], 0 }
  0x15   :  { %30 = vsyncpa [#allocation9], 0 }
  0x16   :  { %31 = vsyncpa [#allocation12], 0 }
  0x17   :  { %32 = vsyncpa [#allocation15], 0 }
  0x18   :  { %33 = vsyncpa [#allocation4], 0 }
  0x19   :  { %35 = vsyncpa [#allocation4 + $0x1], 0  ;;  %s4872_s0 = smov 0   ;;  %s4874_s30 = smov 0  }
  0x1a   :  { %s4876_s20 = smov 0   ;;  %s4878_s21 = smov 0  }
  0x1b LB: > { %s4746_s1 = smov [#allocation7]   ;;  %s4893_s2 = sadd.s32 4294967295, %s4744_s21   ;;  %s4744_s21 = sphi %s4878_s21, %s5883_s21   ;;  %s4740_s20 = sphi %s4876_s20, %s5882_s20   ;;  %s4736_s30 = sphi %s4874_s30, %s5881_s30   ;;  %s4732_s0 = sphi %s4872_s0, %s5880_s0  }
  0x1c   : > { %s493_s22 = sshll.u32 %s4746_s1, 4  ;;  %p3824_p0 = scmp.ge.s32.totalorder %s4744_s21, 1  ;;  %s4898_s22 = int_to_ptr.vmem [resolvable:$true] %s493_s22 }
  0x1d   : > { %p5811_p1 = scmp.eq.s32.totalorder %s4893_s2, 0  ;;  %p481_p2 = scmp.lt.s32.totalorder %s4744_s21, 3 }
  0x1e   : > { %s4747_s24 = smov [#allocation8]   ;;  %s4748_s26 = smov [#allocation11]  }
  0x1f   : > { %p4900_p3 = pnand %p3824_p0, %p481_p2  ;;  %s510_s25 = sshll.u32 %s4747_s24, 4  ;;  %s4913_s25 = int_to_ptr.vmem [resolvable:$true] %s510_s25 }
  0x20   : > { %s4915_s27 = sshll.u32 %s4748_s26, 4  ;;  %s5840_s1 = sld [smem:[#allocation27_spill]]  ;;  %s540_s27 = int_to_ptr.vmem [resolvable:$true] %s4915_s27 }
  0x21   : > { %s5838_s23 = scalar_select %p4900_p3, 1, 0 }
  0x22   : > { %p4235_p5 = pneg %p4900_p3 }
  0x24   : > { %p4909_p6 = pnand %p4235_p5, %p5811_p1 }
  0x26   : > { %s4402_s19 = scalar_lea.hbm %s5840_s1, 128  ;;  %p4925_p8 = pneg %p4909_p6 }
  0x27   : > { %p4403_p7 = scmp.ne.s32.totalorder %s5840_s1, %s4402_s19  ;;  %p4409_p11 = scmp.lt.u32.totalorder %s4402_s19, %s5840_s1 }
  0x29   : > { %p4405_p9 = pnand %p4925_p8, %p4403_p7 }
  0x2b   : > { %p4406_p10 = pneg %p4405_p9 }
  0x2d   : > { %p4411_p12 = pnand %p4409_p11, %p4406_p10 }
  0x2f   : > { %4414 = shalt.err (!%p4411_p12)
}
  0x30   : > { %s4415_s17 = scalar_lea.vmem %s4898_s22, 128  ;;  %p4423_p5 = scmp.lt.s32.totalorder %s4898_s22, %s4898_s22 }
  0x31   : > { %p4416_p13 = scmp.ne.s32.totalorder %s4898_s22, %s4415_s17  ;;  %p4424_p4 = scmp.lt.s32.totalorder %s4415_s17, %s4415_s17 }
  0x33   : > { %p4418_p0 = pnand %p4416_p13, %p4925_p8  ;;  %p4425_p7 = por %p4424_p4, %p4423_p5 }
  0x35   : > { %p4419_p2 = pneg %p4418_p0 }
  0x37   : > { %p4426_p9 = pnand %p4425_p7, %p4419_p2 }
  0x39   : > { %4429 = shalt.err (!%p4426_p9)
}
  0x3a   : > { %s4749_s18 = smov 64   ;;  %s4750_s16 = smov 4  }
  0x3b   : > { %4238 = dma.hbm_to_vmem [thread:$0]  (!%p4909_p6), %s5840_s1, 128, %s4898_s22, [#allocation6], %s4749_s18, %s4749_s18, %s4750_s16  }
  0x3c   : > { %s5842_s4 = sld [smem:[#allocation29_spill]] }
  0x42   : > { %s4430_s15 = scalar_lea.hbm %s5842_s4, 128 }
  0x43   : > { %p4431_p4 = scmp.ne.s32.totalorder %s5842_s4, %s4430_s15  ;;  %p4437_p12 = scmp.lt.u32.totalorder %s4430_s15, %s5842_s4 }
  0x45   : > { %p4433_p10 = pnand %p4431_p4, %p4925_p8 }
  0x47   : > { %p4434_p11 = pneg %p4433_p10 }
  0x49   : > { %p4439_p13 = pnand %p4437_p12, %p4434_p11 }
  0x4b   : > { %4442 = shalt.err (!%p4439_p13)
}
  0x4c   : > { %s4443_s22 = scalar_lea.vmem %s4913_s25, 128  ;;  %p4451_p7 = scmp.lt.s32.totalorder %s4913_s25, %s4913_s25 }
  0x4d   : > { %p4444_p0 = scmp.ne.s32.totalorder %s4913_s25, %s4443_s22  ;;  %p4452_p9 = scmp.lt.s32.totalorder %s4443_s22, %s4443_s22 }
  0x4f   : > { %p4446_p2 = pnand %p4444_p0, %p4925_p8  ;;  %p4453_p4 = por %p4452_p9, %p4451_p7 }
  0x51   : > { %p4447_p5 = pneg %p4446_p2 }
  0x53   : > { %p4454_p10 = pnand %p4453_p4, %p4447_p5 }
  0x55   : > { %4457 = shalt.err (!%p4454_p10)
}
  0x56   : > { %4241 = dma.hbm_to_vmem [thread:$0]  (!%p4909_p6), %s5842_s4, 128, %s4913_s25, [#allocation9]  }
  0x57   : > { %s5843_s8 = sld [smem:[#allocation31_spill]] }
  0x5d   : > { %s4458_s18 = scalar_lea.hbm %s5843_s8, 32 }
  0x5e   : > { %p4459_p11 = scmp.ne.s32.totalorder %s5843_s8, %s4458_s18  ;;  %p4465_p0 = scmp.lt.u32.totalorder %s4458_s18, %s5843_s8 }
  0x60   : > { %p4461_p12 = pnand %p4459_p11, %p4925_p8 }
  0x62   : > { %p4462_p13 = pneg %p4461_p12 }
  0x64   : > { %p4467_p2 = pnand %p4465_p0, %p4462_p13 }
  0x66   : > { %4470 = shalt.err (!%p4467_p2)
}
  0x67   : > { %s4471_s26 = scalar_lea.vmem %s540_s27, 32  ;;  %p4479_p4 = scmp.lt.s32.totalorder %s540_s27, %s540_s27 }
  0x68   : > { %p4472_p5 = scmp.ne.s32.totalorder %s540_s27, %s4471_s26  ;;  %p4480_p10 = scmp.lt.s32.totalorder %s4471_s26, %s4471_s26 }
  0x6a   : > { %p4474_p7 = pnand %p4472_p5, %p4925_p8  ;;  %p4481_p1 = por %p4480_p10, %p4479_p4 }
  0x6c   : > { %p4475_p9 = pneg %p4474_p7 }
  0x6e   : > { %p4482_p3 = pnand %p4481_p1, %p4475_p9 }
  0x70   : > { %4485 = shalt.err (!%p4482_p3)
}
  0x71   : > { %s4751_s25 = smov 16   ;;  %s4752_s17 = smov 1  }
  0x72   : > { %4247 = dma.hbm_to_vmem [thread:$0]  (!%p4909_p6), %s5843_s8, 32, %s540_s27, [#allocation12], %s4751_s25, %s4751_s25, %s4752_s17  }
  0x73   : > { %s4753_s13 = smov [#allocation14]   ;;  %s4754_s15 = smov [#allocation10]  }
  0x74   : > { %s565_s14 = sshll.u32 %s4753_s13, 4  ;;  %s523_s18 = sshll.u32 %s4754_s15, 4  ;;  %s566_s14 = int_to_ptr.vmem [resolvable:$true] %s565_s14  ;;  %s524_s18 = int_to_ptr.vmem [resolvable:$true] %s523_s18 }
  0x75   : > { %s4486_s28 = scalar_lea.hbm %s5791_s10, 32 }
  0x76   : > { %p4487_p1 = scmp.ne.s32.totalorder %s5791_s10, %s4486_s28  ;;  %p4493_p12 = scmp.lt.u32.totalorder %s4486_s28, %s5791_s10 }
  0x78   : > { %p4489_p3 = pnand %p4487_p1, %p4925_p8 }
  0x7a   : > { %p4490_p11 = pneg %p4489_p3 }
  0x7c   : > { %p4495_p13 = pnand %p4493_p12, %p4490_p11 }
  0x7e   : > { %4498 = shalt.err (!%p4495_p13)
}
  0x7f   : > { %s4499_s27 = scalar_lea.vmem %s566_s14, 32  ;;  %p4507_p7 = scmp.lt.s32.totalorder %s566_s14, %s566_s14 }
  0x80   : > { %p4500_p0 = scmp.ne.s32.totalorder %s566_s14, %s4499_s27  ;;  %p4508_p9 = scmp.lt.s32.totalorder %s4499_s27, %s4499_s27 }
  0x82   : > { %p4502_p2 = pnand %p4500_p0, %p4925_p8  ;;  %p4509_p4 = por %p4508_p9, %p4507_p7 }
  0x84   : > { %p4503_p5 = pneg %p4502_p2 }
  0x86   : > { %p4510_p10 = pnand %p4509_p4, %p4503_p5 }
  0x88   : > { %4513 = shalt.err (!%p4510_p10)
}
  0x89   : > { %4253 = dma.hbm_to_vmem [thread:$0]  (!%p4909_p6), %s5791_s10, 32, %s566_s14, [#allocation15], %s4751_s25, %s4751_s25, %s4752_s17  }
  0x8a   : > { %s5844_s6 = sld [smem:[#allocation30_spill]] }
  0x90   : > { %s4514_s13 = scalar_lea.hbm %s5844_s6, 32 }
  0x91   : > { %p4515_p1 = scmp.ne.s32.totalorder %s5844_s6, %s4514_s13  ;;  %p4521_p12 = scmp.lt.u32.totalorder %s4514_s13, %s5844_s6 }
  0x93   : > { %p4517_p3 = pnand %p4515_p1, %p4925_p8 }
  0x95   : > { %p4518_p11 = pneg %p4517_p3 }
  0x97   : > { %p4523_p13 = pnand %p4521_p12, %p4518_p11 }
  0x99   : > { %4526 = shalt.err (!%p4523_p13)
}
  0x9a   : > { %s4527_s29 = scalar_lea.vmem %s524_s18, 32  ;;  %p4535_p7 = scmp.lt.s32.totalorder %s524_s18, %s524_s18 }
  0x9b   : > { %p4528_p0 = scmp.ne.s32.totalorder %s524_s18, %s4527_s29  ;;  %p4536_p9 = scmp.lt.s32.totalorder %s4527_s29, %s4527_s29 }
  0x9d   : > { %p4530_p2 = pnand %p4528_p0, %p4925_p8  ;;  %p4537_p4 = por %p4536_p9, %p4535_p7 }
  0x9f   : > { %p4531_p5 = pneg %p4530_p2 }
  0xa1   : > { %p4538_p10 = pnand %p4537_p4, %p4531_p5 }
  0xa3   : > { %4541 = shalt.err (!%p4538_p10)
}
  0xa4   : > { %4244 = dma.hbm_to_vmem [thread:$0]  (!%p4909_p6), %s5844_s6, 32, %s524_s18, [#allocation9], %s4751_s25, %s4751_s25, %s4752_s17  }
  0xa5   : > { %s4755_s27 = smov [#allocation13]   ;;  %s4756_s1 = smov [#allocation16]  }
  0xa6   : > { %s552_s4 = sshll.u32 %s4755_s27, 4  ;;  %s581_s22 = sshll.u32 %s4756_s1, 4  ;;  %s553_s4 = int_to_ptr.vmem [resolvable:$true] %s552_s4  ;;  %s582_s22 = int_to_ptr.vmem [resolvable:$true] %s581_s22 }
  0xa7   : > { %s5845_s9 = sld [smem:[#allocation32_spill]] }
  0xad   : > { %s4542_s15 = scalar_lea.hbm %s5845_s9, 32 }
  0xae   : > { %p4543_p1 = scmp.ne.s32.totalorder %s5845_s9, %s4542_s15  ;;  %p4549_p12 = scmp.lt.u32.totalorder %s4542_s15, %s5845_s9 }
  0xb0   : > { %p4545_p3 = pnand %p4543_p1, %p4925_p8 }
  0xb2   : > { %p4546_p11 = pneg %p4545_p3 }
  0xb4   : > { %p4551_p13 = pnand %p4549_p12, %p4546_p11 }
  0xb6   : > { %4554 = shalt.err (!%p4551_p13)
}
  0xb7   : > { %s4555_s18 = scalar_lea.vmem %s553_s4, 32  ;;  %p4563_p7 = scmp.lt.s32.totalorder %s553_s4, %s553_s4 }
  0xb8   : > { %p4556_p0 = scmp.ne.s32.totalorder %s553_s4, %s4555_s18  ;;  %p4564_p9 = scmp.lt.s32.totalorder %s4555_s18, %s4555_s18 }
  0xba   : > { %p4558_p2 = pnand %p4556_p0, %p4925_p8  ;;  %p4565_p4 = por %p4564_p9, %p4563_p7 }
  0xbc   : > { %p4559_p5 = pneg %p4558_p2 }
  0xbe   : > { %p4566_p10 = pnand %p4565_p4, %p4559_p5 }
  0xc0   : > { %4569 = shalt.err (!%p4566_p10)
}
  0xc1   : > { %4250 = dma.hbm_to_vmem [thread:$0]  (!%p4909_p6), %s5845_s9, 32, %s553_s4, [#allocation12], %s4751_s25, %s4751_s25, %s4752_s17  }
  0xc2   : > { %s4570_s11 = scalar_lea.hbm %s5793_s12, 32 }
  0xc3   : > { %p4571_p1 = scmp.ne.s32.totalorder %s5793_s12, %s4570_s11  ;;  %p4577_p12 = scmp.lt.u32.totalorder %s4570_s11, %s5793_s12 }
  0xc5   : > { %p4573_p3 = pnand %p4571_p1, %p4925_p8 }
  0xc7   : > { %p4574_p11 = pneg %p4573_p3 }
  0xc9   : > { %p4579_p13 = pnand %p4577_p12, %p4574_p11 }
  0xcb   : > { %4582 = shalt.err (!%p4579_p13)
}
  0xcc   : > { %s4583_s28 = scalar_lea.vmem %s582_s22, 32  ;;  %p4591_p7 = scmp.lt.s32.totalorder %s582_s22, %s582_s22 }
  0xcd   : > { %p4584_p0 = scmp.ne.s32.totalorder %s582_s22, %s4583_s28  ;;  %p4592_p9 = scmp.lt.s32.totalorder %s4583_s28, %s4583_s28 }
  0xcf   : > { %p4586_p2 = pnand %p4584_p0, %p4925_p8  ;;  %p4593_p4 = por %p4592_p9, %p4591_p7 }
  0xd1   : > { %p4587_p5 = pneg %p4586_p2 }
  0xd3   : > { %p4594_p10 = pnand %p4593_p4, %p4587_p5 }
  0xd5   : > { %4597 = shalt.err (!%p4594_p10)
}
  0xd6   : > { %4256 = dma.hbm_to_vmem [thread:$0]  (!%p4909_p6), %s5793_s12, 32, %s582_s22, [#allocation15], %s4751_s25, %s4751_s25, %s4752_s17  }
  0xd7   : > { %s3823_s3 = sadd.s32 4294967294, %s4744_s21   ;;  %s5077_s24 = sadd.s32 1, %s4744_s21  }
  0xd8   : > { %s48_s18 = sadd.s32 1, %s4740_s20  ;;  %s45_s14 = ssub.s32 %s4744_s21, %s5077_s24 }
  0xd9   : > { %p55_p8 = scmp.ne.s32.totalorder %s4740_s20, %s4736_s30  ;;  %p46_p1 = scmp.eq.s32.totalorder %s45_s14, 0 }
  0xda   : > { %p56_p3 = scmp.eq.s32.totalorder %s4744_s21, 0  ;;  %p61_p11 = scmp.ne.s32.totalorder %s4736_s30, %s4732_s0 }
  0xdb   : > { %p468_p12 = scmp.eq.s32.totalorder %s4893_s2, 1  ;;  %p5846_p0 = scmp.eq.s32.totalorder %s4893_s2, 0 }
  0xdc   : > { %s5089_s26 = scalar_select %p46_p1, %s4740_s20, %s48_s18  }
  0xdd   : > { %p57_p13 = por %p56_p3, %p55_p8  ;;  %p5093_p2 = por %p5846_p0, %p61_p11 }
  0xde   : > { %p5097_p6 = por %p468_p12, %p55_p8  ;;  %p474_p5 = scmp.eq.s32.totalorder %s3823_s3, 1 }
  0xdf   : > { %s5847_s25 = scalar_select %p5093_p2, 1, 0 }
  0xe0   : > { %s5848_s17 = scalar_select %p5097_p6, 1, 0 }
  0xe1   : > { %p4275_p7 = scmp.lt.s32.totalorder %s4744_s21, 2  ;;  %s5103_s22 = sand.u32 1, %s4740_s20  }
  0xe2   : > { %p5105_p9 = por %p474_p5, %p61_p11  ;;  %s3833_s1 = sshll.u32 %s5103_s22, 3 }
  0xe3   : > { %s3834_s11 = sshll.u32 %s4744_s21, 7  ;;  %s5850_s16 = sld [smem:[#allocation25_spill]] }
  0xe4   : > { %s5849_s27 = scalar_select %p5105_p9, 1, 0 }
  0xe5   : > { %s617_s28 = scalar_lea.vmem [#allocation2], %s3833_s1  ;;  %p5116_p4 = pnand %p4275_p7, %p57_p13 }
  0xe6   : > { %s624_s4 = sshll.u32 %s617_s28, 4  ;;  %s614_s18 = scalar_lea.sflag [#allocation3], %s5103_s22  ;;  %s5120_s4 = int_to_ptr.vmem [resolvable:$true] %s624_s4 }
  0xe7   : > { %p4600_p8 = pneg %p5116_p4 }
  0xe9   : > { %s5114_s19 = scalar_lea.hbm %s5850_s16, %s3834_s11  ;;  %s4603_s13 = scalar_lea.hbm %s5850_s16, 256 }
  0xea   : > { %s4598_s14 = scalar_lea.hbm %s5114_s19, 128  ;;  %p4604_p11 = scmp.lt.u32.totalorder %s5114_s19, %s5850_s16 }
  0xeb   : > { %p4599_p10 = scmp.ne.s32.totalorder %s5114_s19, %s4598_s14  ;;  %p4605_p12 = scmp.lt.u32.totalorder %s4603_s13, %s4598_s14 }
  0xec   : > { %p4607_p0 = scmp.lt.u32.totalorder %s4598_s14, %s5114_s19 }
  0xed   : > { %p4601_p1 = pnand %p4600_p8, %p4599_p10  ;;  %p4606_p13 = por %p4605_p12, %p4604_p11 }
  0xef   : > { %p4602_p3 = pneg %p4601_p1  ;;  %p4608_p5 = por %p4607_p0, %p4606_p13 }
  0xf1   : > { %p4609_p7 = pnand %p4608_p5, %p4602_p3 }
  0xf3   : > { %4612 = shalt.err (!%p4609_p7)
}
  0xf4   : > { %s4613_s3 = scalar_lea.vmem %s5120_s4, 128  ;;  %s4757_s1 = smov [#allocation2]  }
  0xf5   : > { %p4614_p10 = scmp.ne.s32.totalorder %s5120_s4, %s4613_s3  ;;  %s4618_s11 = sshll.u32 %s4757_s1, 4  ;;  %s4619_s11 = int_to_ptr.vmem [resolvable:$false] %s4618_s11 }
  0xf6   : > { %s4620_s15 = scalar_lea.vmem %s4619_s11, 256  ;;  %p4621_p6 = scmp.lt.s32.totalorder %s5120_s4, %s4619_s11 }
  0xf7   : > { %p4616_p1 = pnand %p4614_p10, %p4600_p8  ;;  %p4622_p11 = scmp.lt.s32.totalorder %s4620_s15, %s4613_s3 }
  0xf9   : > { %p4617_p9 = pneg %p4616_p1  ;;  %p4623_p12 = por %p4622_p11, %p4621_p6 }
  0xfb   : > { %p4624_p13 = pnand %p4623_p12, %p4617_p9 }
  0xfd   : > { %4627 = shalt.err (!%p4624_p13)
}
  0xfe   : > { %4260 = dma.hbm_to_vmem [thread:$0]  (!%p5116_p4), %s5114_s19, 128, %s5120_s4, %s614_s18  }
  0xff   : > { %s3835_s14 = sshll.u32 %s4744_s21, 4  ;;  %s5852_s1 = sld [smem:[#allocation26_spill]] }
 0x100   : > { %s634_s3 = scalar_lea.vmem [#allocation5], %s5103_s22  ;;  %s5853_s15 = sand.u32 1, %s4744_s21  }
 0x101   : > { %s641_s11 = sshll.u32 %s634_s3, 4  ;;  %s632_s8 = scalar_lea.sflag [#allocation6], %s5853_s15  ;;  %s642_s11 = int_to_ptr.vmem [resolvable:$true] %s641_s11 }
 0x105   : > { %s5153_s6 = scalar_lea.hbm %s5852_s1, %s3835_s14  ;;  %s4633_s18 = scalar_lea.hbm %s5852_s1, 32 }
 0x106   : > { %s4628_s9 = scalar_lea.hbm %s5153_s6, 16  ;;  %p4634_p0 = scmp.lt.u32.totalorder %s5153_s6, %s5852_s1 }
 0x107   : > { %p4629_p6 = scmp.ne.s32.totalorder %s5153_s6, %s4628_s9  ;;  %p4635_p5 = scmp.lt.u32.totalorder %s4633_s18, %s4628_s9 }
 0x108   : > { %p4637_p10 = scmp.lt.u32.totalorder %s4628_s9, %s5153_s6 }
 0x109   : > { %p4631_p9 = pnand %p4629_p6, %p4600_p8  ;;  %p4636_p7 = por %p4635_p5, %p4634_p0 }
 0x10b   : > { %p4632_p3 = pneg %p4631_p9  ;;  %p4638_p1 = por %p4637_p10, %p4636_p7 }
 0x10d   : > { %p4639_p11 = pnand %p4638_p1, %p4632_p3 }
 0x10f   : > { %4642 = shalt.err (!%p4639_p11)
}
 0x110   : > { %s4643_s22 = scalar_lea.vmem %s642_s11, 16  ;;  %s4758_s28 = smov [#allocation5]  }
 0x111   : > { %p4644_p12 = scmp.ne.s32.totalorder %s642_s11, %s4643_s22  ;;  %s4648_s3 = sshll.u32 %s4758_s28, 4  ;;  %s4649_s3 = int_to_ptr.vmem [resolvable:$false] %s4648_s3 }
 0x112   : > { %s4650_s15 = scalar_lea.vmem %s4649_s3, 32  ;;  %p4651_p9 = scmp.lt.s32.totalorder %s642_s11, %s4649_s3 }
 0x113   : > { %p4646_p13 = pnand %p4644_p12, %p4600_p8  ;;  %p4652_p2 = scmp.lt.s32.totalorder %s4650_s15, %s4643_s22 }
 0x115   : > { %p4647_p6 = pneg %p4646_p13  ;;  %p4653_p0 = por %p4652_p2, %p4651_p9 }
 0x117   : > { %p4654_p5 = pnand %p4653_p0, %p4647_p6 }
 0x119   : > { %4657 = shalt.err (!%p4654_p5)
}
 0x11a   : > { %4263 = dma.hbm_to_vmem [thread:$0]  (!%p5116_p4), %s5153_s6, 16, %s642_s11, %s632_s8  }
 0x11b   : > { %p5854_p3 = scmp.ne.s32.totalorder %s5838_s23, 0 }
 0x11c   : > { %s5180_s9 = sand.u32 (!%p5854_p3), 1, %s4736_s30   ;;  %p5855_p8 = scmp.ne.s32.totalorder (!%p5854_p3), %s5847_s25, 0 }
 0x11d   : > { %650 = sbr.rel (%p5854_p3) target bundleno = 6163 (0x1813), region = 96  ;;  %s3837_s19 = sshll.u32 (!%p5854_p3), %s5180_s9, 3 }
 0x11e   : > { %s653_s4 = scalar_lea.sflag (!%p5854_p3), [#allocation3], %s5180_s9  ;;  %s656_s18 = scalar_lea.vmem (!%p5854_p3), [#allocation2], %s3837_s19 }
 0x124   : > { %4703 = dma.done.wait (%p5855_p8), %s653_s4, 128  }
 0x125   : > { %4705 = vsyncadd (%p5855_p8), %s653_s4, 4294967168  ;;  %s661_s6 = sand.u32 1, %s4893_s2   ;;  %s664_s23 = scalar_lea.vmem [#allocation5], %s5180_s9 }
 0x126   : > { %s662_s8 = scalar_lea.sflag [#allocation6], %s661_s6 }
 0x127   : > { %4707 = dma.done.wait (%p5855_p8), %s662_s8, 16  }
 0x128   : > { %4709 = vsyncadd (%p5855_p8), %s662_s8, 4294967280  ;;  %p5856_p2 = scmp.eq.s32.totalorder %s4893_s2, 0 }
 0x12a   : > { %4711 = dma.done.wait (%p5856_p2), [#allocation6], 128   ;;  %p5857_p4 = pmov %p5856_p2 }
 0x12b   : > { %p5858_p7 = pmov %p5856_p2 }
 0x12c   : > { %4713 = vsyncadd (%p5857_p4), [#allocation6], 4294967168 }
 0x12d   : > { %4715 = dma.done.wait (%p5858_p7), [#allocation9], 160   ;;  %p5859_p10 = pmov %p5856_p2 }
 0x12e   : > { %p5860_p1 = pmov %p5856_p2 }
 0x12f   : > { %4717 = vsyncadd (%p5859_p10), [#allocation9], 4294967136 }
 0x130   : > { %4719 = dma.done.wait (%p5860_p1), [#allocation12], 64   ;;  %p5861_p11 = pmov %p5860_p1 }
 0x131   : > { %p5862_p12 = pmov %p5860_p1 }
 0x132   : > { %4721 = vsyncadd (%p5861_p11), [#allocation12], 4294967232 }
 0x133   : > { %4723 = dma.done.wait (%p5862_p12), [#allocation15], 64   ;;  %p5863_p13 = pmov %p5860_p1 }
 0x134   : > { %v4759_v0 = vmov 0.0   ;;  %vm4760_vm0 = vmmov 0   ;;  %v4339_v1 = vld [vmem:[#allocation7] sm:$0xff]   ;;  %v751_v2 = vld [vmem:[%s656_s18] sm:$0xff]  ;;  %vm768_vm1 = vcmask 130048   ;;  %s5864_s28 = sld [smem:[#allocation28_spill]]  ;;  %v898_v26 = vlaneseq }
 0x135   : > { %4725 = vsyncadd (%p5863_p13), [#allocation15], 4294967232  ;;  %4019 = vmatprep.subr.bf16.mxu0 %v4759_v0  ;;  %4021 = vmatprep.mubr.msk.bf16.mxu0 %vm4760_vm0, %v4759_v0  ;;  %v754_v3 = vpack.c.bf16 %v751_v2, %v751_v2  ;;  %v4340_v4 = vld [vmem:[%s5786_s5] sm:$0xff]   ;;  %v4341_v5 = vld [vmem:[%s5786_s5 + $0x8] sm:$0xff]   ;;  %vm839_vm2 = vcmask 261120   ;;  %s4761_s3 = smov 104  }
 0x136   : > { %4025 = vmatprep.subr.bf16.mxu1 %v4759_v0  ;;  %4029 = vmatprep.mubr.msk.bf16.mxu1 %vm4760_vm0, %v4759_v0  ;;  %v812_v8 = vld [vmem:[#allocation8] sm:$0xff]  ;;  %v3848_v15 = vld [vmem:[#allocation10] ss:$0 sm:$0xff]  ;;  %s4762_s15 = smov 120   ;;  %s4763_s19 = smov 96   ;;  %v899_v28 = vshrl.u32 %v898_v26, 7 }
 0x137   : > { %4020 = vmatpush3.bf16.msra.mxu0 %v4339_v1  ;;  %4026 = vmatpush3.bf16.msra.mxu1 %v4340_v4  ;;  %s4764_s4 = smov 112   ;;  %v4765_v24 = vmov 1983009808   ;;  %v4766_v29 = vmov 1934713408   ;;  %vm1337_vm3 = vcmask 64512  }
 0x138   : > { %4033 = vmatprep.subr.bf16.mxu0 %v4759_v0  ;;  %4027 = vmatprep.subr.bf16.mxu1 %v4759_v0  ;;  %v896_v25 = vunpack.c.l.s4 %v4765_v24  ;;  %v928_v30 = vunpack.c.l.s4 %v4766_v29  ;;  %s5819_s18 = smov 64   ;;  %vm1587_vm4 = vcmask 1043456   ;;  %s5818_s29 = smov 16   ;;  %vm1919_vm5 = vcmask 195584  }
 0x139   : > { %s5817_s11 = smov 8   ;;  %s5816_s14 = smov 24   ;;  %vm2127_vm6 = vcmask 523264  }
 0x13a   : > { %4022 = vmatmul.mubr.msk.bf16.vlgmr.msra.gmra.mrb[0].mxu0 %vm768_vm1, %v754_v3  ;;  %v3845_v6 = vld [vmem:[%s5864_s28] ss:$0 sm:$0xff]  ;;  %v897_v27 = vunpack.c.0.s8 %v896_v25  ;;  %v929_v36 = vunpack.c.0.s8 %v928_v30  ;;  %s5865_s28 = sld [smem:[#allocation33_spill]]  ;;  %s5868_s8 = sld [smem:[#allocation36_spill]] }
 0x13b   : > { %4035 = vmatprep.mubr.msk.bf16.mxu0 %vm4760_vm0, %v4759_v0  ;;  %4028 = vmatpush3.bf16.msra.mxu1 %v4341_v5  ;;  %s5871_s13 = smov 16   ;;  %s5872_s22 = smov 8  }
 0x13c   : > { %4039 = vmatprep.subr.bf16.mxu1 %v4759_v0  ;;  %v5264_v33 = vsub.s32 %v897_v27, %v899_v28  ;;  %v5274_v43 = vsub.s32 %v929_v36, %v899_v28  ;;  %s5873_s6 = smov 24   ;;  %p5877_p9 = scmp.ne.s32.totalorder %s5848_s17, 0 }
 0x20d   : > { %v806_v7 = vpop.f32.mrb[0].mxu0 }
 0x20e   : > { %v807_v9 = vadd.f32 %v3845_v6, %v806_v7  ;;  %v4023_v10 = vpop.f32.mrb[1].mxu0 }
 0x20f   : > { %v809_v11 = vpop.f32.mrb[2].mxu0 }
 0x210   : > { %v5231_v12 = vadd.f32 %v812_v8, %v807_v9  ;;  %v4024_v13 = vpop.f32.mrb[3].mxu0 }
 0x212   : > { %v819_v14 = vpack.c.bf16 %v5231_v12, %v5231_v12 }
 0x214   : > { %4030 = vmatmul.mubr.msk.bf16.vlgmr.msra.gmra.mrb[0].mxu1 %vm839_vm2, %v819_v14 }
 0x215   : > { %4041 = vmatprep.mubr.msk.bf16.mxu1 %vm4760_vm0, %v4759_v0 }
 0x2e7   : > { %v877_v16 = vpop.f32.mrb[0].mxu1 }
 0x2e8   : > { %v5238_v17 = vadd.f32 %v3848_v15, %v877_v16  ;;  %v4031_v18 = vpop.f32.mrb[1].mxu1 }
 0x2e9   : > { %v880_v19 = vpop.f32.mrb[2].mxu1 }
 0x2ea   : > { %890 = vrot.lane.b32.xlu1 %v5238_v17, %s4761_s3  ;;  %884 = vrot.lane.b32.xlu0 %v5238_v17, %s4762_s15  ;;  %v4032_v20 = vpop.f32.mrb[3].mxu1 }
 0x2ee   : > { %1033 = vrot.lane.b32.xlu1 %v5238_v17, %s4763_s19  ;;  %887 = vrot.lane.b32.xlu0 %v5238_v17, %s4764_s4 }
 0x35c   : > { %v5248_v21 = vpop.permute.xlu0 %884  ;;  %v5252_v22 = vpop.permute.xlu1 %890 }
 0x35d   : > { %1035 = vrot.lane.b32.xlu0 %v5248_v21, %s4763_s19  ;;  %v909_v34 = vcombine.low %v5248_v21, %v5252_v22  ;;  %v910_v35 = vcombine.high %v5248_v21, %v5252_v22 }
 0x35f   : > { %v917_v39 = vrot.slane %v909_v34, %v5264_v33  ;;  %v924_v40 = vrot.slane %v910_v35, %v5264_v33 }
 0x360   : > { %v5254_v23 = vpop.permute.xlu0 %887  ;;  %v1034_v41 = vpop.permute.xlu1 %1033 }
 0x361   : > { %1039 = vrot.lane.b32.xlu0 %v5252_v22, %s4763_s19  ;;  %1037 = vrot.lane.b32.xlu1 %v5254_v23, %s4763_s19  ;;  %v893_v31 = vcombine.low %v5238_v17, %v5254_v23  ;;  %v894_v32 = vcombine.high %v5238_v17, %v5254_v23 }
 0x363   : > { %v901_v37 = vrot.slane %v893_v31, %v5264_v33  ;;  %v908_v38 = vrot.slane %v894_v32, %v5264_v33 }
 0x365   : > { %v925_v44 = vcombine.low %v901_v37, %v917_v39  ;;  %v926_v45 = vcombine.high %v901_v37, %v917_v39  ;;  %v941_v46 = vcombine.low %v908_v38, %v924_v40  ;;  %v942_v47 = vcombine.high %v908_v38, %v924_v40 }
 0x367   : > { %v933_v54 = vrot.slane %v925_v44, %v5274_v43  ;;  %v940_v55 = vrot.slane %v926_v45, %v5274_v43  ;;  %v949_v56 = vrot.slane %v941_v46, %v5274_v43  ;;  %v956_v57 = vrot.slane %v942_v47, %v5274_v43 }
 0x369   : > { %v961_v3 = vcombine.low %v933_v54, %v940_v55  ;;  %v3852_v4 = vcombine.high %v933_v54, %v940_v55  ;;  %v977_v5 = vcombine.low %v949_v56, %v956_v57  ;;  %v3853_v6 = vcombine.high %v949_v56, %v956_v57 }
 0x36b   : > { %v968_v16 = vrot.slane %v961_v3, %v5264_v33  ;;  %v976_v18 = vrot.slane %v3852_v4, %v5264_v33  ;;  %v984_v19 = vrot.slane %v977_v5, %v5264_v33  ;;  %v992_v20 = vrot.slane %v3853_v6, %v5264_v33  ;;  %v5326_v5 = vld [vmem:[%s664_s23] ss:$0 sm:$0xff]  ;;  %s5867_s23 = sld [smem:[#allocation35_spill]] }
 0x36d   : > { %v993_v35 = vcombine.low %v968_v16, %v976_v18  ;;  %v1009_v36 = vcombine.low %v984_v19, %v992_v20 }
 0x36f   : > { %v1001_v44 = vrot.slane %v993_v35, %v5274_v43  ;;  %v1017_v45 = vrot.slane %v1009_v36, %v5274_v43 }
 0x3cf   : > { %v1036_v42 = vpop.permute.xlu0 %1035 }
 0x3d3   : > { %v1038_v48 = vpop.permute.xlu1 %1037  ;;  %v1040_v49 = vpop.permute.xlu0 %1039 }
 0x3d4   : > { %v1045_v50 = vcombine.low %v1034_v41, %v1038_v48  ;;  %v1046_v51 = vcombine.high %v1034_v41, %v1038_v48  ;;  %v1061_v52 = vcombine.low %v1036_v42, %v1040_v49  ;;  %v1062_v53 = vcombine.high %v1036_v42, %v1040_v49 }
 0x3d6   : > { %v1053_v58 = vrot.slane %v1045_v50, %v5264_v33  ;;  %v1060_v59 = vrot.slane %v1046_v51, %v5264_v33  ;;  %v1069_v60 = vrot.slane %v1061_v52, %v5264_v33  ;;  %v1076_v61 = vrot.slane %v1062_v53, %v5264_v33 }
 0x3d7   : > { %v994_v50 = vcombine.high %v968_v16, %v976_v18  ;;  %v1025_v51 = vcombine.low %v1001_v44, %v1017_v45  ;;  %v1026_v52 = vcombine.high %v1001_v44, %v1017_v45  ;;  %v1010_v53 = vcombine.high %v984_v19, %v992_v20 }
 0x3d8   : > { %v1077_v62 = vcombine.low %v1053_v58, %v1069_v60  ;;  %v1078_v63 = vcombine.high %v1053_v58, %v1069_v60  ;;  %v1093_v1 = vcombine.low %v1060_v59, %v1076_v61  ;;  %v1094_v2 = vcombine.high %v1060_v59, %v1076_v61 }
 0x3d9   : > { %v1029_v56 = vpack.c.bf16 %v1025_v51, %v1025_v51  ;;  %v1030_v57 = vpack.c.bf16 %v1026_v52, %v1026_v52  ;;  %v1008_v58 = vrot.slane %v994_v50, %v5274_v43  ;;  %v1024_v59 = vrot.slane %v1010_v53, %v5274_v43 }
 0x3da   : > { %v1085_v7 = vrot.slane %v1077_v62, %v5274_v43  ;;  %v1092_v8 = vrot.slane %v1078_v63, %v5274_v43  ;;  %v1101_v9 = vrot.slane %v1093_v1, %v5274_v43  ;;  %v1108_v10 = vrot.slane %v1094_v2, %v5274_v43 }
 0x3db   : > { %v1027_v62 = vcombine.low %v1008_v58, %v1024_v59  ;;  %v1028_v63 = vcombine.high %v1008_v58, %v1024_v59 }
 0x3dc   : > { %v1113_v11 = vcombine.low %v1085_v7, %v1092_v8  ;;  %v3854_v13 = vcombine.high %v1085_v7, %v1092_v8  ;;  %v1129_v14 = vcombine.low %v1101_v9, %v1108_v10  ;;  %v3855_v15 = vcombine.high %v1101_v9, %v1108_v10 }
 0x3dd   : > { %v1031_v1 = vpack.c.bf16 %v1027_v62, %v1027_v62  ;;  %v1032_v2 = vpack.c.bf16 %v1028_v63, %v1028_v63 }
 0x3de   : > { %v1120_v24 = vrot.slane %v1113_v11, %v5264_v33  ;;  %v1128_v25 = vrot.slane %v3854_v13, %v5264_v33  ;;  %v1136_v26 = vrot.slane %v1129_v14, %v5264_v33  ;;  %v1144_v27 = vrot.slane %v3855_v15, %v5264_v33 }
 0x3e0   : > { %v1145_v28 = vcombine.low %v1120_v24, %v1128_v25  ;;  %v1161_v29 = vcombine.low %v1136_v26, %v1144_v27  ;;  %v1146_v30 = vcombine.high %v1120_v24, %v1128_v25  ;;  %v1162_v31 = vcombine.high %v1136_v26, %v1144_v27 }
 0x3e2   : > { %v1153_v32 = vrot.slane %v1145_v28, %v5274_v43  ;;  %v1169_v34 = vrot.slane %v1161_v29, %v5274_v43  ;;  %v1160_v39 = vrot.slane %v1146_v30, %v5274_v43  ;;  %v1176_v40 = vrot.slane %v1162_v31, %v5274_v43 }
 0x3e4   : > { %v1177_v37 = vcombine.low %v1153_v32, %v1169_v34  ;;  %v1178_v38 = vcombine.high %v1153_v32, %v1169_v34  ;;  %v1179_v48 = vcombine.low %v1160_v39, %v1176_v40  ;;  %v1180_v49 = vcombine.high %v1160_v39, %v1176_v40 }
 0x3e6   : > { %v1181_v41 = vpack.c.bf16 %v1177_v37, %v1177_v37  ;;  %v1182_v42 = vpack.c.bf16 %v1178_v38, %v1178_v38  ;;  %v1183_v54 = vpack.c.bf16 %v1179_v48, %v1179_v48  ;;  %v1184_v55 = vpack.c.bf16 %v1180_v49, %v1180_v49 }
 0x3e8   : > { %v1342_v46 = vsel %vm1337_vm3, %v1181_v41, 0  ;;  %v1388_v47 = vsel %vm1337_vm3, %v1182_v42, 0  ;;  %v1434_v60 = vsel %vm1337_vm3, %v1183_v54, 0  ;;  %v1480_v61 = vsel %vm1337_vm3, %v1184_v55, 0 }
 0x3e9   : > { %4034 = vmatpush3.bf16.xpose.msra.mxu0 %v1342_v46  ;;  %4040 = vmatpush3.bf16.xpose.msra.mxu1 %v1388_v47 }
 0x3ea   : > { %4045 = vmatprep.subr.bf16.mxu0 %v4759_v0  ;;  %4051 = vmatprep.subr.bf16.mxu1 %v4759_v0 }
 0x3f0   : > { %4036 = vmatmul.mubr.msk.bf16.vlgmr.msra.gmra.mrb[4].mxu0 %vm1337_vm3, %v1029_v56  ;;  %4042 = vmatmul.mubr.msk.bf16.vlgmr.msra.gmra.mrb[4].mxu1 %vm1337_vm3, %v1030_v57 }
 0x3f1   : > { %4046 = vmatpush3.bf16.xpose.msra.mxu0 %v1434_v60  ;;  %4052 = vmatpush3.bf16.xpose.msra.mxu1 %v1480_v61 }
 0x3f2   : > { %4047 = vmatprep.mubr.msk.bf16.mxu0 %vm4760_vm0, %v4759_v0  ;;  %4053 = vmatprep.mubr.msk.bf16.mxu1 %vm4760_vm0, %v4759_v0 }
 0x3f3   : > { %4057 = vmatprep.subr.bf16.mxu0 %v4759_v0  ;;  %4063 = vmatprep.subr.bf16.mxu1 %v4759_v0 }
 0x3f8   : > { %4048 = vmatmul.mubr.msk.bf16.vlgmr.msra.gmra.mrb[8].mxu0 %vm1337_vm3, %v1031_v1  ;;  %4054 = vmatmul.mubr.msk.bf16.vlgmr.msra.gmra.mrb[8].mxu1 %vm1337_vm3, %v1032_v2 }
 0x3f9   : > { %4059 = vmatprep.mubr.msk.bf16.mxu0 %vm4760_vm0, %v4759_v0  ;;  %4065 = vmatprep.mubr.msk.bf16.mxu1 %vm4760_vm0, %v4759_v0 }
 0x4c3   : > { %v1378_v3 = vpop.f32.mrb[4].mxu0  ;;  %v1424_v4 = vpop.f32.mrb[4].mxu1 }
 0x4c4   : > { %v1522_v6 = vmul.f32 0.35355338, %v1378_v3  ;;  %v1523_v7 = vmul.f32 0.35355338, %v1424_v4  ;;  %v4037_v8 = vpop.f32.mrb[5].mxu0  ;;  %v4043_v9 = vpop.f32.mrb[5].mxu1 }
 0x4c5   : > { %v1381_v10 = vpop.f32.mrb[6].mxu0  ;;  %v1427_v11 = vpop.f32.mrb[6].mxu1 }
 0x4c6   : > { %v4038_v13 = vpop.f32.mrb[7].mxu0  ;;  %v4044_v14 = vpop.f32.mrb[7].mxu1  ;;  %v1533_v15 = vadd.f32 %v5326_v5, %v1523_v7  ;;  %v1532_v16 = vadd.f32 %v5326_v5, %v1522_v6 }
 0x4c8   : > { %v1539_v18 = vsel %vm1337_vm3, %v1533_v15, -inf  ;;  %v1536_v19 = vsel %vm1337_vm3, %v1532_v16, -inf }
 0x4c9   : > { %1540 = vmax.xlane.f32.xlu0 %v1539_v18  ;;  %1537 = vmax.xlane.f32.xlu1 %v1536_v19 }
 0x4cb   : > { %v1470_v20 = vpop.f32.mrb[8].mxu0  ;;  %v1516_v24 = vpop.f32.mrb[8].mxu1 }
 0x4cc   : > { %v1524_v25 = vmul.f32 0.35355338, %v1470_v20  ;;  %v1525_v26 = vmul.f32 0.35355338, %v1516_v24  ;;  %v4049_v27 = vpop.f32.mrb[9].mxu0  ;;  %v4055_v28 = vpop.f32.mrb[9].mxu1 }
 0x4cd   : > { %v1473_v29 = vpop.f32.mrb[10].mxu0  ;;  %v1519_v30 = vpop.f32.mrb[10].mxu1 }
 0x4ce   : > { %v4050_v31 = vpop.f32.mrb[11].mxu0  ;;  %v4056_v32 = vpop.f32.mrb[11].mxu1  ;;  %v1535_v34 = vadd.f32 %v5326_v5, %v1525_v26  ;;  %v1534_v35 = vadd.f32 %v5326_v5, %v1524_v25 }
 0x4d0   : > { %v1545_v36 = vsel %vm1337_vm3, %v1535_v34, -inf  ;;  %v1542_v37 = vsel %vm1337_vm3, %v1534_v35, -inf }
 0x4d1   : > { %1546 = vmax.xlane.f32.xlu1 %v1545_v36  ;;  %1543 = vmax.xlane.f32.xlu0 %v1542_v37 }
 0x4e2   : > { %1187 = vrot.lane.b32.xlu1 %v5248_v21, %s5819_s18 }
 0x4e7   : > { %1185 = vrot.lane.b32.xlu0 %v5238_v17, %s5819_s18 }
 0x556   : > { %v1541_v38 = vpop.xlane.xlu0 %1540  ;;  %v1538_v39 = vpop.xlane.xlu1 %1537 }
 0x557   : > { %v1549_v40 = vsub.f32 %v1533_v15, %v1541_v38  ;;  %v1548_v41 = vsub.f32 %v1532_v16, %v1538_v39 }
 0x559   : > { %v1554_v42 = vmul.f32 1.442695, %v1549_v40  ;;  %v1552_v44 = vmul.f32 1.442695, %v1548_v41 }
 0x55b   : > { %4362 = vpow2.f32 %v1554_v42 }
 0x55c   : > { %4364 = vpow2.f32 %v1552_v44 }
 0x55e   : > { %v1544_v17 = vpop.xlane.xlu0 %1543  ;;  %v1547_v48 = vpop.xlane.xlu1 %1546 }
 0x55f   : > { %v1550_v49 = vsub.f32 %v1534_v35, %v1544_v17  ;;  %v1551_v50 = vsub.f32 %v1535_v34, %v1547_v48 }
 0x561   : > { %v1556_v51 = vmul.f32 1.442695, %v1550_v49  ;;  %v1558_v52 = vmul.f32 1.442695, %v1551_v50 }
 0x562   : > { %v1186_v56 = vpop.permute.xlu0 %1185 }
 0x563   : > { %4366 = vpow2.f32 %v1556_v51 }
 0x564   : > { %4368 = vpow2.f32 %v1558_v52 }
 0x565   : > { %v5340_v45 = vpop.eup %4362 }
 0x566   : > { %v5342_v46 = vpop.eup %4364  ;;  %v1563_v47 = vsel %vm1337_vm3, %v5340_v45, 0.0 }
 0x567   : > { %1564 = vadd.xlane.f32.xlu1 %v1563_v47  ;;  %v1560_v21 = vsel %vm1337_vm3, %v5342_v46, 0.0 }
 0x568   : > { %1561 = vadd.xlane.f32.xlu0 %v1560_v21 }
 0x56d   : > { %v5352_v53 = vpop.eup %4366 }
 0x56e   : > { %v5354_v54 = vpop.eup %4368  ;;  %v1566_v55 = vsel %vm1337_vm3, %v5352_v53, 0.0 }
 0x578   : > { %1189 = vrot.lane.b32.xlu1 %v5254_v23, %s5819_s18  ;;  %v1569_v23 = vsel %vm1337_vm3, %v5354_v54, 0.0 }
 0x57e   : > { %1191 = vrot.lane.b32.xlu0 %v5252_v22, %s5819_s18  ;;  %v1188_v22 = vpop.permute.xlu1 %1187  ;;  %s5869_s18 = sld [smem:[#allocation37_spill]] }
 0x59c   : > { %1567 = vadd.xlane.f32.xlu1 %v1566_v55 }
 0x59d   : > { %1570 = vadd.xlane.f32.xlu0 %v1569_v23 }
 0x5f4   : > { %v1565_v57 = vpop.xlane.xlu1 %1564 }
 0x5f5   : > { %v1562_v58 = vpop.xlane.xlu0 %1561  ;;  %4370 = vrcp.f32 %v1565_v57 }
 0x5f6   : > { %4372 = vrcp.f32 %v1562_v58 }
 0x5f8   : > { %v1190_v59 = vpop.permute.xlu1 %1189 }
 0x5f9   : > { %v1197_v60 = vcombine.low %v1186_v56, %v1190_v59  ;;  %v1198_v61 = vcombine.high %v1186_v56, %v1190_v59  ;;  %v1192_v62 = vpop.permute.xlu0 %1191 }
 0x5fa   : > { %v1213_v63 = vcombine.low %v1188_v22, %v1192_v62  ;;  %v1214_v1 = vcombine.high %v1188_v22, %v1192_v62 }
 0x5fb   : > { %v1205_v2 = vrot.slane %v1197_v60, %v5264_v33  ;;  %v1212_v3 = vrot.slane %v1198_v61, %v5264_v33 }
 0x5fc   : > { %v1221_v4 = vrot.slane %v1213_v63, %v5264_v33  ;;  %v1228_v6 = vrot.slane %v1214_v1, %v5264_v33 }
 0x5fe   : > { %v1229_v7 = vcombine.low %v1205_v2, %v1221_v4  ;;  %v1230_v8 = vcombine.high %v1205_v2, %v1221_v4  ;;  %v1245_v9 = vcombine.low %v1212_v3, %v1228_v6  ;;  %v1246_v10 = vcombine.high %v1212_v3, %v1228_v6 }
 0x5ff   : > { %v4371_v35 = vpop.eup %4370 }
 0x600   : > { %v1237_v11 = vrot.slane %v1229_v7, %v5274_v43  ;;  %v1244_v13 = vrot.slane %v1230_v8, %v5274_v43  ;;  %v1253_v14 = vrot.slane %v1245_v9, %v5274_v43  ;;  %v1260_v15 = vrot.slane %v1246_v10, %v5274_v43  ;;  %v4373_v38 = vpop.eup %4372 }
 0x601   : > { %v1577_v44 = vmul.f32 %v4371_v35, %v5340_v45  ;;  %v1576_v47 = vmul.f32 %v4373_v38, %v5342_v46 }
 0x602   : > { %v1265_v16 = vcombine.low %v1237_v11, %v1244_v13  ;;  %v3856_v18 = vcombine.high %v1237_v11, %v1244_v13  ;;  %v1281_v19 = vcombine.low %v1253_v14, %v1260_v15  ;;  %v3857_v20 = vcombine.high %v1253_v14, %v1260_v15 }
 0x603   : > { %v1580_v52 = vpack.c.bf16 %v1576_v47, %v1576_v47  ;;  %v1581_v55 = vpack.c.bf16 %v1577_v44, %v1577_v44 }
 0x604   : > { %v1272_v24 = vrot.slane %v1265_v16, %v5264_v33  ;;  %v1280_v25 = vrot.slane %v3856_v18, %v5264_v33  ;;  %v1288_v26 = vrot.slane %v1281_v19, %v5264_v33  ;;  %v1296_v27 = vrot.slane %v3857_v20, %v5264_v33 }
 0x606   : > { %v1297_v28 = vcombine.low %v1272_v24, %v1280_v25  ;;  %v1298_v29 = vcombine.high %v1272_v24, %v1280_v25  ;;  %v1313_v30 = vcombine.low %v1288_v26, %v1296_v27  ;;  %v1314_v31 = vcombine.high %v1288_v26, %v1296_v27 }
 0x608   : > { %v1305_v32 = vrot.slane %v1297_v28, %v5274_v43  ;;  %v1312_v34 = vrot.slane %v1298_v29, %v5274_v43  ;;  %v1321_v36 = vrot.slane %v1313_v30, %v5274_v43  ;;  %v1328_v37 = vrot.slane %v1314_v31, %v5274_v43  ;;  %v4342_v31 = vld [vmem:[%s5788_s7] sm:$0xff]  }
 0x60a   : > { %v1329_v39 = vcombine.low %v1305_v32, %v1321_v36  ;;  %v1330_v40 = vcombine.high %v1305_v32, %v1321_v36  ;;  %v1331_v41 = vcombine.low %v1312_v34, %v1328_v37  ;;  %v1332_v42 = vcombine.high %v1312_v34, %v1328_v37 }
 0x60c   : > { %v1333_v21 = vpack.c.bf16 %v1329_v39, %v1329_v39  ;;  %v1334_v17 = vpack.c.bf16 %v1330_v40, %v1330_v40  ;;  %v1335_v50 = vpack.c.bf16 %v1331_v41, %v1331_v41  ;;  %v1336_v51 = vpack.c.bf16 %v1332_v42, %v1332_v42  ;;  %v4343_v41 = vld [vmem:[%s5788_s7 + $0x8] sm:$0xff]  }
 0x60e   : > { %v1589_v48 = vsel %vm1587_vm4, %v1333_v21, 0  ;;  %v1635_v49 = vsel %vm1587_vm4, %v1334_v17, 0  ;;  %v1681_v45 = vsel %vm1587_vm4, %v1335_v50, 0  ;;  %v1727_v46 = vsel %vm1587_vm4, %v1336_v51, 0 }
 0x60f   : > { %4058 = vmatpush3.bf16.msra.mxu0 %v1589_v48  ;;  %4064 = vmatpush3.bf16.msra.mxu1 %v1635_v49 }
 0x610   : > { %4069 = vmatprep.subr.bf16.mxu0 %v4759_v0  ;;  %4075 = vmatprep.subr.bf16.mxu1 %v4759_v0 }
 0x612   : > { %4060 = vmatmul.mubr.msk.bf16.vlgmr.msra.gmra.mrb[12].mxu0 %vm1337_vm3, %v1580_v52  ;;  %4066 = vmatmul.mubr.msk.bf16.vlgmr.msra.gmra.mrb[12].mxu1 %vm1337_vm3, %v1581_v55 }
 0x613   : > { %4070 = vmatpush3.bf16.msra.mxu0 %v1681_v45  ;;  %4076 = vmatpush3.bf16.msra.mxu1 %v1727_v46 }
 0x614   : > { %4071 = vmatprep.mubr.msk.bf16.mxu0 %vm4760_vm0, %v4759_v0  ;;  %4077 = vmatprep.mubr.msk.bf16.mxu1 %vm4760_vm0, %v4759_v0 }
 0x615   : > { %4081 = vmatprep.subr.bf16.mxu0 %v4759_v0  ;;  %4089 = vmatprep.subr.bf16.mxu1 %v4759_v0 }
 0x629   : > { %v1568_v23 = vpop.xlane.xlu1 %1567 }
 0x62a   : > { %4374 = vrcp.f32 %v1568_v23  ;;  %v1571_v22 = vpop.xlane.xlu0 %1570 }
 0x62b   : > { %4376 = vrcp.f32 %v1571_v22 }
 0x634   : > { %v4375_v56 = vpop.eup %4374 }
 0x635   : > { %v4377_v57 = vpop.eup %4376  ;;  %v1578_v58 = vmul.f32 %v4375_v56, %v5352_v53 }
 0x636   : > { %v1579_v59 = vmul.f32 %v4377_v57, %v5354_v54 }
 0x637   : > { %v1582_v60 = vpack.c.bf16 %v1578_v58, %v1578_v58 }
 0x638   : > { %v1583_v61 = vpack.c.bf16 %v1579_v59, %v1579_v59 }
 0x639   : > { %4072 = vmatmul.mubr.msk.bf16.vlgmr.msra.gmra.mrb[16].mxu0 %vm1337_vm3, %v1582_v60 }
 0x63a   : > { %4078 = vmatmul.mubr.msk.bf16.vlgmr.msra.gmra.mrb[16].mxu1 %vm1337_vm3, %v1583_v61  ;;  %4085 = vmatprep.mubr.msk.bf16.mxu0 %vm4760_vm0, %v4759_v0 }
 0x63b   : > { %4093 = vmatprep.mubr.msk.bf16.mxu1 %vm4760_vm0, %v4759_v0  ;;  %4082 = vmatpush3.bf16.msra.mxu0 %v4342_v31 }
 0x63c   : > { %4083 = vmatprep.subr.bf16.mxu0 %v4759_v0 }
 0x63f   : > { %4084 = vmatpush3.bf16.msra.mxu0 %v4343_v41 }
 0x640   : > { %4097 = vmatprep.subr.bf16.mxu0 %v4759_v0 }
 0x6e5   : > { %v1625_v62 = vpop.f32.mrb[12].mxu0  ;;  %v1671_v63 = vpop.f32.mrb[12].mxu1 }
 0x6e6   : > { %v4061_v1 = vpop.f32.mrb[13].mxu0  ;;  %v4067_v2 = vpop.f32.mrb[13].mxu1 }
 0x6e7   : > { %v1628_v3 = vpop.f32.mrb[14].mxu0  ;;  %v1674_v53 = vpop.f32.mrb[14].mxu1  ;;  %v3869_v1 = vld [vmem:[#allocation11] ss:$0 sm:$0xff] }
 0x6e8   : > { %v4062_v4 = vpop.f32.mrb[15].mxu0  ;;  %v4068_v54 = vpop.f32.mrb[15].mxu1 }
 0x70c   : > { %v1717_v6 = vpop.f32.mrb[16].mxu0 }
 0x70d   : > { %v1769_v7 = vcombine.low %v1625_v62, %v1717_v6  ;;  %v1770_v8 = vcombine.high %v1625_v62, %v1717_v6  ;;  %v1763_v9 = vpop.f32.mrb[16].mxu1  ;;  %v4073_v10 = vpop.f32.mrb[17].mxu0 }
 0x70e   : > { %v1785_v11 = vcombine.low %v1671_v63, %v1763_v9  ;;  %v1786_v13 = vcombine.high %v1671_v63, %v1763_v9  ;;  %v4079_v14 = vpop.f32.mrb[17].mxu1  ;;  %v1720_v15 = vpop.f32.mrb[18].mxu0 }
 0x70f   : > { %v1777_v16 = vrot.slane %v1769_v7, %v5264_v33  ;;  %v1784_v18 = vrot.slane %v1770_v8, %v5264_v33  ;;  %v1766_v19 = vpop.f32.mrb[18].mxu1  ;;  %v4074_v20 = vpop.f32.mrb[19].mxu0  ;;  %v4344_v14 = vld [vmem:[%s5865_s28] sm:$0xff]   ;;  %v4345_v15 = vld [vmem:[%s5865_s28 + $0x8] sm:$0xff]  }
 0x710   : > { %v1793_v24 = vrot.slane %v1785_v11, %v5264_v33  ;;  %v1800_v25 = vrot.slane %v1786_v13, %v5264_v33  ;;  %v4080_v26 = vpop.f32.mrb[19].mxu1  ;;  %4090 = vmatpush3.bf16.msra.mxu1 %v4344_v14 }
 0x711   : > { %4091 = vmatprep.subr.bf16.mxu1 %v4759_v0 }
 0x712   : > { %v1801_v27 = vcombine.low %v1777_v16, %v1793_v24  ;;  %v1802_v28 = vcombine.high %v1777_v16, %v1793_v24  ;;  %v1817_v29 = vcombine.low %v1784_v18, %v1800_v25  ;;  %v1818_v30 = vcombine.high %v1784_v18, %v1800_v25  ;;  %v3873_v25 = vld [vmem:[#allocation13] ss:$0 sm:$0xff] }
 0x714   : > { %v1809_v32 = vrot.slane %v1801_v27, %v5274_v43  ;;  %v1816_v34 = vrot.slane %v1802_v28, %v5274_v43  ;;  %v1825_v35 = vrot.slane %v1817_v29, %v5274_v43  ;;  %v1832_v36 = vrot.slane %v1818_v30, %v5274_v43  ;;  %4092 = vmatpush3.bf16.msra.mxu1 %v4345_v15  ;;  %v3874_v27 = vld [vmem:[#allocation14] ss:$0 sm:$0xff] }
 0x715   : > { %4109 = vmatprep.subr.bf16.mxu1 %v4759_v0 }
 0x716   : > { %v1837_v37 = vcombine.low %v1809_v32, %v1816_v34  ;;  %v3867_v38 = vcombine.high %v1809_v32, %v1816_v34  ;;  %v1853_v39 = vcombine.low %v1825_v35, %v1832_v36  ;;  %v3868_v40 = vcombine.high %v1825_v35, %v1832_v36  ;;  %v3875_v34 = vld [vmem:[#allocation16] ss:$0 sm:$0xff] }
 0x718   : > { %v1844_v42 = vrot.slane %v1837_v37, %v5264_v33  ;;  %v1852_v44 = vrot.slane %v3867_v38, %v5264_v33  ;;  %v1860_v47 = vrot.slane %v1853_v39, %v5264_v33  ;;  %v1868_v21 = vrot.slane %v3868_v40, %v5264_v33 }
 0x71a   : > { %v1870_v17 = vcombine.high %v1844_v42, %v1852_v44  ;;  %v1886_v48 = vcombine.high %v1860_v47, %v1868_v21  ;;  %v1869_v49 = vcombine.low %v1844_v42, %v1852_v44  ;;  %v1885_v50 = vcombine.low %v1860_v47, %v1868_v21  ;;  %v3879_v42 = vld [vmem:[%s5867_s23] ss:$0 sm:$0xff] }
 0x71c   : > { %v1884_v51 = vrot.slane %v1870_v17, %v5274_v43  ;;  %v1900_v52 = vrot.slane %v1886_v48, %v5274_v43  ;;  %v1877_v55 = vrot.slane %v1869_v49, %v5274_v43  ;;  %v1893_v45 = vrot.slane %v1885_v50, %v5274_v43 }
 0x71e   : > { %v1903_v46 = vcombine.low %v1884_v51, %v1900_v52  ;;  %v1902_v23 = vcombine.high %v1877_v55, %v1893_v45  ;;  %v1904_v22 = vcombine.high %v1884_v51, %v1900_v52  ;;  %v1901_v56 = vcombine.low %v1877_v55, %v1893_v45 }
 0x720   : > { %1910 = vrot.lane.b32.xlu1 %v1903_v46, %s5818_s29  ;;  %1906 = vrot.lane.b32.xlu0 %v1902_v23, %s5817_s11  ;;  %v4350_v23 = vld [vmem:[%s5786_s5 + $0x10] sm:$0xff]   ;;  %s5874_s11 = sld [smem:[#allocation38_spill]] }
 0x724   : > { %1914 = vrot.lane.b32.xlu1 %v1904_v22, %s5816_s14  ;;  %s5866_s14 = sld [smem:[#allocation34_spill]]  ;;  %v4351_v22 = vld [vmem:[%s5786_s5 + $0x18] sm:$0xff]  }
 0x72a   : > { %v4347_v16 = vld [vmem:[%s5866_s14 + $0x8] sm:$0xff]   ;;  %v4348_v31 = vld [vmem:[%s5866_s14 + $0x10] sm:$0xff]   ;;  %v4349_v32 = vld [vmem:[%s5866_s14 + $0x18] sm:$0xff]  }
 0x792   : > { %v1911_v57 = vpop.permute.xlu1 %1910  ;;  %v1907_v58 = vpop.permute.xlu0 %1906 }
 0x793   : > { %v1917_v59 = vsel %vm1337_vm3, %v1901_v56, %v1907_v58 }
 0x794   : > { %v1918_v61 = vsel %vm768_vm1, %v1917_v59, %v1911_v57 }
 0x796   : > { %v1915_v60 = vpop.permute.xlu1 %1914 }
 0x797   : > { %v1920_v62 = vsel %vm1919_vm5, %v1918_v61, %v1915_v60  ;;  %v3885_v60 = vld [vmem:[%s5868_s8] ss:$0 sm:$0xff] }
 0x798   : > { %v1925_v63 = vpack.c.bf16 %v1920_v62, %v1920_v62  ;;  %v3886_v62 = vld [vmem:[%s5869_s18] ss:$0 sm:$0xff] }
 0x79a   : > { %4086 = vmatmul.mubr.msk.bf16.vlgmr.msra.gmra.mrb[20].mxu0 %vm839_vm2, %v1925_v63 }
 0x79b   : > { %4105 = vmatprep.mubr.msk.bf16.mxu0 %vm4760_vm0, %v4759_v0 }
 0x86d   : > { %v1982_v2 = vpop.f32.mrb[20].mxu0 }
 0x86e   : > { %v1983_v3 = vadd.f32 %v3869_v1, %v1982_v2  ;;  %v4087_v53 = vpop.f32.mrb[21].mxu0 }
 0x86f   : > { %v1985_v4 = vpop.f32.mrb[22].mxu0 }
 0x870   : > { %v4088_v54 = vpop.f32.mrb[23].mxu0  ;;  %v1988_v6 = vadd.f32 %v1983_v3, %v5231_v12  ;;  %v4346_v12 = vld [vmem:[%s5866_s14] sm:$0xff]  }
 0x871   : > { %4098 = vmatpush3.bf16.msra.mxu0 %v4346_v12  ;;  %v3891_v3 = vld [vmem:[#allocation10 + $0x1] ss:$0 sm:$0xff] }
 0x872   : > { %v1991_v7 = vsel %vm839_vm2, %v1988_v6, 0.0  ;;  %4099 = vmatprep.subr.bf16.mxu0 %v4759_v0 }
 0x873   : > { %1992 = vadd.xlane.f32.xlu0 %v1991_v7 }
 0x875   : > { %4100 = vmatpush3.bf16.msra.mxu0 %v4347_v16 }
 0x876   : > { %4101 = vmatprep.subr.bf16.mxu0 %v4759_v0 }
 0x879   : > { %4102 = vmatpush3.bf16.msra.mxu0 %v4348_v31 }
 0x87a   : > { %4103 = vmatprep.subr.bf16.mxu0 %v4759_v0 }
 0x87d   : > { %4104 = vmatpush3.bf16.msra.mxu0 %v4349_v32 }
 0x87e   : > { %4123 = vmatprep.subr.bf16.mxu0 %v4759_v0 }
 0x900   : > { %v1993_v8 = vpop.xlane.xlu0 %1992 }
 0x901   : > { %v1995_v9 = vmul.f32 0.03125, %v1993_v8 }
 0x903   : > { %v1996_v10 = vsub.f32 %v1988_v6, %v1995_v9 }
 0x905   : > { %v1997_v11 = vmul.f32 %v1996_v10, %v1996_v10 }
 0x907   : > { %v1998_v13 = vsel %vm839_vm2, %v1997_v11, 0.0 }
 0x908   : > { %1999 = vadd.xlane.f32.xlu1 %v1998_v13 }
 0x995   : > { %v2000_v18 = vpop.xlane.xlu1 %1999 }
 0x996   : > { %v2001_v19 = vmul.f32 0.03125, %v2000_v18 }
 0x998   : > { %v2002_v20 = vadd.f32 1e-05, %v2001_v19 }
 0x99a   : > { %4378 = vrsqrt.f32 %v2002_v20 }
 0x9a4   : > { %v4379_v24 = vpop.eup %4378 }
 0x9a5   : > { %v2004_v26 = vmul.f32 %v4379_v24, %v1996_v10 }
 0x9a7   : > { %v2011_v28 = vmul.f32 %v3873_v25, %v2004_v26 }
 0x9a9   : > { %v2018_v29 = vadd.f32 %v3874_v27, %v2011_v28 }
 0x9ab   : > { %v2023_v30 = vpack.c.bf16 %v2018_v29, %v2018_v29 }
 0x9ad   : > { %4094 = vmatmul.mubr.msk.bf16.vlgmr.msra.gmra.mrb[20].mxu1 %vm839_vm2, %v2023_v30 }
 0x9ae   : > { %4113 = vmatprep.mubr.msk.bf16.mxu1 %vm4760_vm0, %v4759_v0  ;;  %4110 = vmatpush3.bf16.msra.mxu1 %v4350_v23 }
 0x9af   : > { %4111 = vmatprep.subr.bf16.mxu1 %v4759_v0 }
 0x9b2   : > { %4112 = vmatpush3.bf16.msra.mxu1 %v4351_v22 }
 0x9b3   : > { %4117 = vmatprep.subr.bf16.mxu1 %v4759_v0 }
 0xa80   : > { %v2080_v35 = vpop.f32.mrb[20].mxu1 }
 0xa81   : > { %v2081_v36 = vadd.f32 %v3875_v34, %v2080_v35  ;;  %v4095_v37 = vpop.f32.mrb[21].mxu1 }
 0xa82   : > { %v2083_v38 = vpop.f32.mrb[22].mxu1 }
 0xa83   : > { %v2086_v39 = vmax.f32 %v2081_v36, 0.0  ;;  %v4096_v40 = vpop.f32.mrb[23].mxu1 }
 0xa85   : > { %v2095_v41 = vpack.c.bf16 %v2086_v39, %v2086_v39 }
 0xa87   : > { %4106 = vmatmul.mubr.msk.bf16.vlgmr.msra.gmra.mrb[24].mxu0 %vm2127_vm6, %v2095_v41 }
 0xa88   : > { %4125 = vmatprep.mubr.msk.bf16.mxu0 %vm4760_vm0, %v4759_v0 }
 0xb5a   : > { %v2165_v44 = vpop.f32.mrb[24].mxu0 }
 0xb5b   : > { %v2166_v47 = vadd.f32 %v3879_v42, %v2165_v44  ;;  %v4107_v21 = vpop.f32.mrb[25].mxu0 }
 0xb5c   : > { %v2168_v17 = vpop.f32.mrb[26].mxu0 }
 0xb5d   : > { %v4108_v48 = vpop.f32.mrb[27].mxu0  ;;  %v2171_v49 = vadd.f32 %v2166_v47, %v2018_v29 }
 0xb5f   : > { %v2174_v50 = vsel %vm839_vm2, %v2171_v49, 0.0 }
 0xb60   : > { %2175 = vadd.xlane.f32.xlu0 %v2174_v50 }
 0xbed   : > { %v2176_v51 = vpop.xlane.xlu0 %2175 }
 0xbee   : > { %v2177_v52 = vmul.f32 0.03125, %v2176_v51 }
 0xbf0   : > { %v2178_v55 = vsub.f32 %v2171_v49, %v2177_v52 }
 0xbf2   : > { %v2179_v45 = vmul.f32 %v2178_v55, %v2178_v55 }
 0xbf4   : > { %v2180_v46 = vsel %vm839_vm2, %v2179_v45, 0.0 }
 0xbf5   : > { %2181 = vadd.xlane.f32.xlu0 %v2180_v46 }
 0xc82   : > { %v2182_v56 = vpop.xlane.xlu0 %2181 }
 0xc83   : > { %v2183_v57 = vmul.f32 0.03125, %v2182_v56 }
 0xc85   : > { %v2184_v58 = vadd.f32 1e-05, %v2183_v57 }
 0xc87   : > { %4380 = vrsqrt.f32 %v2184_v58 }
 0xc91   : > { %v4381_v59 = vpop.eup %4380 }
 0xc92   : > { %v2186_v61 = vmul.f32 %v4381_v59, %v2178_v55 }
 0xc94   : > { %v2193_v63 = vmul.f32 %v3885_v60, %v2186_v61 }
 0xc96   : > { %v5485_v1 = vadd.f32 %v3886_v62, %v2193_v63 }
 0xc98   : > { %v2206_v2 = vpack.c.bf16 %v5485_v1, %v5485_v1 }
 0xc9a   : > { %4114 = vmatmul.mubr.msk.bf16.vlgmr.msra.gmra.mrb[24].mxu1 %vm839_vm2, %v2206_v2 }
 0xc9b   : > { %4119 = vmatprep.mubr.msk.bf16.mxu1 %vm4760_vm0, %v4759_v0 }
 0xd6d   : > { %v2264_v53 = vpop.f32.mrb[24].mxu1 }
 0xd6e   : > { %v5492_v4 = vadd.f32 %v3891_v3, %v2264_v53  ;;  %v4115_v54 = vpop.f32.mrb[25].mxu1 }
 0xd6f   : > { %v2267_v6 = vpop.f32.mrb[26].mxu1 }
 0xd70   : > { %2274 = vrot.lane.b32.xlu0 %v5492_v4, %s4764_s4  ;;  %2271 = vrot.lane.b32.xlu1 %v5492_v4, %s4762_s15  ;;  %v4116_v7 = vpop.f32.mrb[27].mxu1  ;;  %s5875_s4 = sld [smem:[#allocation39_spill]]  ;;  %s3659_s15 = scalar_lea.sflag [#allocation4], %s5180_s9 }
 0xd74   : > { %2277 = vrot.lane.b32.xlu1 %v5492_v4, %s4761_s3  ;;  %s5870_s3 = smov 64  }
 0xd78   : > { %2420 = vrot.lane.b32.xlu1 %v5492_v4, %s4763_s19 }
 0xde2   : > { %v5502_v8 = vpop.permute.xlu0 %2274  ;;  %v5504_v9 = vpop.permute.xlu1 %2271 }
 0xde3   : > { %2424 = vrot.lane.b32.xlu1 %v5502_v8, %s4763_s19  ;;  %2422 = vrot.lane.b32.xlu0 %v5504_v9, %s4763_s19  ;;  %v2280_v14 = vcombine.low %v5492_v4, %v5502_v8  ;;  %v2281_v15 = vcombine.high %v5492_v4, %v5502_v8 }
 0xde5   : > { %v2288_v19 = vrot.slane %v2280_v14, %v5264_v33  ;;  %v2295_v20 = vrot.slane %v2281_v15, %v5264_v33 }
 0xde6   : > { %v5510_v10 = vpop.permute.xlu1 %2277 }
 0xde7   : > { %2426 = vrot.lane.b32.xlu0 %v5510_v10, %s4763_s19  ;;  %v2296_v11 = vcombine.low %v5504_v9, %v5510_v10  ;;  %v2297_v13 = vcombine.high %v5504_v9, %v5510_v10  ;;  %s4771_s19 = smov [#allocation17]  }
 0xde9   : > { %v2304_v16 = vrot.slane %v2296_v11, %v5264_v33  ;;  %v2311_v18 = vrot.slane %v2297_v13, %v5264_v33 }
 0xdea   : > { %v2421_v12 = vpop.permute.xlu1 %2420 }
 0xdeb   : > { %v2312_v26 = vcombine.low %v2288_v19, %v2304_v16  ;;  %v2313_v27 = vcombine.high %v2288_v19, %v2304_v16  ;;  %v2328_v28 = vcombine.low %v2295_v20, %v2311_v18  ;;  %v2329_v29 = vcombine.high %v2295_v20, %v2311_v18 }
 0xded   : > { %v2320_v36 = vrot.slane %v2312_v26, %v5274_v43  ;;  %v2327_v37 = vrot.slane %v2313_v27, %v5274_v43  ;;  %v2336_v38 = vrot.slane %v2328_v28, %v5274_v43  ;;  %v2343_v39 = vrot.slane %v2329_v29, %v5274_v43 }
 0xdef   : > { %v2348_v49 = vcombine.low %v2320_v36, %v2327_v37  ;;  %v3895_v50 = vcombine.high %v2320_v36, %v2327_v37  ;;  %v2364_v51 = vcombine.low %v2336_v38, %v2343_v39  ;;  %v3896_v52 = vcombine.high %v2336_v38, %v2343_v39 }
 0xdf1   : > { %v2355_v59 = vrot.slane %v2348_v49, %v5264_v33  ;;  %v2363_v60 = vrot.slane %v3895_v50, %v5264_v33  ;;  %v2371_v61 = vrot.slane %v2364_v51, %v5264_v33  ;;  %v2379_v62 = vrot.slane %v3896_v52, %v5264_v33 }
 0xdf3   : > { %v2380_v15 = vcombine.low %v2355_v59, %v2363_v60  ;;  %v2397_v36 = vcombine.high %v2371_v61, %v2379_v62 }
 0xdf5   : > { %v2388_v26 = vrot.slane %v2380_v15, %v5274_v43 }
 0xe55   : > { %v2423_v24 = vpop.permute.xlu0 %2422  ;;  %v2425_v25 = vpop.permute.xlu1 %2424 }
 0xe56   : > { %v2432_v30 = vcombine.low %v2421_v12, %v2425_v25  ;;  %v2433_v31 = vcombine.high %v2421_v12, %v2425_v25  ;;  %v2396_v12 = vcombine.low %v2371_v61, %v2379_v62 }
 0xe58   : > { %v2440_v40 = vrot.slane %v2432_v30, %v5264_v33  ;;  %v2447_v41 = vrot.slane %v2433_v31, %v5264_v33  ;;  %v2404_v27 = vrot.slane %v2396_v12, %v5274_v43 }
 0xe59   : > { %v2427_v32 = vpop.permute.xlu0 %2426 }
 0xe5a   : > { %v2448_v34 = vcombine.low %v2423_v24, %v2427_v32  ;;  %v2449_v35 = vcombine.high %v2423_v24, %v2427_v32  ;;  %v2381_v32 = vcombine.high %v2355_v59, %v2363_v60 }
 0xe5c   : > { %v2456_v42 = vrot.slane %v2448_v34, %v5264_v33  ;;  %v2463_v44 = vrot.slane %v2449_v35, %v5264_v33  ;;  %v2412_v34 = vcombine.low %v2388_v26, %v2404_v27  ;;  %v2413_v35 = vcombine.high %v2388_v26, %v2404_v27 }
 0xe5e   : > { %v2464_v47 = vcombine.low %v2440_v40, %v2456_v42  ;;  %v2465_v21 = vcombine.high %v2440_v40, %v2456_v42  ;;  %v2480_v17 = vcombine.low %v2447_v41, %v2463_v44  ;;  %v2481_v48 = vcombine.high %v2447_v41, %v2463_v44 }
 0xe5f   : > { %v2416_v39 = vpack.c.bf16 %v2412_v34, %v2412_v34  ;;  %v2417_v40 = vpack.c.bf16 %v2413_v35, %v2413_v35  ;;  %v2395_v41 = vrot.slane %v2381_v32, %v5274_v43  ;;  %v2411_v42 = vrot.slane %v2397_v36, %v5274_v43 }
 0xe60   : > { %v2472_v55 = vrot.slane %v2464_v47, %v5274_v43  ;;  %v2479_v45 = vrot.slane %v2465_v21, %v5274_v43  ;;  %v2488_v46 = vrot.slane %v2480_v17, %v5274_v43  ;;  %v2495_v23 = vrot.slane %v2481_v48, %v5274_v43 }
 0xe61   : > { %v2414_v21 = vcombine.low %v2395_v41, %v2411_v42  ;;  %v2415_v17 = vcombine.high %v2395_v41, %v2411_v42 }
 0xe62   : > { %v2500_v22 = vcombine.low %v2472_v55, %v2479_v45  ;;  %v3897_v56 = vcombine.high %v2472_v55, %v2479_v45  ;;  %v2516_v57 = vcombine.low %v2488_v46, %v2495_v23  ;;  %v3898_v58 = vcombine.high %v2488_v46, %v2495_v23 }
 0xe63   : > { %v2418_v48 = vpack.c.bf16 %v2414_v21, %v2414_v21  ;;  %v2419_v49 = vpack.c.bf16 %v2415_v17, %v2415_v17 }
 0xe64   : > { %v2507_v63 = vrot.slane %v2500_v22, %v5264_v33  ;;  %v2515_v2 = vrot.slane %v3897_v56, %v5264_v33  ;;  %v2523_v3 = vrot.slane %v2516_v57, %v5264_v33  ;;  %v2531_v53 = vrot.slane %v3898_v58, %v5264_v33 }
 0xe66   : > { %v2532_v54 = vcombine.low %v2507_v63, %v2515_v2  ;;  %v2548_v6 = vcombine.low %v2523_v3, %v2531_v53  ;;  %v2533_v7 = vcombine.high %v2507_v63, %v2515_v2  ;;  %v2549_v11 = vcombine.high %v2523_v3, %v2531_v53 }
 0xe68   : > { %v2540_v13 = vrot.slane %v2532_v54, %v5274_v43  ;;  %v2556_v14 = vrot.slane %v2548_v6, %v5274_v43  ;;  %v2547_v19 = vrot.slane %v2533_v7, %v5274_v43  ;;  %v2563_v20 = vrot.slane %v2549_v11, %v5274_v43 }
 0xe6a   : > { %v2564_v16 = vcombine.low %v2540_v13, %v2556_v14  ;;  %v2565_v18 = vcombine.high %v2540_v13, %v2556_v14  ;;  %v2566_v30 = vcombine.low %v2547_v19, %v2563_v20  ;;  %v2567_v31 = vcombine.high %v2547_v19, %v2563_v20 }
 0xe6c   : > { %v2568_v24 = vpack.c.bf16 %v2564_v16, %v2564_v16  ;;  %v2569_v25 = vpack.c.bf16 %v2565_v18, %v2565_v18  ;;  %v2570_v37 = vpack.c.bf16 %v2566_v30, %v2566_v30  ;;  %v2571_v38 = vpack.c.bf16 %v2567_v31, %v2567_v31 }
 0xe6e   : > { %v2728_v28 = vsel %vm1337_vm3, %v2568_v24, 0  ;;  %v2774_v29 = vsel %vm1337_vm3, %v2569_v25, 0  ;;  %v2820_v44 = vsel %vm1337_vm3, %v2570_v37, 0  ;;  %v2866_v47 = vsel %vm1337_vm3, %v2571_v38, 0 }
 0xe6f   : > { %4118 = vmatpush3.bf16.xpose.msra.mxu1 %v2728_v28  ;;  %4124 = vmatpush3.bf16.xpose.msra.mxu0 %v2774_v29 }
 0xe70   : > { %4129 = vmatprep.subr.bf16.mxu1 %v4759_v0  ;;  %4135 = vmatprep.subr.bf16.mxu0 %v4759_v0 }
 0xe76   : > { %4120 = vmatmul.mubr.msk.bf16.vlgmr.msra.gmra.mrb[28].mxu1 %vm1337_vm3, %v2416_v39  ;;  %4126 = vmatmul.mubr.msk.bf16.vlgmr.msra.gmra.mrb[28].mxu0 %vm1337_vm3, %v2417_v40 }
 0xe77   : > { %4130 = vmatpush3.bf16.xpose.msra.mxu1 %v2820_v44  ;;  %4136 = vmatpush3.bf16.xpose.msra.mxu0 %v2866_v47 }
 0xe78   : > { %4131 = vmatprep.mubr.msk.bf16.mxu1 %vm4760_vm0, %v4759_v0  ;;  %4137 = vmatprep.mubr.msk.bf16.mxu0 %vm4760_vm0, %v4759_v0 }
 0xe79   : > { %4141 = vmatprep.subr.bf16.mxu1 %v4759_v0  ;;  %4147 = vmatprep.subr.bf16.mxu0 %v4759_v0 }
 0xe7e   : > { %4132 = vmatmul.mubr.msk.bf16.vlgmr.msra.gmra.mrb[32].mxu1 %vm1337_vm3, %v2418_v48  ;;  %4138 = vmatmul.mubr.msk.bf16.vlgmr.msra.gmra.mrb[32].mxu0 %vm1337_vm3, %v2419_v49 }
 0xe7f   : > { %4143 = vmatprep.mubr.msk.bf16.mxu1 %vm4760_vm0, %v4759_v0  ;;  %4149 = vmatprep.mubr.msk.bf16.mxu0 %vm4760_vm0, %v4759_v0 }
 0xf49   : > { %v2764_v50 = vpop.f32.mrb[28].mxu1  ;;  %v2810_v51 = vpop.f32.mrb[28].mxu0 }
 0xf4a   : > { %v2908_v52 = vmul.f32 0.35355338, %v2764_v50  ;;  %v2909_v55 = vmul.f32 0.35355338, %v2810_v51  ;;  %v4121_v45 = vpop.f32.mrb[29].mxu1  ;;  %v4127_v46 = vpop.f32.mrb[29].mxu0 }
 0xf4b   : > { %v2767_v23 = vpop.f32.mrb[30].mxu1  ;;  %v2813_v22 = vpop.f32.mrb[30].mxu0 }
 0xf4c   : > { %v4122_v56 = vpop.f32.mrb[31].mxu1  ;;  %v4128_v57 = vpop.f32.mrb[31].mxu0  ;;  %v2912_v58 = vadd.f32 %v5326_v5, %v2908_v52  ;;  %v2913_v59 = vadd.f32 %v5326_v5, %v2909_v55 }
 0xf4e   : > { %v2916_v60 = vsel %vm1337_vm3, %v2912_v58, -inf  ;;  %v2919_v61 = vsel %vm1337_vm3, %v2913_v59, -inf }
 0xf4f   : > { %2917 = vmax.xlane.f32.xlu1 %v2916_v60  ;;  %2920 = vmax.xlane.f32.xlu0 %v2919_v61 }
 0xf51   : > { %v2856_v62 = vpop.f32.mrb[32].mxu1  ;;  %v2902_v63 = vpop.f32.mrb[32].mxu0 }
 0xf52   : > { %v2910_v2 = vmul.f32 0.35355338, %v2856_v62  ;;  %v2911_v3 = vmul.f32 0.35355338, %v2902_v63  ;;  %v4133_v53 = vpop.f32.mrb[33].mxu1  ;;  %v4139_v54 = vpop.f32.mrb[33].mxu0 }
 0xf53   : > { %v2859_v6 = vpop.f32.mrb[34].mxu1  ;;  %v2905_v7 = vpop.f32.mrb[34].mxu0 }
 0xf54   : > { %v4134_v11 = vpop.f32.mrb[35].mxu1  ;;  %v4140_v13 = vpop.f32.mrb[35].mxu0  ;;  %v2914_v14 = vadd.f32 %v5326_v5, %v2910_v2  ;;  %v2915_v15 = vadd.f32 %v5326_v5, %v2911_v3 }
 0xf56   : > { %v2922_v12 = vsel %vm1337_vm3, %v2914_v14, -inf  ;;  %v2925_v16 = vsel %vm1337_vm3, %v2915_v15, -inf }
 0xf57   : > { %2923 = vmax.xlane.f32.xlu0 %v2922_v12  ;;  %2926 = vmax.xlane.f32.xlu1 %v2925_v16 }
 0xf68   : > { %2574 = vrot.lane.b32.xlu1 %v5504_v9, %s5870_s3 }
 0xf6d   : > { %2572 = vrot.lane.b32.xlu0 %v5492_v4, %s5870_s3 }
 0xfdc   : > { %v2918_v18 = vpop.xlane.xlu1 %2917  ;;  %v2921_v19 = vpop.xlane.xlu0 %2920 }
 0xfdd   : > { %v2928_v20 = vsub.f32 %v2912_v58, %v2918_v18  ;;  %v2929_v24 = vsub.f32 %v2913_v59, %v2921_v19 }
 0xfdf   : > { %v2932_v25 = vmul.f32 1.442695, %v2928_v20  ;;  %v2934_v26 = vmul.f32 1.442695, %v2929_v24 }
 0xfe1   : > { %4382 = vpow2.f32 %v2932_v25 }
 0xfe2   : > { %4384 = vpow2.f32 %v2934_v26 }
 0xfe4   : > { %v2927_v4 = vpop.xlane.xlu1 %2926  ;;  %v2924_v29 = vpop.xlane.xlu0 %2923 }
 0xfe5   : > { %v2931_v30 = vsub.f32 %v2915_v15, %v2927_v4  ;;  %v2930_v31 = vsub.f32 %v2914_v14, %v2924_v29 }
 0xfe7   : > { %v2938_v32 = vmul.f32 1.442695, %v2931_v30  ;;  %v2936_v34 = vmul.f32 1.442695, %v2930_v31 }
 0xfe8   : > { %v2575_v38 = vpop.permute.xlu1 %2574 }
 0xfe9   : > { %4386 = vpow2.f32 %v2938_v32 }
 0xfea   : > { %4388 = vpow2.f32 %v2936_v34 }
 0xfeb   : > { %v5586_v5 = vpop.eup %4382 }
 0xfec   : > { %v5588_v27 = vpop.eup %4384  ;;  %v2940_v28 = vsel %vm1337_vm3, %v5586_v5, 0.0 }
 0xfed   : > { %2941 = vadd.xlane.f32.xlu0 %v2940_v28  ;;  %v2943_v9 = vsel %vm1337_vm3, %v5588_v27, 0.0 }
 0xfee   : > { %2944 = vadd.xlane.f32.xlu1 %v2943_v9 }
 0xff3   : > { %v5598_v35 = vpop.eup %4386 }
 0xff4   : > { %v5600_v36 = vpop.eup %4388  ;;  %v2949_v37 = vsel %vm1337_vm3, %v5598_v35, 0.0 }
 0xfff   : > { %2576 = vrot.lane.b32.xlu1 %v5502_v8, %s5870_s3  ;;  %v2946_v8 = vsel %vm1337_vm3, %v5600_v36, 0.0 }
0x1003   : > { %2578 = vrot.lane.b32.xlu0 %v5510_v10, %s5870_s3  ;;  %v2573_v10 = vpop.permute.xlu0 %2572  ;;  %s5876_s3 = sld [smem:[#allocation40_spill]] }
0x1022   : > { %2950 = vadd.xlane.f32.xlu0 %v2949_v37 }
0x1023   : > { %2947 = vadd.xlane.f32.xlu1 %v2946_v8 }
0x107a   : > { %v2942_v39 = vpop.xlane.xlu0 %2941 }
0x107b   : > { %v2945_v40 = vpop.xlane.xlu1 %2944  ;;  %4390 = vrcp.f32 %v2942_v39 }
0x107c   : > { %4392 = vrcp.f32 %v2945_v40 }
0x107e   : > { %v2579_v41 = vpop.permute.xlu0 %2578 }
0x107f   : > { %v2600_v42 = vcombine.low %v2575_v38, %v2579_v41  ;;  %v2601_v44 = vcombine.high %v2575_v38, %v2579_v41  ;;  %v2577_v47 = vpop.permute.xlu1 %2576 }
0x1080   : > { %v2584_v21 = vcombine.low %v2573_v10, %v2577_v47  ;;  %v2585_v17 = vcombine.high %v2573_v10, %v2577_v47 }
0x1081   : > { %v2608_v48 = vrot.slane %v2600_v42, %v5264_v33  ;;  %v2615_v49 = vrot.slane %v2601_v44, %v5264_v33 }
0x1082   : > { %v2592_v50 = vrot.slane %v2584_v21, %v5264_v33  ;;  %v2599_v51 = vrot.slane %v2585_v17, %v5264_v33 }
0x1084   : > { %v2616_v52 = vcombine.low %v2592_v50, %v2608_v48  ;;  %v2617_v55 = vcombine.high %v2592_v50, %v2608_v48  ;;  %v2632_v45 = vcombine.low %v2599_v51, %v2615_v49  ;;  %v2633_v46 = vcombine.high %v2599_v51, %v2615_v49 }
0x1085   : > { %v4391_v14 = vpop.eup %4390 }
0x1086   : > { %v2624_v23 = vrot.slane %v2616_v52, %v5274_v43  ;;  %v2631_v22 = vrot.slane %v2617_v55, %v5274_v43  ;;  %v2640_v56 = vrot.slane %v2632_v45, %v5274_v43  ;;  %v2647_v57 = vrot.slane %v2633_v46, %v5274_v43  ;;  %v4393_v16 = vpop.eup %4392 }
0x1087   : > { %v2956_v25 = vmul.f32 %v4391_v14, %v5586_v5  ;;  %v2957_v26 = vmul.f32 %v4393_v16, %v5588_v27 }
0x1088   : > { %v2652_v58 = vcombine.low %v2624_v23, %v2631_v22  ;;  %v3899_v59 = vcombine.high %v2624_v23, %v2631_v22  ;;  %v2668_v60 = vcombine.low %v2640_v56, %v2647_v57  ;;  %v3900_v61 = vcombine.high %v2640_v56, %v2647_v57 }
0x1089   : > { %v2960_v32 = vpack.c.bf16 %v2956_v25, %v2956_v25  ;;  %v2961_v34 = vpack.c.bf16 %v2957_v26, %v2957_v26 }
0x108a   : > { %v2659_v62 = vrot.slane %v2652_v58, %v5264_v33  ;;  %v2667_v63 = vrot.slane %v3899_v59, %v5264_v33  ;;  %v2675_v2 = vrot.slane %v2668_v60, %v5264_v33  ;;  %v2683_v3 = vrot.slane %v3900_v61, %v5264_v33 }
0x108c   : > { %v2684_v53 = vcombine.low %v2659_v62, %v2667_v63  ;;  %v2685_v54 = vcombine.high %v2659_v62, %v2667_v63  ;;  %v2700_v6 = vcombine.low %v2675_v2, %v2683_v3  ;;  %v2701_v7 = vcombine.high %v2675_v2, %v2683_v3 }
0x108e   : > { %v2692_v11 = vrot.slane %v2684_v53, %v5274_v43  ;;  %v2699_v13 = vrot.slane %v2685_v54, %v5274_v43  ;;  %v2708_v15 = vrot.slane %v2700_v6, %v5274_v43  ;;  %v2715_v12 = vrot.slane %v2701_v7, %v5274_v43  ;;  %v4352_v6 = vld [vmem:[%s5788_s7 + $0x10] sm:$0xff]  }
0x1090   : > { %v2716_v18 = vcombine.low %v2692_v11, %v2708_v15  ;;  %v2717_v19 = vcombine.high %v2692_v11, %v2708_v15  ;;  %v2718_v20 = vcombine.low %v2699_v13, %v2715_v12  ;;  %v2719_v24 = vcombine.high %v2699_v13, %v2715_v12 }
0x1092   : > { %v2720_v28 = vpack.c.bf16 %v2716_v18, %v2716_v18  ;;  %v2721_v9 = vpack.c.bf16 %v2717_v19, %v2717_v19  ;;  %v2722_v30 = vpack.c.bf16 %v2718_v20, %v2718_v20  ;;  %v2723_v31 = vpack.c.bf16 %v2719_v24, %v2719_v24  ;;  %v4353_v19 = vld [vmem:[%s5788_s7 + $0x18] sm:$0xff]  }
0x1094   : > { %v2968_v4 = vsel %vm1587_vm4, %v2720_v28, 0  ;;  %v3014_v29 = vsel %vm1587_vm4, %v2721_v9, 0  ;;  %v3060_v5 = vsel %vm1587_vm4, %v2722_v30, 0  ;;  %v3106_v27 = vsel %vm1587_vm4, %v2723_v31, 0 }
0x1095   : > { %4142 = vmatpush3.bf16.msra.mxu1 %v2968_v4  ;;  %4148 = vmatpush3.bf16.msra.mxu0 %v3014_v29 }
0x1096   : > { %4153 = vmatprep.subr.bf16.mxu1 %v4759_v0  ;;  %4159 = vmatprep.subr.bf16.mxu0 %v4759_v0 }
0x1098   : > { %4144 = vmatmul.mubr.msk.bf16.vlgmr.msra.gmra.mrb[36].mxu1 %vm1337_vm3, %v2960_v32  ;;  %4150 = vmatmul.mubr.msk.bf16.vlgmr.msra.gmra.mrb[36].mxu0 %vm1337_vm3, %v2961_v34 }
0x1099   : > { %4154 = vmatpush3.bf16.msra.mxu1 %v3060_v5  ;;  %4160 = vmatpush3.bf16.msra.mxu0 %v3106_v27 }
0x109a   : > { %4155 = vmatprep.mubr.msk.bf16.mxu1 %vm4760_vm0, %v4759_v0  ;;  %4161 = vmatprep.mubr.msk.bf16.mxu0 %vm4760_vm0, %v4759_v0 }
0x109b   : > { %4165 = vmatprep.subr.bf16.mxu1 %v4759_v0  ;;  %4173 = vmatprep.subr.bf16.mxu0 %v4759_v0 }
0x10af   : > { %v2951_v37 = vpop.xlane.xlu0 %2950 }
0x10b0   : > { %4394 = vrcp.f32 %v2951_v37  ;;  %v2948_v8 = vpop.xlane.xlu1 %2947 }
0x10b1   : > { %4396 = vrcp.f32 %v2948_v8 }
0x10ba   : > { %v4395_v10 = vpop.eup %4394 }
0x10bb   : > { %v4397_v38 = vpop.eup %4396  ;;  %v2959_v39 = vmul.f32 %v4395_v10, %v5598_v35 }
0x10bc   : > { %v2958_v40 = vmul.f32 %v4397_v38, %v5600_v36 }
0x10bd   : > { %v2963_v41 = vpack.c.bf16 %v2959_v39, %v2959_v39 }
0x10be   : > { %v2962_v42 = vpack.c.bf16 %v2958_v40, %v2958_v40 }
0x10bf   : > { %4162 = vmatmul.mubr.msk.bf16.vlgmr.msra.gmra.mrb[40].mxu0 %vm1337_vm3, %v2963_v41 }
0x10c0   : > { %4156 = vmatmul.mubr.msk.bf16.vlgmr.msra.gmra.mrb[40].mxu1 %vm1337_vm3, %v2962_v42  ;;  %4177 = vmatprep.mubr.msk.bf16.mxu0 %vm4760_vm0, %v4759_v0  ;;  %v3915_v42 = vld [vmem:[#allocation11 + $0x1] ss:$0 sm:$0xff] }
0x10c1   : > { %4169 = vmatprep.mubr.msk.bf16.mxu1 %vm4760_vm0, %v4759_v0  ;;  %4166 = vmatpush3.bf16.msra.mxu1 %v4352_v6 }
0x10c2   : > { %4167 = vmatprep.subr.bf16.mxu1 %v4759_v0 }
0x10c5   : > { %4168 = vmatpush3.bf16.msra.mxu1 %v4353_v19 }
0x10c6   : > { %4181 = vmatprep.subr.bf16.mxu1 %v4759_v0 }
0x116b   : > { %v3004_v44 = vpop.f32.mrb[36].mxu1  ;;  %v3050_v47 = vpop.f32.mrb[36].mxu0 }
0x116c   : > { %v4145_v21 = vpop.f32.mrb[37].mxu1  ;;  %v4151_v17 = vpop.f32.mrb[37].mxu0 }
0x116d   : > { %v3007_v48 = vpop.f32.mrb[38].mxu1  ;;  %v3053_v35 = vpop.f32.mrb[38].mxu0 }
0x116e   : > { %v4146_v49 = vpop.f32.mrb[39].mxu1  ;;  %v4152_v36 = vpop.f32.mrb[39].mxu0 }
0x1192   : > { %v3142_v50 = vpop.f32.mrb[40].mxu0 }
0x1193   : > { %v3096_v51 = vpop.f32.mrb[40].mxu1  ;;  %v3164_v52 = vcombine.low %v3050_v47, %v3142_v50  ;;  %v3165_v55 = vcombine.high %v3050_v47, %v3142_v50  ;;  %v4163_v45 = vpop.f32.mrb[41].mxu0 }
0x1194   : > { %v3148_v46 = vcombine.low %v3004_v44, %v3096_v51  ;;  %v3149_v23 = vcombine.high %v3004_v44, %v3096_v51  ;;  %v4157_v22 = vpop.f32.mrb[41].mxu1  ;;  %v3145_v56 = vpop.f32.mrb[42].mxu0  ;;  %v4354_v45 = vld [vmem:[%s5865_s28 + $0x10] sm:$0xff]  }
0x1195   : > { %v3172_v57 = vrot.slane %v3164_v52, %v5264_v33  ;;  %v3179_v58 = vrot.slane %v3165_v55, %v5264_v33  ;;  %v3099_v59 = vpop.f32.mrb[42].mxu1  ;;  %v4164_v60 = vpop.f32.mrb[43].mxu0  ;;  %4174 = vmatpush3.bf16.msra.mxu0 %v4354_v45 }
0x1196   : > { %v3156_v61 = vrot.slane %v3148_v46, %v5264_v33  ;;  %v3163_v62 = vrot.slane %v3149_v23, %v5264_v33  ;;  %v4158_v63 = vpop.f32.mrb[43].mxu1  ;;  %v4355_v46 = vld [vmem:[%s5865_s28 + $0x18] sm:$0xff]   ;;  %4175 = vmatprep.subr.bf16.mxu0 %v4759_v0  ;;  %v4357_v23 = vld [vmem:[%s5866_s14 + $0x28] sm:$0xff]   ;;  %v3919_v59 = vld [vmem:[#allocation13 + $0x1] ss:$0 sm:$0xff] }
0x1198   : > { %v3180_v2 = vcombine.low %v3156_v61, %v3172_v57  ;;  %v3181_v3 = vcombine.high %v3156_v61, %v3172_v57  ;;  %v3196_v53 = vcombine.low %v3163_v62, %v3179_v58  ;;  %v3197_v54 = vcombine.high %v3163_v62, %v3179_v58  ;;  %v3920_v61 = vld [vmem:[#allocation14 + $0x1] ss:$0 sm:$0xff] }
0x1199   : > { %4176 = vmatpush3.bf16.msra.mxu0 %v4355_v46 }
0x119a   : > { %v3188_v7 = vrot.slane %v3180_v2, %v5274_v43  ;;  %v3195_v11 = vrot.slane %v3181_v3, %v5274_v43  ;;  %v3204_v13 = vrot.slane %v3196_v53, %v5274_v43  ;;  %v3211_v14 = vrot.slane %v3197_v54, %v5274_v43  ;;  %4193 = vmatprep.subr.bf16.mxu0 %v4759_v0  ;;  %v4358_v3 = vld [vmem:[%s5866_s14 + $0x30] sm:$0xff]   ;;  %v4359_v53 = vld [vmem:[%s5866_s14 + $0x38] sm:$0xff]   ;;  %v3925_v54 = vld [vmem:[#allocation16 + $0x1] ss:$0 sm:$0xff] }
0x119c   : > { %v3216_v15 = vcombine.low %v3188_v7, %v3195_v11  ;;  %v3909_v12 = vcombine.high %v3188_v7, %v3195_v11  ;;  %v3232_v16 = vcombine.low %v3204_v13, %v3211_v14  ;;  %v3910_v18 = vcombine.high %v3204_v13, %v3211_v14 }
0x119e   : > { %v3223_v20 = vrot.slane %v3216_v15, %v5264_v33  ;;  %v3231_v24 = vrot.slane %v3909_v12, %v5264_v33  ;;  %v3239_v25 = vrot.slane %v3232_v16, %v5264_v33  ;;  %v3247_v26 = vrot.slane %v3910_v18, %v5264_v33  ;;  %v3938_v16 = vld [vmem:[%s5867_s23 + $0x1] ss:$0 sm:$0xff] }
0x11a0   : > { %v3249_v28 = vcombine.high %v3223_v20, %v3231_v24  ;;  %v3265_v9 = vcombine.high %v3239_v25, %v3247_v26  ;;  %v3248_v4 = vcombine.low %v3223_v20, %v3231_v24  ;;  %v3264_v29 = vcombine.low %v3239_v25, %v3247_v26 }
0x11a2   : > { %v3263_v30 = vrot.slane %v3249_v28, %v5274_v43  ;;  %v3279_v31 = vrot.slane %v3265_v9, %v5274_v43  ;;  %v3256_v32 = vrot.slane %v3248_v4, %v5274_v43  ;;  %v3272_v34 = vrot.slane %v3264_v29, %v5274_v43 }
0x11a4   : > { %v3282_v5 = vcombine.low %v3263_v30, %v3279_v31  ;;  %v3281_v27 = vcombine.high %v3256_v32, %v3272_v34  ;;  %v3283_v37 = vcombine.high %v3263_v30, %v3279_v31  ;;  %v3280_v8 = vcombine.low %v3256_v32, %v3272_v34  ;;  %v4360_v32 = vld [vmem:[%s5874_s11] sm:$0xff]   ;;  %v4361_v34 = vld [vmem:[%s5874_s11 + $0x8] sm:$0xff]  }
0x11a6   : > { %3289 = vrot.lane.b32.xlu1 %v3282_v5, %s5871_s13  ;;  %3285 = vrot.lane.b32.xlu0 %v3281_v27, %s5872_s22  ;;  %s3951_s13 = sshll.u32 %s4893_s2, 4  ;;  %s749_s22 = scalar_lea.vmem [#allocation17], %s5180_s9 }
0x11a7   : > { %s5737_s1 = scalar_lea.hbm %s5876_s3, %s3951_s13 }
0x11aa   : > { %3293 = vrot.lane.b32.xlu1 %v3283_v37, %s5873_s6  ;;  %s3671_s6 = sshll.u32 %s749_s22, 4  ;;  %s5739_s6 = int_to_ptr.vmem [resolvable:$true] %s3671_s6 }
0x11ab   : > { %s4658_s2 = scalar_lea.vmem %s5739_s6, 16 }
0x11ac   : > { %p4659_p6 = scmp.ne.s32.totalorder %s5739_s6, %s4658_s2 }
0x11ae   : > { %p4660_p0 = pnand %p4659_p6, %p5877_p9 }
0x11b0   : > { %p4661_p5 = pneg %p4660_p0 }
0x1218   : > { %v3290_v33 = vpop.permute.xlu1 %3289  ;;  %v3286_v10 = vpop.permute.xlu0 %3285 }
0x1219   : > { %v3296_v38 = vsel %vm1337_vm3, %v3280_v8, %v3286_v10 }
0x121a   : > { %v3297_v40 = vsel %vm768_vm1, %v3296_v38, %v3290_v33  ;;  %v3946_v33 = vld [vmem:[%s5868_s8 + $0x1] ss:$0 sm:$0xff] }
0x121b   : > { %v3947_v38 = vld [vmem:[%s5869_s18 + $0x1] ss:$0 sm:$0xff] }
0x121c   : > { %v3294_v39 = vpop.permute.xlu1 %3293 }
0x121d   : > { %v3298_v41 = vsel %vm1919_vm5, %v3297_v40, %v3294_v39 }
0x121e   : > { %v3304_v43 = vpack.c.bf16 %v3298_v41, %v3298_v41 }
0x1220   : > { %4170 = vmatmul.mubr.msk.bf16.vlgmr.msra.gmra.mrb[44].mxu1 %vm839_vm2, %v3304_v43 }
0x1221   : > { %4189 = vmatprep.mubr.msk.bf16.mxu1 %vm4760_vm0, %v4759_v0 }
0x12f3   : > { %v3362_v44 = vpop.f32.mrb[44].mxu1 }
0x12f4   : > { %v3363_v47 = vadd.f32 %v3915_v42, %v3362_v44  ;;  %v4171_v21 = vpop.f32.mrb[45].mxu1 }
0x12f5   : > { %v3365_v17 = vpop.f32.mrb[46].mxu1 }
0x12f6   : > { %v4172_v48 = vpop.f32.mrb[47].mxu1  ;;  %v3368_v35 = vadd.f32 %v3363_v47, %v5485_v1  ;;  %v4356_v1 = vld [vmem:[%s5866_s14 + $0x20] sm:$0xff]  }
0x12f7   : > { %4182 = vmatpush3.bf16.msra.mxu1 %v4356_v1 }
0x12f8   : > { %v3373_v49 = vsel %vm839_vm2, %v3368_v35, 0.0  ;;  %4183 = vmatprep.subr.bf16.mxu1 %v4759_v0 }
0x12f9   : > { %3374 = vadd.xlane.f32.xlu0 %v3373_v49 }
0x12fb   : > { %4184 = vmatpush3.bf16.msra.mxu1 %v4357_v23 }
0x12fc   : > { %4185 = vmatprep.subr.bf16.mxu1 %v4759_v0 }
0x12ff   : > { %4186 = vmatpush3.bf16.msra.mxu1 %v4358_v3 }
0x1300   : > { %4187 = vmatprep.subr.bf16.mxu1 %v4759_v0 }
0x1303   : > { %4188 = vmatpush3.bf16.msra.mxu1 %v4359_v53 }
0x1386   : > { %v3375_v36 = vpop.xlane.xlu0 %3374 }
0x1387   : > { %v3376_v50 = vmul.f32 0.03125, %v3375_v36 }
0x1389   : > { %v3377_v51 = vsub.f32 %v3368_v35, %v3376_v50  ;;  %v3601_v35 = vld [vmem:[%s5875_s4] sm:$0x1]  ;;  %s4662_s4 = sshll.u32 %s4771_s19, 4  ;;  %s4663_s4 = int_to_ptr.vmem [resolvable:$false] %s4662_s4 }
0x138a   : > { %s4664_s25 = scalar_lea.vmem %s4663_s4, 32  ;;  %p4665_p3 = scmp.lt.s32.totalorder %s5739_s6, %s4663_s4 }
0x138b   : > { %v3378_v52 = vmul.f32 %v3377_v51, %v3377_v51  ;;  %p4666_p8 = scmp.lt.s32.totalorder %s4664_s25, %s4658_s2 }
0x138d   : > { %v3379_v55 = vsel %vm839_vm2, %v3378_v52, 0.0  ;;  %p4667_p2 = por %p4666_p8, %p4665_p3 }
0x138e   : > { %3380 = vadd.xlane.f32.xlu1 %v3379_v55 }
0x138f   : > { %p4668_p4 = pnand %p4667_p2, %p4661_p5 }
0x141b   : > { %v3381_v22 = vpop.xlane.xlu1 %3380 }
0x141c   : > { %v3382_v56 = vmul.f32 0.03125, %v3381_v22 }
0x141e   : > { %v3383_v57 = vadd.f32 1e-05, %v3382_v56 }
0x1420   : > { %4398 = vrsqrt.f32 %v3383_v57 }
0x142a   : > { %v4399_v58 = vpop.eup %4398 }
0x142b   : > { %v3385_v60 = vmul.f32 %v4399_v58, %v3377_v51 }
0x142d   : > { %v3392_v62 = vmul.f32 %v3919_v59, %v3385_v60 }
0x142f   : > { %v3399_v63 = vadd.f32 %v3920_v61, %v3392_v62 }
0x1431   : > { %v3405_v2 = vpack.c.bf16 %v3399_v63, %v3399_v63 }
0x1433   : > { %4178 = vmatmul.mubr.msk.bf16.vlgmr.msra.gmra.mrb[44].mxu0 %vm839_vm2, %v3405_v2 }
0x1434   : > { %4197 = vmatprep.mubr.msk.bf16.mxu0 %vm4760_vm0, %v4759_v0  ;;  %4194 = vmatpush3.bf16.msra.mxu0 %v4360_v32 }
0x1435   : > { %4195 = vmatprep.subr.bf16.mxu0 %v4759_v0 }
0x1438   : > { %4196 = vmatpush3.bf16.msra.mxu0 %v4361_v34 }
0x1506   : > { %v3463_v6 = vpop.f32.mrb[44].mxu0 }
0x1507   : > { %v3464_v7 = vadd.f32 %v3925_v54, %v3463_v6  ;;  %v4179_v11 = vpop.f32.mrb[45].mxu0 }
0x1508   : > { %v3466_v13 = vpop.f32.mrb[46].mxu0 }
0x1509   : > { %v3469_v14 = vmax.f32 %v3464_v7, 0.0  ;;  %v4180_v15 = vpop.f32.mrb[47].mxu0 }
0x150b   : > { %v3479_v12 = vpack.c.bf16 %v3469_v14, %v3469_v14 }
0x150d   : > { %4190 = vmatmul.mubr.msk.bf16.vlgmr.msra.gmra.mrb[48].mxu1 %vm2127_vm6, %v3479_v12 }
0x15e0   : > { %v3549_v18 = vpop.f32.mrb[48].mxu1 }
0x15e1   : > { %v3550_v19 = vadd.f32 %v3938_v16, %v3549_v18  ;;  %v4191_v20 = vpop.f32.mrb[49].mxu1 }
0x15e2   : > { %v3552_v24 = vpop.f32.mrb[50].mxu1 }
0x15e3   : > { %v4192_v25 = vpop.f32.mrb[51].mxu1  ;;  %v3555_v26 = vadd.f32 %v3550_v19, %v3399_v63 }
0x15e5   : > { %v3560_v28 = vsel %vm839_vm2, %v3555_v26, 0.0 }
0x15e6   : > { %3561 = vadd.xlane.f32.xlu0 %v3560_v28 }
0x1673   : > { %v3562_v9 = vpop.xlane.xlu0 %3561 }
0x1674   : > { %v3563_v4 = vmul.f32 0.03125, %v3562_v9 }
0x1676   : > { %v3564_v29 = vsub.f32 %v3555_v26, %v3563_v4 }
0x1678   : > { %v3565_v30 = vmul.f32 %v3564_v29, %v3564_v29 }
0x167a   : > { %v3566_v31 = vsel %vm839_vm2, %v3565_v30, 0.0 }
0x167b   : > { %3567 = vadd.xlane.f32.xlu0 %v3566_v31 }
0x1708   : > { %v3568_v5 = vpop.xlane.xlu0 %3567 }
0x1709   : > { %v3569_v27 = vmul.f32 0.03125, %v3568_v5 }
0x170b   : > { %v3570_v37 = vadd.f32 1e-05, %v3569_v27 }
0x170d   : > { %4400 = vrsqrt.f32 %v3570_v37 }
0x1717   : > { %v4401_v8 = vpop.eup %4400 }
0x1718   : > { %v3572_v10 = vmul.f32 %v4401_v8, %v3564_v29 }
0x171a   : > { %v3579_v39 = vmul.f32 %v3946_v33, %v3572_v10 }
0x171c   : > { %v3586_v40 = vadd.f32 %v3947_v38, %v3579_v39 }
0x171e   : > { %v3587_v0 = vsel %vm839_vm2, %v3586_v40, 0.0 }
0x171f   : > { %v3588_v41 = vrot.slane %v3587_v0, 4 }
0x1721   : > { %v3589_v43 = vadd.f32 %v3588_v41, %v3587_v0 }
0x1723   : > { %v3590_v42 = vrot.slane %v3589_v43, 2 }
0x1725   : > { %v3591_v44 = vadd.f32 %v3590_v42, %v3589_v43 }
0x1727   : > { %v3592_v47 = vrot.slane %v3591_v44, 1 }
0x1729   : > { %v3593_v21 = vadd.f32 %v3592_v47, %v3591_v44 }
0x172b   : > { %v3595_v17 = vmul.f32 0.125, %v3593_v21 }
0x172d   : > { %v3600_v48 = vpack.c.bf16 %v3595_v17, %v3595_v17 }
0x172f   : > { %4198 = vmatmul.mubr.msk.bf16.vlgmr.msra.gmra.mrb[48].mxu0 %vm839_vm2, %v3600_v48 }
0x1802   : > { %v3651_v49 = vpop.f32.mrb[48].mxu0 }
0x1803   : > { %v3652_v36 = vadd.f32 %v3651_v49, %v3601_v35  ;;  %v4199_v50 = vpop.f32.mrb[49].mxu0 }
0x1804   : > { %v3654_v51 = vpop.f32.mrb[50].mxu0 }
0x1805   : > { %3657 = vst [vmem:[%s749_s22] sm:$0x1] %v3652_v36  ;;  %v4200_v52 = vpop.f32.mrb[51].mxu0 }
0x1806   : > { %4671 = shalt.err (!%p4668_p4)
}
0x1807   : > { %s4672_s9 = scalar_lea.hbm %s5737_s1, 16  ;;  %s4676_s29 = scalar_lea.hbm %s5876_s3, 32 }
0x1808   : > { %p4673_p7 = scmp.ne.s32.totalorder %s5737_s1, %s4672_s9  ;;  %p4677_p11 = scmp.lt.u32.totalorder %s5737_s1, %s5876_s3 }
0x1809   : > { %p4678_p12 = scmp.lt.u32.totalorder %s4676_s29, %s4672_s9  ;;  %p4680_p6 = scmp.lt.u32.totalorder %s4672_s9, %s5737_s1 }
0x180a   : > { %p4674_p10 = pnand %p4673_p7, %p5877_p9 }
0x180b   : > { %p4679_p13 = por %p4678_p12, %p4677_p11 }
0x180c   : > { %p4675_p1 = pneg %p4674_p10 }
0x180d   : > { %p4681_p0 = por %p4680_p6, %p4679_p13 }
0x180f   : > { %p4682_p5 = pnand %p4681_p0, %p4675_p1 }
0x1811   : > { %4685 = shalt.err (!%p4682_p5)
}
0x1812   : > { %4233 = dma.vmem_to_hbm [thread:$0]  (%p5877_p9), %s5739_s6, 16, %s5737_s1, %s3659_s15  }
0x1813 PF: > { %s3683_s2 = sand.u32 1, %s4732_s0   ;;  %p5878_p3 = scmp.ne.s32.totalorder %s5849_s27, 0 }
0x1814   : > { %p5879_p8 = scmp.ge.s32.totalorder %s4744_s21, 2  ;;  %s3684_s25 = scalar_lea.sflag [#allocation4], %s3683_s2 }
0x1816   : > { %p4265_p2 = pnand %p5879_p8, %p5878_p3 }
0x1818   : > { %4727 = dma.done.wait (!%p4265_p2), %s3684_s25, 16  }
0x1819   : > { %4729 = vsyncadd (!%p4265_p2), %s3684_s25, 4294967280  ;;  %p38_p4 = scmp.ge.s32.totalorder %s5077_s24, 4   ;;  %s5880_s0 = smov %s4736_s30 }
0x181a   : > { %s5881_s30 = smov %s4740_s20  ;;  %s5882_s20 = smov %s5089_s26 }
0x181b   : > { %s5883_s21 = smov %s5077_s24  ;;  %40 = sbr.rel (!%p38_p4) target bundleno = 27 (0x1b), region = 194 }
0x1822   :  { %3688 = vsyncpa [#allocation3], 1 }
0x1823   :  { %3690 = vsyncpa [#allocation3 + $0x1], 1 }
0x1824   :  { %3691 = vsyncpa [#allocation6], 1 }
0x1825   :  { %3693 = vsyncpa [#allocation6 + $0x1], 1 }
0x1826   :  { %3694 = vsyncpa [#allocation9], 1 }
0x1827   :  { %3695 = vsyncpa [#allocation12], 1 }
0x1828   :  { %3696 = vsyncpa [#allocation15], 1 }
0x1829   :  { %3697 = vsyncpa [#allocation4], 1 }
0x182a   :  { %3699 = vsyncpa [#allocation4 + $0x1], 1 }

// kernel: tpu_custom_call.1
= control target key start
LH: loop header
LB: loop body
LE: loop exit
PB: predicated region body
PF: predicated region fallthrough
CT: control target
= control target key end

     0   :  { %s5781_s0 = inlined_call_operand.hbm [shape: f32[2,8,16], index: 0, kind: input, shape index: {}]   ;;  %s5782_s1 = inlined_call_operand.hbm [shape: f32[2,1,8], index: 1, kind: input, shape index: {}]   ;;  %s5783_s2 = inlined_call_operand.hbm [shape: bf16[16,32], index: 2, kind: input, shape index: {}]   ;;  %s5784_s3 = inlined_call_operand.vmem [shape: f32[1,32], index: 3, kind: input, shape index: {}]   ;;  %s5785_s4 = inlined_call_operand.hbm [shape: f32[8,32], index: 4, kind: input, shape index: {}]   ;;  %s5786_s5 = inlined_call_operand.vmem [shape: bf16[2,32,96], index: 5, kind: input, shape index: {}]   ;;  %s5787_s6 = inlined_call_operand.hbm [shape: f32[2,1,96], index: 6, kind: input, shape index: {}]   ;;  %s5788_s7 = inlined_call_operand.vmem [shape: bf16[2,32,32], index: 7, kind: input, shape index: {}]   ;;  %s5789_s8 = inlined_call_operand.hbm [shape: f32[2,1,32], index: 8, kind: input, shape index: {}]   ;;  %s5790_s9 = inlined_call_operand.hbm [shape: f32[2,1,32], index: 9, kind: input, shape index: {}]   ;;  %s5791_s10 = inlined_call_operand.hbm [shape: f32[2,1,32], index: 10, kind: input, shape index: {}]   ;;  %s5792_s11 = inlined_call_operand.vmem [shape: bf16[2,32,64], index: 11, kind: input, shape index: {}]   ;;  %s5793_s12 = inlined_call_operand.hbm [shape: f32[2,1,64], index: 12, kind: input, shape index: {}]   ;;  %s5794_s13 = inlined_call_operand.vmem [shape: bf16[2,64,32], index: 13, kind: input, shape index: {}]   ;;  %s5795_s14 = inlined_call_operand.vmem [shape: f32[2,1,32], index: 14, kind: input, shape index: {}]   ;;  %s5796_s15 = inlined_call_operand.vmem [shape: f32[2,1,32], index: 15, kind: input, shape index: {}]   ;;  %s5797_s16 = inlined_call_operand.vmem [shape: f32[2,1,32], index: 16, kind: input, shape index: {}]   ;;  %s5798_s17 = inlined_call_operand.vmem [shape: bf16[32,128], index: 17, kind: input, shape index: {}]   ;;  %s5799_s18 = inlined_call_operand.vmem [shape: f32[1,128], index: 18, kind: input, shape index: {}]   ;;  %s5800_s19 = inlined_call_operand.hbm [shape: f32[2,1,128], index: 19, kind: output, shape index: {}]  }
   0x1   :  { %5822 = sst [smem:[#allocation25_spill]] %s5781_s0 }
   0x2   :  { %5823 = sst [smem:[#allocation26_spill]] %s5782_s1 }
   0x3   :  { %5824 = sst [smem:[#allocation27_spill]] %s5783_s2 }
   0x4   :  { %5825 = sst [smem:[#allocation28_spill]] %s5784_s3 }
   0x5   :  { %5826 = sst [smem:[#allocation29_spill]] %s5785_s4 }
   0x6   :  { %5827 = sst [smem:[#allocation30_spill]] %s5787_s6 }
   0x7   :  { %5828 = sst [smem:[#allocation31_spill]] %s5789_s8 }
   0x8   :  { %5829 = sst [smem:[#allocation32_spill]] %s5790_s9 }
   0x9   :  { %5830 = sst [smem:[#allocation33_spill]] %s5792_s11 }
   0xa   :  { %5831 = sst [smem:[#allocation34_spill]] %s5794_s13 }
   0xb   :  { %5832 = sst [smem:[#allocation35_spill]] %s5795_s14 }
   0xc   :  { %5833 = sst [smem:[#allocation36_spill]] %s5796_s15 }
   0xd   :  { %5834 = sst [smem:[#allocation37_spill]] %s5797_s16 }
   0xe   :  { %5835 = sst [smem:[#allocation38_spill]] %s5798_s17 }
   0xf   :  { %5836 = sst [smem:[#allocation39_spill]] %s5799_s18 }
  0x10   :  { %5837 = sst [smem:[#allocation40_spill]] %s5800_s19 }
  0x11   :  { %24 = vsyncpa [#allocation3], 0 }
  0x12   :  { %26 = vsyncpa [#allocation3 + $0x1], 0 }
  0x13   :  { %27 = vsyncpa [#allocation6], 0 }
  0x14   :  { %29 = vsyncpa [#allocation6 + $0x1], 0 }
  0x15   :  { %30 = vsyncpa [#allocation9], 0 }
  0x16   :  { %31 = vsyncpa [#allocation12], 0 }
  0x17   :  { %32 = vsyncpa [#allocation15], 0 }
  0x18   :  { %33 = vsyncpa [#allocation4], 0 }
  0x19   :  { %35 = vsyncpa [#allocation4 + $0x1], 0  ;;  %s4872_s0 = smov 0   ;;  %s4874_s30 = smov 0  }
  0x1a   :  { %s4876_s20 = smov 0   ;;  %s4878_s21 = smov 0  }
  0x1b LB: > { %s4746_s1 = smov [#allocation7]   ;;  %s4893_s2 = sadd.s32 4294967295, %s4744_s21   ;;  %s4744_s21 = sphi %s4878_s21, %s5883_s21   ;;  %s4740_s20 = sphi %s4876_s20, %s5882_s20   ;;  %s4736_s30 = sphi %s4874_s30, %s5881_s30   ;;  %s4732_s0 = sphi %s4872_s0, %s5880_s0  }
  0x1c   : > { %s493_s22 = sshll.u32 %s4746_s1, 4  ;;  %p3824_p0 = scmp.ge.s32.totalorder %s4744_s21, 1  ;;  %s4898_s22 = int_to_ptr.vmem [resolvable:$true] %s493_s22 }
  0x1d   : > { %p5811_p1 = scmp.eq.s32.totalorder %s4893_s2, 0  ;;  %p481_p2 = scmp.lt.s32.totalorder %s4744_s21, 3 }
  0x1e   : > { %s4747_s24 = smov [#allocation8]   ;;  %s4748_s26 = smov [#allocation11]  }
  0x1f   : > { %p4900_p3 = pnand %p3824_p0, %p481_p2  ;;  %s510_s25 = sshll.u32 %s4747_s24, 4  ;;  %s4913_s25 = int_to_ptr.vmem [resolvable:$true] %s510_s25 }
  0x20   : > { %s4915_s27 = sshll.u32 %s4748_s26, 4  ;;  %s5840_s1 = sld [smem:[#allocation27_spill]]  ;;  %s540_s27 = int_to_ptr.vmem [resolvable:$true] %s4915_s27 }
  0x21   : > { %s5838_s23 = scalar_select %p4900_p3, 1, 0 }
  0x22   : > { %p4235_p5 = pneg %p4900_p3 }
  0x24   : > { %p4909_p6 = pnand %p4235_p5, %p5811_p1 }
  0x26   : > { %s4402_s19 = scalar_lea.hbm %s5840_s1, 128  ;;  %p4925_p8 = pneg %p4909_p6 }
  0x27   : > { %p4403_p7 = scmp.ne.s32.totalorder %s5840_s1, %s4402_s19  ;;  %p4409_p11 = scmp.lt.u32.totalorder %s4402_s19, %s5840_s1 }
  0x29   : > { %p4405_p9 = pnand %p4925_p8, %p4403_p7 }
  0x2b   : > { %p4406_p10 = pneg %p4405_p9 }
  0x2d   : > { %p4411_p12 = pnand %p4409_p11, %p4406_p10 }
  0x2f   : > { %4414 = shalt.err (!%p4411_p12)
}
  0x30   : > { %s4415_s17 = scalar_lea.vmem %s4898_s22, 128  ;;  %p4423_p5 = scmp.lt.s32.totalorder %s4898_s22, %s4898_s22 }
  0x31   : > { %p4416_p13 = scmp.ne.s32.totalorder %s4898_s22, %s4415_s17  ;;  %p4424_p4 = scmp.lt.s32.totalorder %s4415_s17, %s4415_s17 }
  0x33   : > { %p4418_p0 = pnand %p4416_p13, %p4925_p8  ;;  %p4425_p7 = por %p4424_p4, %p4423_p5 }
  0x35   : > { %p4419_p2 = pneg %p4418_p0 }
  0x37   : > { %p4426_p9 = pnand %p4425_p7, %p4419_p2 }
  0x39   : > { %4429 = shalt.err (!%p4426_p9)
}
  0x3a   : > { %s4749_s18 = smov 64   ;;  %s4750_s16 = smov 4  }
  0x3b   : > { %4238 = dma.hbm_to_vmem [thread:$0]  (!%p4909_p6), %s5840_s1, 128, %s4898_s22, [#allocation6], %s4749_s18, %s4749_s18, %s4750_s16  }
  0x3c   : > { %s5842_s4 = sld [smem:[#allocation29_spill]] }
  0x42   : > { %s4430_s15 = scalar_lea.hbm %s5842_s4, 128 }
  0x43   : > { %p4431_p4 = scmp.ne.s32.totalorder %s5842_s4, %s4430_s15  ;;  %p4437_p12 = scmp.lt.u32.totalorder %s4430_s15, %s5842_s4 }
  0x45   : > { %p4433_p10 = pnand %p4431_p4, %p4925_p8 }
  0x47   : > { %p4434_p11 = pneg %p4433_p10 }
  0x49   : > { %p4439_p13 = pnand %p4437_p12, %p4434_p11 }
  0x4b   : > { %4442 = shalt.err (!%p4439_p13)
}
  0x4c   : > { %s4443_s22 = scalar_lea.vmem %s4913_s25, 128  ;;  %p4451_p7 = scmp.lt.s32.totalorder %s4913_s25, %s4913_s25 }
  0x4d   : > { %p4444_p0 = scmp.ne.s32.totalorder %s4913_s25, %s4443_s22  ;;  %p4452_p9 = scmp.lt.s32.totalorder %s4443_s22, %s4443_s22 }
  0x4f   : > { %p4446_p2 = pnand %p4444_p0, %p4925_p8  ;;  %p4453_p4 = por %p4452_p9, %p4451_p7 }
  0x51   : > { %p4447_p5 = pneg %p4446_p2 }
  0x53   : > { %p4454_p10 = pnand %p4453_p4, %p4447_p5 }
  0x55   : > { %4457 = shalt.err (!%p4454_p10)
}
  0x56   : > { %4241 = dma.hbm_to_vmem [thread:$0]  (!%p4909_p6), %s5842_s4, 128, %s4913_s25, [#allocation9]  }
  0x57   : > { %s5843_s8 = sld [smem:[#allocation31_spill]] }
  0x5d   : > { %s4458_s18 = scalar_lea.hbm %s5843_s8, 32 }
  0x5e   : > { %p4459_p11 = scmp.ne.s32.totalorder %s5843_s8, %s4458_s18  ;;  %p4465_p0 = scmp.lt.u32.totalorder %s4458_s18, %s5843_s8 }
  0x60   : > { %p4461_p12 = pnand %p4459_p11, %p4925_p8 }
  0x62   : > { %p4462_p13 = pneg %p4461_p12 }
  0x64   : > { %p4467_p2 = pnand %p4465_p0, %p4462_p13 }
  0x66   : > { %4470 = shalt.err (!%p4467_p2)
}
  0x67   : > { %s4471_s26 = scalar_lea.vmem %s540_s27, 32  ;;  %p4479_p4 = scmp.lt.s32.totalorder %s540_s27, %s540_s27 }
  0x68   : > { %p4472_p5 = scmp.ne.s32.totalorder %s540_s27, %s4471_s26  ;;  %p4480_p10 = scmp.lt.s32.totalorder %s4471_s26, %s4471_s26 }
  0x6a   : > { %p4474_p7 = pnand %p4472_p5, %p4925_p8  ;;  %p4481_p1 = por %p4480_p10, %p4479_p4 }
  0x6c   : > { %p4475_p9 = pneg %p4474_p7 }
  0x6e   : > { %p4482_p3 = pnand %p4481_p1, %p4475_p9 }
  0x70   : > { %4485 = shalt.err (!%p4482_p3)
}
  0x71   : > { %s4751_s25 = smov 16   ;;  %s4752_s17 = smov 1  }
  0x72   : > { %4247 = dma.hbm_to_vmem [thread:$0]  (!%p4909_p6), %s5843_s8, 32, %s540_s27, [#allocation12], %s4751_s25, %s4751_s25, %s4752_s17  }
  0x73   : > { %s4753_s13 = smov [#allocation14]   ;;  %s4754_s15 = smov [#allocation10]  }
  0x74   : > { %s565_s14 = sshll.u32 %s4753_s13, 4  ;;  %s523_s18 = sshll.u32 %s4754_s15, 4  ;;  %s566_s14 = int_to_ptr.vmem [resolvable:$true] %s565_s14  ;;  %s524_s18 = int_to_ptr.vmem [resolvable:$true] %s523_s18 }
  0x75   : > { %s4486_s28 = scalar_lea.hbm %s5791_s10, 32 }
  0x76   : > { %p4487_p1 = scmp.ne.s32.totalorder %s5791_s10, %s4486_s28  ;;  %p4493_p12 = scmp.lt.u32.totalorder %s4486_s28, %s5791_s10 }
  0x78   : > { %p4489_p3 = pnand %p4487_p1, %p4925_p8 }
  0x7a   : > { %p4490_p11 = pneg %p4489_p3 }
  0x7c   : > { %p4495_p13 = pnand %p4493_p12, %p4490_p11 }
  0x7e   : > { %4498 = shalt.err (!%p4495_p13)
}
  0x7f   : > { %s4499_s27 = scalar_lea.vmem %s566_s14, 32  ;;  %p4507_p7 = scmp.lt.s32.totalorder %s566_s14, %s566_s14 }
  0x80   : > { %p4500_p0 = scmp.ne.s32.totalorder %s566_s14, %s4499_s27  ;;  %p4508_p9 = scmp.lt.s32.totalorder %s4499_s27, %s4499_s27 }
  0x82   : > { %p4502_p2 = pnand %p4500_p0, %p4925_p8  ;;  %p4509_p4 = por %p4508_p9, %p4507_p7 }
  0x84   : > { %p4503_p5 = pneg %p4502_p2 }
  0x86   : > { %p4510_p10 = pnand %p4509_p4, %p4503_p5 }
  0x88   : > { %4513 = shalt.err (!%p4510_p10)
}
  0x89   : > { %4253 = dma.hbm_to_vmem [thread:$0]  (!%p4909_p6), %s5791_s10, 32, %s566_s14, [#allocation15], %s4751_s25, %s4751_s25, %s4752_s17  }
  0x8a   : > { %s5844_s6 = sld [smem:[#allocation30_spill]] }
  0x90   : > { %s4514_s13 = scalar_lea.hbm %s5844_s6, 32 }
  0x91   : > { %p4515_p1 = scmp.ne.s32.totalorder %s5844_s6, %s4514_s13  ;;  %p4521_p12 = scmp.lt.u32.totalorder %s4514_s13, %s5844_s6 }
  0x93   : > { %p4517_p3 = pnand %p4515_p1, %p4925_p8 }
  0x95   : > { %p4518_p11 = pneg %p4517_p3 }
  0x97   : > { %p4523_p13 = pnand %p4521_p12, %p4518_p11 }
  0x99   : > { %4526 = shalt.err (!%p4523_p13)
}
  0x9a   : > { %s4527_s29 = scalar_lea.vmem %s524_s18, 32  ;;  %p4535_p7 = scmp.lt.s32.totalorder %s524_s18, %s524_s18 }
  0x9b   : > { %p4528_p0 = scmp.ne.s32.totalorder %s524_s18, %s4527_s29  ;;  %p4536_p9 = scmp.lt.s32.totalorder %s4527_s29, %s4527_s29 }
  0x9d   : > { %p4530_p2 = pnand %p4528_p0, %p4925_p8  ;;  %p4537_p4 = por %p4536_p9, %p4535_p7 }
  0x9f   : > { %p4531_p5 = pneg %p4530_p2 }
  0xa1   : > { %p4538_p10 = pnand %p4537_p4, %p4531_p5 }
  0xa3   : > { %4541 = shalt.err (!%p4538_p10)
}
  0xa4   : > { %4244 = dma.hbm_to_vmem [thread:$0]  (!%p4909_p6), %s5844_s6, 32, %s524_s18, [#allocation9], %s4751_s25, %s4751_s25, %s4752_s17  }
  0xa5   : > { %s4755_s27 = smov [#allocation13]   ;;  %s4756_s1 = smov [#allocation16]  }
  0xa6   : > { %s552_s4 = sshll.u32 %s4755_s27, 4  ;;  %s581_s22 = sshll.u32 %s4756_s1, 4  ;;  %s553_s4 = int_to_ptr.vmem [resolvable:$true] %s552_s4  ;;  %s582_s22 = int_to_ptr.vmem [resolvable:$true] %s581_s22 }
  0xa7   : > { %s5845_s9 = sld [smem:[#allocation32_spill]] }
  0xad   : > { %s4542_s15 = scalar_lea.hbm %s5845_s9, 32 }
  0xae   : > { %p4543_p1 = scmp.ne.s32.totalorder %s5845_s9, %s4542_s15  ;;  %p4549_p12 = scmp.lt.u32.totalorder %s4542_s15, %s5845_s9 }
  0xb0   : > { %p4545_p3 = pnand %p4543_p1, %p4925_p8 }
  0xb2   : > { %p4546_p11 = pneg %p4545_p3 }
  0xb4   : > { %p4551_p13 = pnand %p4549_p12, %p4546_p11 }
  0xb6   : > { %4554 = shalt.err (!%p4551_p13)
}
  0xb7   : > { %s4555_s18 = scalar_lea.vmem %s553_s4, 32  ;;  %p4563_p7 = scmp.lt.s32.totalorder %s553_s4, %s553_s4 }
  0xb8   : > { %p4556_p0 = scmp.ne.s32.totalorder %s553_s4, %s4555_s18  ;;  %p4564_p9 = scmp.lt.s32.totalorder %s4555_s18, %s4555_s18 }
  0xba   : > { %p4558_p2 = pnand %p4556_p0, %p4925_p8  ;;  %p4565_p4 = por %p4564_p9, %p4563_p7 }
  0xbc   : > { %p4559_p5 = pneg %p4558_p2 }
  0xbe   : > { %p4566_p10 = pnand %p4565_p4, %p4559_p5 }
  0xc0   : > { %4569 = shalt.err (!%p4566_p10)
}
  0xc1   : > { %4250 = dma.hbm_to_vmem [thread:$0]  (!%p4909_p6), %s5845_s9, 32, %s553_s4, [#allocation12], %s4751_s25, %s4751_s25, %s4752_s17  }
  0xc2   : > { %s4570_s11 = scalar_lea.hbm %s5793_s12, 32 }
  0xc3   : > { %p4571_p1 = scmp.ne.s32.totalorder %s5793_s12, %s4570_s11  ;;  %p4577_p12 = scmp.lt.u32.totalorder %s4570_s11, %s5793_s12 }
  0xc5   : > { %p4573_p3 = pnand %p4571_p1, %p4925_p8 }
  0xc7   : > { %p4574_p11 = pneg %p4573_p3 }
  0xc9   : > { %p4579_p13 = pnand %p4577_p12, %p4574_p11 }
  0xcb   : > { %4582 = shalt.err (!%p4579_p13)
}
  0xcc   : > { %s4583_s28 = scalar_lea.vmem %s582_s22, 32  ;;  %p4591_p7 = scmp.lt.s32.totalorder %s582_s22, %s582_s22 }
  0xcd   : > { %p4584_p0 = scmp.ne.s32.totalorder %s582_s22, %s4583_s28  ;;  %p4592_p9 = scmp.lt.s32.totalorder %s4583_s28, %s4583_s28 }
  0xcf   : > { %p4586_p2 = pnand %p4584_p0, %p4925_p8  ;;  %p4593_p4 = por %p4592_p9, %p4591_p7 }
  0xd1   : > { %p4587_p5 = pneg %p4586_p2 }
  0xd3   : > { %p4594_p10 = pnand %p4593_p4, %p4587_p5 }
  0xd5   : > { %4597 = shalt.err (!%p4594_p10)
}
  0xd6   : > { %4256 = dma.hbm_to_vmem [thread:$0]  (!%p4909_p6), %s5793_s12, 32, %s582_s22, [#allocation15], %s4751_s25, %s4751_s25, %s4752_s17  }
  0xd7   : > { %s3823_s3 = sadd.s32 4294967294, %s4744_s21   ;;  %s5077_s24 = sadd.s32 1, %s4744_s21  }
  0xd8   : > { %s48_s18 = sadd.s32 1, %s4740_s20  ;;  %s45_s14 = ssub.s32 %s4744_s21, %s5077_s24 }
  0xd9   : > { %p55_p8 = scmp.ne.s32.totalorder %s4740_s20, %s4736_s30  ;;  %p46_p1 = scmp.eq.s32.totalorder %s45_s14, 0 }
  0xda   : > { %p56_p3 = scmp.eq.s32.totalorder %s4744_s21, 0  ;;  %p61_p11 = scmp.ne.s32.totalorder %s4736_s30, %s4732_s0 }
  0xdb   : > { %p468_p12 = scmp.eq.s32.totalorder %s4893_s2, 1  ;;  %p5846_p0 = scmp.eq.s32.totalorder %s4893_s2, 0 }
  0xdc   : > { %s5089_s26 = scalar_select %p46_p1, %s4740_s20, %s48_s18  }
  0xdd   : > { %p57_p13 = por %p56_p3, %p55_p8  ;;  %p5093_p2 = por %p5846_p0, %p61_p11 }
  0xde   : > { %p5097_p6 = por %p468_p12, %p55_p8  ;;  %p474_p5 = scmp.eq.s32.totalorder %s3823_s3, 1 }
  0xdf   : > { %s5847_s25 = scalar_select %p5093_p2, 1, 0 }
  0xe0   : > { %s5848_s17 = scalar_select %p5097_p6, 1, 0 }
  0xe1   : > { %p4275_p7 = scmp.lt.s32.totalorder %s4744_s21, 2  ;;  %s5103_s22 = sand.u32 1, %s4740_s20  }
  0xe2   : > { %p5105_p9 = por %p474_p5, %p61_p11  ;;  %s3833_s1 = sshll.u32 %s5103_s22, 3 }
  0xe3   : > { %s3834_s11 = sshll.u32 %s4744_s21, 7  ;;  %s5850_s16 = sld [smem:[#allocation25_spill]] }
  0xe4   : > { %s5849_s27 = scalar_select %p5105_p9, 1, 0 }
  0xe5   : > { %s617_s28 = scalar_lea.vmem [#allocation2], %s3833_s1  ;;  %p5116_p4 = pnand %p4275_p7, %p57_p13 }
  0xe6   : > { %s624_s4 = sshll.u32 %s617_s28, 4  ;;  %s614_s18 = scalar_lea.sflag [#allocation3], %s5103_s22  ;;  %s5120_s4 = int_to_ptr.vmem [resolvable:$true] %s624_s4 }
  0xe7   : > { %p4600_p8 = pneg %p5116_p4 }
  0xe9   : > { %s5114_s19 = scalar_lea.hbm %s5850_s16, %s3834_s11  ;;  %s4603_s13 = scalar_lea.hbm %s5850_s16, 256 }
  0xea   : > { %s4598_s14 = scalar_lea.hbm %s5114_s19, 128  ;;  %p4604_p11 = scmp.lt.u32.totalorder %s5114_s19, %s5850_s16 }
  0xeb   : > { %p4599_p10 = scmp.ne.s32.totalorder %s5114_s19, %s4598_s14  ;;  %p4605_p12 = scmp.lt.u32.totalorder %s4603_s13, %s4598_s14 }
  0xec   : > { %p4607_p0 = scmp.lt.u32.totalorder %s4598_s14, %s5114_s19 }
  0xed   : > { %p4601_p1 = pnand %p4600_p8, %p4599_p10  ;;  %p4606_p13 = por %p4605_p12, %p4604_p11 }
  0xef   : > { %p4602_p3 = pneg %p4601_p1  ;;  %p4608_p5 = por %p4607_p0, %p4606_p13 }
  0xf1   : > { %p4609_p7 = pnand %p4608_p5, %p4602_p3 }
  0xf3   : > { %4612 = shalt.err (!%p4609_p7)
}
  0xf4   : > { %s4613_s3 = scalar_lea.vmem %s5120_s4, 128  ;;  %s4757_s1 = smov [#allocation2]  }
  0xf5   : > { %p4614_p10 = scmp.ne.s32.totalorder %s5120_s4, %s4613_s3  ;;  %s4618_s11 = sshll.u32 %s4757_s1, 4  ;;  %s4619_s11 = int_to_ptr.vmem [resolvable:$false] %s4618_s11 }
  0xf6   : > { %s4620_s15 = scalar_lea.vmem %s4619_s11, 256  ;;  %p4621_p6 = scmp.lt.s32.totalorder %s5120_s4, %s4619_s11 }
  0xf7   : > { %p4616_p1 = pnand %p4614_p10, %p4600_p8  ;;  %p4622_p11 = scmp.lt.s32.totalorder %s4620_s15, %s4613_s3 }
  0xf9   : > { %p4617_p9 = pneg %p4616_p1  ;;  %p4623_p12 = por %p4622_p11, %p4621_p6 }
  0xfb   : > { %p4624_p13 = pnand %p4623_p12, %p4617_p9 }
  0xfd   : > { %4627 = shalt.err (!%p4624_p13)
}
  0xfe   : > { %4260 = dma.hbm_to_vmem [thread:$0]  (!%p5116_p4), %s5114_s19, 128, %s5120_s4, %s614_s18  }
  0xff   : > { %s3835_s14 = sshll.u32 %s4744_s21, 4  ;;  %s5852_s1 = sld [smem:[#allocation26_spill]] }
 0x100   : > { %s634_s3 = scalar_lea.vmem [#allocation5], %s5103_s22  ;;  %s5853_s15 = sand.u32 1, %s4744_s21  }
 0x101   : > { %s641_s11 = sshll.u32 %s634_s3, 4  ;;  %s632_s8 = scalar_lea.sflag [#allocation6], %s5853_s15  ;;  %s642_s11 = int_to_ptr.vmem [resolvable:$true] %s641_s11 }
 0x105   : > { %s5153_s6 = scalar_lea.hbm %s5852_s1, %s3835_s14  ;;  %s4633_s18 = scalar_lea.hbm %s5852_s1, 32 }
 0x106   : > { %s4628_s9 = scalar_lea.hbm %s5153_s6, 16  ;;  %p4634_p0 = scmp.lt.u32.totalorder %s5153_s6, %s5852_s1 }
 0x107   : > { %p4629_p6 = scmp.ne.s32.totalorder %s5153_s6, %s4628_s9  ;;  %p4635_p5 = scmp.lt.u32.totalorder %s4633_s18, %s4628_s9 }
 0x108   : > { %p4637_p10 = scmp.lt.u32.totalorder %s4628_s9, %s5153_s6 }
 0x109   : > { %p4631_p9 = pnand %p4629_p6, %p4600_p8  ;;  %p4636_p7 = por %p4635_p5, %p4634_p0 }
 0x10b   : > { %p4632_p3 = pneg %p4631_p9  ;;  %p4638_p1 = por %p4637_p10, %p4636_p7 }
 0x10d   : > { %p4639_p11 = pnand %p4638_p1, %p4632_p3 }
 0x10f   : > { %4642 = shalt.err (!%p4639_p11)
}
 0x110   : > { %s4643_s22 = scalar_lea.vmem %s642_s11, 16  ;;  %s4758_s28 = smov [#allocation5]  }
 0x111   : > { %p4644_p12 = scmp.ne.s32.totalorder %s642_s11, %s4643_s22  ;;  %s4648_s3 = sshll.u32 %s4758_s28, 4  ;;  %s4649_s3 = int_to_ptr.vmem [resolvable:$false] %s4648_s3 }
 0x112   : > { %s4650_s15 = scalar_lea.vmem %s4649_s3, 32  ;;  %p4651_p9 = scmp.lt.s32.totalorder %s642_s11, %s4649_s3 }
 0x113   : > { %p4646_p13 = pnand %p4644_p12, %p4600_p8  ;;  %p4652_p2 = scmp.lt.s32.totalorder %s4650_s15, %s4643_s22 }
 0x115   : > { %p4647_p6 = pneg %p4646_p13  ;;  %p4653_p0 = por %p4652_p2, %p4651_p9 }
 0x117   : > { %p4654_p5 = pnand %p4653_p0, %p4647_p6 }
 0x119   : > { %4657 = shalt.err (!%p4654_p5)
}
 0x11a   : > { %4263 = dma.hbm_to_vmem [thread:$0]  (!%p5116_p4), %s5153_s6, 16, %s642_s11, %s632_s8  }
 0x11b   : > { %p5854_p3 = scmp.ne.s32.totalorder %s5838_s23, 0 }
 0x11c   : > { %s5180_s9 = sand.u32 (!%p5854_p3), 1, %s4736_s30   ;;  %p5855_p8 = scmp.ne.s32.totalorder (!%p5854_p3), %s5847_s25, 0 }
 0x11d   : > { %650 = sbr.rel (%p5854_p3) target bundleno = 6163 (0x1813), region = 96  ;;  %s3837_s19 = sshll.u32 (!%p5854_p3), %s5180_s9, 3 }
 0x11e   : > { %s653_s4 = scalar_lea.sflag (!%p5854_p3), [#allocation3], %s5180_s9  ;;  %s656_s18 = scalar_lea.vmem (!%p5854_p3), [#allocation2], %s3837_s19 }
 0x124   : > { %4703 = dma.done.wait (%p5855_p8), %s653_s4, 128  }
 0x125   : > { %4705 = vsyncadd (%p5855_p8), %s653_s4, 4294967168  ;;  %s661_s6 = sand.u32 1, %s4893_s2   ;;  %s664_s23 = scalar_lea.vmem [#allocation5], %s5180_s9 }
 0x126   : > { %s662_s8 = scalar_lea.sflag [#allocation6], %s661_s6 }
 0x127   : > { %4707 = dma.done.wait (%p5855_p8), %s662_s8, 16  }
 0x128   : > { %4709 = vsyncadd (%p5855_p8), %s662_s8, 4294967280  ;;  %p5856_p2 = scmp.eq.s32.totalorder %s4893_s2, 0 }
 0x12a   : > { %4711 = dma.done.wait (%p5856_p2), [#allocation6], 128   ;;  %p5857_p4 = pmov %p5856_p2 }
 0x12b   : > { %p5858_p7 = pmov %p5856_p2 }
 0x12c   : > { %4713 = vsyncadd (%p5857_p4), [#allocation6], 4294967168 }
 0x12d   : > { %4715 = dma.done.wait (%p5858_p7), [#allocation9], 160   ;;  %p5859_p10 = pmov %p5856_p2 }
 0x12e   : > { %p5860_p1 = pmov %p5856_p2 }
 0x12f   : > { %4717 = vsyncadd (%p5859_p10), [#allocation9], 4294967136 }
 0x130   : > { %4719 = dma.done.wait (%p5860_p1), [#allocation12], 64   ;;  %p5861_p11 = pmov %p5860_p1 }
 0x131   : > { %p5862_p12 = pmov %p5860_p1 }
 0x132   : > { %4721 = vsyncadd (%p5861_p11), [#allocation12], 4294967232 }
 0x133   : > { %4723 = dma.done.wait (%p5862_p12), [#allocation15], 64   ;;  %p5863_p13 = pmov %p5860_p1 }
 0x134   : > { %v4759_v0 = vmov 0.0   ;;  %vm4760_vm0 = vmmov 0   ;;  %v4339_v1 = vld [vmem:[#allocation7] sm:$0xff]   ;;  %v751_v2 = vld [vmem:[%s656_s18] sm:$0xff]  ;;  %vm768_vm1 = vcmask 130048   ;;  %s5864_s28 = sld [smem:[#allocation28_spill]]  ;;  %v898_v26 = vlaneseq }
 0x135   : > { %4725 = vsyncadd (%p5863_p13), [#allocation15], 4294967232  ;;  %4019 = vmatprep.subr.bf16.mxu0 %v4759_v0  ;;  %4021 = vmatprep.mubr.msk.bf16.mxu0 %vm4760_vm0, %v4759_v0  ;;  %v754_v3 = vpack.c.bf16 %v751_v2, %v751_v2  ;;  %v4340_v4 = vld [vmem:[%s5786_s5] sm:$0xff]   ;;  %v4341_v5 = vld [vmem:[%s5786_s5 + $0x8] sm:$0xff]   ;;  %vm839_vm2 = vcmask 261120   ;;  %s4761_s3 = smov 104  }
 0x136   : > { %4025 = vmatprep.subr.bf16.mxu1 %v4759_v0  ;;  %4029 = vmatprep.mubr.msk.bf16.mxu1 %vm4760_vm0, %v4759_v0  ;;  %v812_v8 = vld [vmem:[#allocation8] sm:$0xff]  ;;  %v3848_v15 = vld [vmem:[#allocation10] ss:$0 sm:$0xff]  ;;  %s4762_s15 = smov 120   ;;  %s4763_s19 = smov 96   ;;  %v899_v28 = vshrl.u32 %v898_v26, 7 }
 0x137   : > { %4020 = vmatpush3.bf16.msra.mxu0 %v4339_v1  ;;  %4026 = vmatpush3.bf16.msra.mxu1 %v4340_v4  ;;  %s4764_s4 = smov 112   ;;  %v4765_v24 = vmov 1983009808   ;;  %v4766_v29 = vmov 1934713408   ;;  %vm1337_vm3 = vcmask 64512  }
 0x138   : > { %4033 = vmatprep.subr.bf16.mxu0 %v4759_v0  ;;  %4027 = vmatprep.subr.bf16.mxu1 %v4759_v0  ;;  %v896_v25 = vunpack.c.l.s4 %v4765_v24  ;;  %v928_v30 = vunpack.c.l.s4 %v4766_v29  ;;  %s5819_s18 = smov 64   ;;  %vm1587_vm4 = vcmask 1043456   ;;  %s5818_s29 = smov 16   ;;  %vm1919_vm5 = vcmask 195584  }
 0x139   : > { %s5817_s11 = smov 8   ;;  %s5816_s14 = smov 24   ;;  %vm2127_vm6 = vcmask 523264  }
 0x13a   : > { %4022 = vmatmul.mubr.msk.bf16.vlgmr.msra.gmra.mrb[0].mxu0 %vm768_vm1, %v754_v3  ;;  %v3845_v6 = vld [vmem:[%s5864_s28] ss:$0 sm:$0xff]  ;;  %v897_v27 = vunpack.c.0.s8 %v896_v25  ;;  %v929_v36 = vunpack.c.0.s8 %v928_v30  ;;  %s5865_s28 = sld [smem:[#allocation33_spill]]  ;;  %s5868_s8 = sld [smem:[#allocation36_spill]] }
 0x13b   : > { %4035 = vmatprep.mubr.msk.bf16.mxu0 %vm4760_vm0, %v4759_v0  ;;  %4028 = vmatpush3.bf16.msra.mxu1 %v4341_v5  ;;  %s5871_s13 = smov 16   ;;  %s5872_s22 = smov 8  }
 0x13c   : > { %4039 = vmatprep.subr.bf16.mxu1 %v4759_v0  ;;  %v5264_v33 = vsub.s32 %v897_v27, %v899_v28  ;;  %v5274_v43 = vsub.s32 %v929_v36, %v899_v28  ;;  %s5873_s6 = smov 24   ;;  %p5877_p9 = scmp.ne.s32.totalorder %s5848_s17, 0 }
 0x20d   : > { %v806_v7 = vpop.f32.mrb[0].mxu0 }
 0x20e   : > { %v807_v9 = vadd.f32 %v3845_v6, %v806_v7  ;;  %v4023_v10 = vpop.f32.mrb[1].mxu0 }
 0x20f   : > { %v809_v11 = vpop.f32.mrb[2].mxu0 }
 0x210   : > { %v5231_v12 = vadd.f32 %v812_v8, %v807_v9  ;;  %v4024_v13 = vpop.f32.mrb[3].mxu0 }
 0x212   : > { %v819_v14 = vpack.c.bf16 %v5231_v12, %v5231_v12 }
 0x214   : > { %4030 = vmatmul.mubr.msk.bf16.vlgmr.msra.gmra.mrb[0].mxu1 %vm839_vm2, %v819_v14 }
 0x215   : > { %4041 = vmatprep.mubr.msk.bf16.mxu1 %vm4760_vm0, %v4759_v0 }
 0x2e7   : > { %v877_v16 = vpop.f32.mrb[0].mxu1 }
 0x2e8   : > { %v5238_v17 = vadd.f32 %v3848_v15, %v877_v16  ;;  %v4031_v18 = vpop.f32.mrb[1].mxu1 }
 0x2e9   : > { %v880_v19 = vpop.f32.mrb[2].mxu1 }
 0x2ea   : > { %890 = vrot.lane.b32.xlu1 %v5238_v17, %s4761_s3  ;;  %884 = vrot.lane.b32.xlu0 %v5238_v17, %s4762_s15  ;;  %v4032_v20 = vpop.f32.mrb[3].mxu1 }
 0x2ee   : > { %1033 = vrot.lane.b32.xlu1 %v5238_v17, %s4763_s19  ;;  %887 = vrot.lane.b32.xlu0 %v5238_v17, %s4764_s4 }
 0x35c   : > { %v5248_v21 = vpop.permute.xlu0 %884  ;;  %v5252_v22 = vpop.permute.xlu1 %890 }
 0x35d   : > { %1035 = vrot.lane.b32.xlu0 %v5248_v21, %s4763_s19  ;;  %v909_v34 = vcombine.low %v5248_v21, %v5252_v22  ;;  %v910_v35 = vcombine.high %v5248_v21, %v5252_v22 }
 0x35f   : > { %v917_v39 = vrot.slane %v909_v34, %v5264_v33  ;;  %v924_v40 = vrot.slane %v910_v35, %v5264_v33 }
 0x360   : > { %v5254_v23 = vpop.permute.xlu0 %887  ;;  %v1034_v41 = vpop.permute.xlu1 %1033 }
 0x361   : > { %1039 = vrot.lane.b32.xlu0 %v5252_v22, %s4763_s19  ;;  %1037 = vrot.lane.b32.xlu1 %v5254_v23, %s4763_s19  ;;  %v893_v31 = vcombine.low %v5238_v17, %v5254_v23  ;;  %v894_v32 = vcombine.high %v5238_v17, %v5254_v23 }
 0x363   : > { %v901_v37 = vrot.slane %v893_v31, %v5264_v33  ;;  %v908_v38 = vrot.slane %v894_v32, %v5264_v33 }
 0x365   : > { %v925_v44 = vcombine.low %v901_v37, %v917_v39  ;;  %v926_v45 = vcombine.high %v901_v37, %v917_v39  ;;  %v941_v46 = vcombine.low %v908_v38, %v924_v40  ;;  %v942_v47 = vcombine.high %v908_v38, %v924_v40 }
 0x367   : > { %v933_v54 = vrot.slane %v925_v44, %v5274_v43  ;;  %v940_v55 = vrot.slane %v926_v45, %v5274_v43  ;;  %v949_v56 = vrot.slane %v941_v46, %v5274_v43  ;;  %v956_v57 = vrot.slane %v942_v47, %v5274_v43 }
 0x369   : > { %v961_v3 = vcombine.low %v933_v54, %v940_v55  ;;  %v3852_v4 = vcombine.high %v933_v54, %v940_v55  ;;  %v977_v5 = vcombine.low %v949_v56, %v956_v57  ;;  %v3853_v6 = vcombine.high %v949_v56, %v956_v57 }
 0x36b   : > { %v968_v16 = vrot.slane %v961_v3, %v5264_v33  ;;  %v976_v18 = vrot.slane %v3852_v4, %v5264_v33  ;;  %v984_v19 = vrot.slane %v977_v5, %v5264_v33  ;;  %v992_v20 = vrot.slane %v3853_v6, %v5264_v33  ;;  %v5326_v5 = vld [vmem:[%s664_s23] ss:$0 sm:$0xff]  ;;  %s5867_s23 = sld [smem:[#allocation35_spill]] }
 0x36d   : > { %v993_v35 = vcombine.low %v968_v16, %v976_v18  ;;  %v1009_v36 = vcombine.low %v984_v19, %v992_v20 }
 0x36f   : > { %v1001_v44 = vrot.slane %v993_v35, %v5274_v43  ;;  %v1017_v45 = vrot.slane %v1009_v36, %v5274_v43 }
 0x3cf   : > { %v1036_v42 = vpop.permute.xlu0 %1035 }
 0x3d3   : > { %v1038_v48 = vpop.permute.xlu1 %1037  ;;  %v1040_v49 = vpop.permute.xlu0 %1039 }
 0x3d4   : > { %v1045_v50 = vcombine.low %v1034_v41, %v1038_v48  ;;  %v1046_v51 = vcombine.high %v1034_v41, %v1038_v48  ;;  %v1061_v52 = vcombine.low %v1036_v42, %v1040_v49  ;;  %v1062_v53 = vcombine.high %v1036_v42, %v1040_v49 }
 0x3d6   : > { %v1053_v58 = vrot.slane %v1045_v50, %v5264_v33  ;;  %v1060_v59 = vrot.slane %v1046_v51, %v5264_v33  ;;  %v1069_v60 = vrot.slane %v1061_v52, %v5264_v33  ;;  %v1076_v61 = vrot.slane %v1062_v53, %v5264_v33 }
 0x3d7   : > { %v994_v50 = vcombine.high %v968_v16, %v976_v18  ;;  %v1025_v51 = vcombine.low %v1001_v44, %v1017_v45  ;;  %v1026_v52 = vcombine.high %v1001_v44, %v1017_v45  ;;  %v1010_v53 = vcombine.high %v984_v19, %v992_v20 }
 0x3d8   : > { %v1077_v62 = vcombine.low %v1053_v58, %v1069_v60  ;;  %v1078_v63 = vcombine.high %v1053_v58, %v1069_v60  ;;  %v1093_v1 = vcombine.low %v1060_v59, %v1076_v61  ;;  %v1094_v2 = vcombine.high %v1060_v59, %v1076_v61 }
 0x3d9   : > { %v1029_v56 = vpack.c.bf16 %v1025_v51, %v1025_v51  ;;  %v1030_v57 = vpack.c.bf16 %v1026_v52, %v1026_v52  ;;  %v1008_v58 = vrot.slane %v994_v50, %v5274_v43  ;;  %v1024_v59 = vrot.slane %v1010_v53, %v5274_v43 }
 0x3da   : > { %v1085_v7 = vrot.slane %v1077_v62, %v5274_v43  ;;  %v1092_v8 = vrot.slane %v1078_v63, %v5274_v43  ;;  %v1101_v9 = vrot.slane %v1093_v1, %v5274_v43  ;;  %v1108_v10 = vrot.slane %v1094_v2, %v5274_v43 }
 0x3db   : > { %v1027_v62 = vcombine.low %v1008_v58, %v1024_v59  ;;  %v1028_v63 = vcombine.high %v1008_v58, %v1024_v59 }
 0x3dc   : > { %v1113_v11 = vcombine.low %v1085_v7, %v1092_v8  ;;  %v3854_v13 = vcombine.high %v1085_v7, %v1092_v8  ;;  %v1129_v14 = vcombine.low %v1101_v9, %v1108_v10  ;;  %v3855_v15 = vcombine.high %v1101_v9, %v1108_v10 }
 0x3dd   : > { %v1031_v1 = vpack.c.bf16 %v1027_v62, %v1027_v62  ;;  %v1032_v2 = vpack.c.bf16 %v1028_v63, %v1028_v63 }
 0x3de   : > { %v1120_v24 = vrot.slane %v1113_v11, %v5264_v33  ;;  %v1128_v25 = vrot.slane %v3854_v13, %v5264_v33  ;;  %v1136_v26 = vrot.slane %v1129_v14, %v5264_v33  ;;  %v1144_v27 = vrot.slane %v3855_v15, %v5264_v33 }
 0x3e0   : > { %v1145_v28 = vcombine.low %v1120_v24, %v1128_v25  ;;  %v1161_v29 = vcombine.low %v1136_v26, %v1144_v27  ;;  %v1146_v30 = vcombine.high %v1120_v24, %v1128_v25  ;;  %v1162_v31 = vcombine.high %v1136_v26, %v1144_v27 }
 0x3e2   : > { %v1153_v32 = vrot.slane %v1145_v28, %v5274_v43  ;;  %v1169_v34 = vrot.slane %v1161_v29, %v5274_v43  ;;  %v1160_v39 = vrot.slane %v1146_v30, %v5274_v43  ;;  %v1176_v40 = vrot.slane %v1162_v31, %v5274_v43 }
 0x3e4   : > { %v1177_v37 = vcombine.low %v1153_v32, %v1169_v34  ;;  %v1178_v38 = vcombine.high %v1153_v32, %v1169_v34  ;;  %v1179_v48 = vcombine.low %v1160_v39, %v1176_v40  ;;  %v1180_v49 = vcombine.high %v1160_v39, %v1176_v40 }
 0x3e6   : > { %v1181_v41 = vpack.c.bf16 %v1177_v37, %v1177_v37  ;;  %v1182_v42 = vpack.c.bf16 %v1178_v38, %v1178_v38  ;;  %v1183_v54 = vpack.c.bf16 %v1179_v48, %v1179_v48  ;;  %v1184_v55 = vpack.c.bf16 %v1180_v49, %v1180_v49 }
 0x3e8   : > { %v1342_v46 = vsel %vm1337_vm3, %v1181_v41, 0  ;;  %v1388_v47 = vsel %vm1337_vm3, %v1182_v42, 0  ;;  %v1434_v60 = vsel %vm1337_vm3, %v1183_v54, 0  ;;  %v1480_v61 = vsel %vm1337_vm3, %v1184_v55, 0 }
 0x3e9   : > { %4034 = vmatpush3.bf16.xpose.msra.mxu0 %v1342_v46  ;;  %4040 = vmatpush3.bf16.xpose.msra.mxu1 %v1388_v47 }
 0x3ea   : > { %4045 = vmatprep.subr.bf16.mxu0 %v4759_v0  ;;  %4051 = vmatprep.subr.bf16.mxu1 %v4759_v0 }
 0x3f0   : > { %4036 = vmatmul.mubr.msk.bf16.vlgmr.msra.gmra.mrb[4].mxu0 %vm1337_vm3, %v1029_v56  ;;  %4042 = vmatmul.mubr.msk.bf16.vlgmr.msra.gmra.mrb[4].mxu1 %vm1337_vm3, %v1030_v57 }
 0x3f1   : > { %4046 = vmatpush3.bf16.xpose.msra.mxu0 %v1434_v60  ;;  %4052 = vmatpush3.bf16.xpose.msra.mxu1 %v1480_v61 }
 0x3f2   : > { %4047 = vmatprep.mubr.msk.bf16.mxu0 %vm4760_vm0, %v4759_v0  ;;  %4053 = vmatprep.mubr.msk.bf16.mxu1 %vm4760_vm0, %v4759_v0 }
 0x3f3   : > { %4057 = vmatprep.subr.bf16.mxu0 %v4759_v0  ;;  %4063 = vmatprep.subr.bf16.mxu1 %v4759_v0 }
 0x3f8   : > { %4048 = vmatmul.mubr.msk.bf16.vlgmr.msra.gmra.mrb[8].mxu0 %vm1337_vm3, %v1031_v1  ;;  %4054 = vmatmul.mubr.msk.bf16.vlgmr.msra.gmra.mrb[8].mxu1 %vm1337_vm3, %v1032_v2 }
 0x3f9   : > { %4059 = vmatprep.mubr.msk.bf16.mxu0 %vm4760_vm0, %v4759_v0  ;;  %4065 = vmatprep.mubr.msk.bf16.mxu1 %vm4760_vm0, %v4759_v0 }
 0x4c3   : > { %v1378_v3 = vpop.f32.mrb[4].mxu0  ;;  %v1424_v4 = vpop.f32.mrb[4].mxu1 }
 0x4c4   : > { %v1522_v6 = vmul.f32 0.35355338, %v1378_v3  ;;  %v1523_v7 = vmul.f32 0.35355338, %v1424_v4  ;;  %v4037_v8 = vpop.f32.mrb[5].mxu0  ;;  %v4043_v9 = vpop.f32.mrb[5].mxu1 }
 0x4c5   : > { %v1381_v10 = vpop.f32.mrb[6].mxu0  ;;  %v1427_v11 = vpop.f32.mrb[6].mxu1 }
 0x4c6   : > { %v4038_v13 = vpop.f32.mrb[7].mxu0  ;;  %v4044_v14 = vpop.f32.mrb[7].mxu1  ;;  %v1533_v15 = vadd.f32 %v5326_v5, %v1523_v7  ;;  %v1532_v16 = vadd.f32 %v5326_v5, %v1522_v6 }
 0x4c8   : > { %v1539_v18 = vsel %vm1337_vm3, %v1533_v15, -inf  ;;  %v1536_v19 = vsel %vm1337_vm3, %v1532_v16, -inf }
 0x4c9   : > { %1540 = vmax.xlane.f32.xlu0 %v1539_v18  ;;  %1537 = vmax.xlane.f32.xlu1 %v1536_v19 }
 0x4cb   : > { %v1470_v20 = vpop.f32.mrb[8].mxu0  ;;  %v1516_v24 = vpop.f32.mrb[8].mxu1 }
 0x4cc   : > { %v1524_v25 = vmul.f32 0.35355338, %v1470_v20  ;;  %v1525_v26 = vmul.f32 0.35355338, %v1516_v24  ;;  %v4049_v27 = vpop.f32.mrb[9].mxu0  ;;  %v4055_v28 = vpop.f32.mrb[9].mxu1 }
 0x4cd   : > { %v1473_v29 = vpop.f32.mrb[10].mxu0  ;;  %v1519_v30 = vpop.f32.mrb[10].mxu1 }
 0x4ce   : > { %v4050_v31 = vpop.f32.mrb[11].mxu0  ;;  %v4056_v32 = vpop.f32.mrb[11].mxu1  ;;  %v1535_v34 = vadd.f32 %v5326_v5, %v1525_v26  ;;  %v1534_v35 = vadd.f32 %v5326_v5, %v1524_v25 }
 0x4d0   : > { %v1545_v36 = vsel %vm1337_vm3, %v1535_v34, -inf  ;;  %v1542_v37 = vsel %vm1337_vm3, %v1534_v35, -inf }
 0x4d1   : > { %1546 = vmax.xlane.f32.xlu1 %v1545_v36  ;;  %1543 = vmax.xlane.f32.xlu0 %v1542_v37 }
 0x4e2   : > { %1187 = vrot.lane.b32.xlu1 %v5248_v21, %s5819_s18 }
 0x4e7   : > { %1185 = vrot.lane.b32.xlu0 %v5238_v17, %s5819_s18 }
 0x556   : > { %v1541_v38 = vpop.xlane.xlu0 %1540  ;;  %v1538_v39 = vpop.xlane.xlu1 %1537 }
 0x557   : > { %v1549_v40 = vsub.f32 %v1533_v15, %v1541_v38  ;;  %v1548_v41 = vsub.f32 %v1532_v16, %v1538_v39 }
 0x559   : > { %v1554_v42 = vmul.f32 1.442695, %v1549_v40  ;;  %v1552_v44 = vmul.f32 1.442695, %v1548_v41 }
 0x55b   : > { %4362 = vpow2.f32 %v1554_v42 }
 0x55c   : > { %4364 = vpow2.f32 %v1552_v44 }
 0x55e   : > { %v1544_v17 = vpop.xlane.xlu0 %1543  ;;  %v1547_v48 = vpop.xlane.xlu1 %1546 }
 0x55f   : > { %v1550_v49 = vsub.f32 %v1534_v35, %v1544_v17  ;;  %v1551_v50 = vsub.f32 %v1535_v34, %v1547_v48 }
 0x561   : > { %v1556_v51 = vmul.f32 1.442695, %v1550_v49  ;;  %v1558_v52 = vmul.f32 1.442695, %v1551_v50 }
 0x562   : > { %v1186_v56 = vpop.permute.xlu0 %1185 }
 0x563   : > { %4366 = vpow2.f32 %v1556_v51 }
 0x564   : > { %4368 = vpow2.f32 %v1558_v52 }
 0x565   : > { %v5340_v45 = vpop.eup %4362 }
 0x566   : > { %v5342_v46 = vpop.eup %4364  ;;  %v1563_v47 = vsel %vm1337_vm3, %v5340_v45, 0.0 }
 0x567   : > { %1564 = vadd.xlane.f32.xlu1 %v1563_v47  ;;  %v1560_v21 = vsel %vm1337_vm3, %v5342_v46, 0.0 }
 0x568   : > { %1561 = vadd.xlane.f32.xlu0 %v1560_v21 }
 0x56d   : > { %v5352_v53 = vpop.eup %4366 }
 0x56e   : > { %v5354_v54 = vpop.eup %4368  ;;  %v1566_v55 = vsel %vm1337_vm3, %v5352_v53, 0.0 }
 0x578   : > { %1189 = vrot.lane.b32.xlu1 %v5254_v23, %s5819_s18  ;;  %v1569_v23 = vsel %vm1337_vm3, %v5354_v54, 0.0 }
 0x57e   : > { %1191 = vrot.lane.b32.xlu0 %v5252_v22, %s5819_s18  ;;  %v1188_v22 = vpop.permute.xlu1 %1187  ;;  %s5869_s18 = sld [smem:[#allocation37_spill]] }
 0x59c   : > { %1567 = vadd.xlane.f32.xlu1 %v1566_v55 }
 0x59d   : > { %1570 = vadd.xlane.f32.xlu0 %v1569_v23 }
 0x5f4   : > { %v1565_v57 = vpop.xlane.xlu1 %1564 }
 0x5f5   : > { %v1562_v58 = vpop.xlane.xlu0 %1561  ;;  %4370 = vrcp.f32 %v1565_v57 }
 0x5f6   : > { %4372 = vrcp.f32 %v1562_v58 }
 0x5f8   : > { %v1190_v59 = vpop.permute.xlu1 %1189 }
 0x5f9   : > { %v1197_v60 = vcombine.low %v1186_v56, %v1190_v59  ;;  %v1198_v61 = vcombine.high %v1186_v56, %v1190_v59  ;;  %v1192_v62 = vpop.permute.xlu0 %1191 }
 0x5fa   : > { %v1213_v63 = vcombine.low %v1188_v22, %v1192_v62  ;;  %v1214_v1 = vcombine.high %v1188_v22, %v1192_v62 }
 0x5fb   : > { %v1205_v2 = vrot.slane %v1197_v60, %v5264_v33  ;;  %v1212_v3 = vrot.slane %v1198_v61, %v5264_v33 }
 0x5fc   : > { %v1221_v4 = vrot.slane %v1213_v63, %v5264_v33  ;;  %v1228_v6 = vrot.slane %v1214_v1, %v5264_v33 }
 0x5fe   : > { %v1229_v7 = vcombine.low %v1205_v2, %v1221_v4  ;;  %v1230_v8 = vcombine.high %v1205_v2, %v1221_v4  ;;  %v1245_v9 = vcombine.low %v1212_v3, %v1228_v6  ;;  %v1246_v10 = vcombine.high %v1212_v3, %v1228_v6 }
 0x5ff   : > { %v4371_v35 = vpop.eup %4370 }
 0x600   : > { %v1237_v11 = vrot.slane %v1229_v7, %v5274_v43  ;;  %v1244_v13 = vrot.slane %v1230_v8, %v5274_v43  ;;  %v1253_v14 = vrot.slane %v1245_v9, %v5274_v43  ;;  %v1260_v15 = vrot.slane %v1246_v10, %v5274_v43  ;;  %v4373_v38 = vpop.eup %4372 }
 0x601   : > { %v1577_v44 = vmul.f32 %v4371_v35, %v5340_v45  ;;  %v1576_v47 = vmul.f32 %v4373_v38, %v5342_v46 }
 0x602   : > { %v1265_v16 = vcombine.low %v1237_v11, %v1244_v13  ;;  %v3856_v18 = vcombine.high %v1237_v11, %v1244_v13  ;;  %v1281_v19 = vcombine.low %v1253_v14, %v1260_v15  ;;  %v3857_v20 = vcombine.high %v1253_v14, %v1260_v15 }
 0x603   : > { %v1580_v52 = vpack.c.bf16 %v1576_v47, %v1576_v47  ;;  %v1581_v55 = vpack.c.bf16 %v1577_v44, %v1577_v44 }
 0x604   : > { %v1272_v24 = vrot.slane %v1265_v16, %v5264_v33  ;;  %v1280_v25 = vrot.slane %v3856_v18, %v5264_v33  ;;  %v1288_v26 = vrot.slane %v1281_v19, %v5264_v33  ;;  %v1296_v27 = vrot.slane %v3857_v20, %v5264_v33 }
 0x606   : > { %v1297_v28 = vcombine.low %v1272_v24, %v1280_v25  ;;  %v1298_v29 = vcombine.high %v1272_v24, %v1280_v25  ;;  %v1313_v30 = vcombine.low %v1288_v26, %v1296_v27  ;;  %v1314_v31 = vcombine.high %v1288_v26, %v1296_v27 }
 0x608   : > { %v1305_v32 = vrot.slane %v1297_v28, %v5274_v43  ;;  %v1312_v34 = vrot.slane %v1298_v29, %v5274_v43  ;;  %v1321_v36 = vrot.slane %v1313_v30, %v5274_v43  ;;  %v1328_v37 = vrot.slane %v1314_v31, %v5274_v43  ;;  %v4342_v31 = vld [vmem:[%s5788_s7] sm:$0xff]  }
 0x60a   : > { %v1329_v39 = vcombine.low %v1305_v32, %v1321_v36  ;;  %v1330_v40 = vcombine.high %v1305_v32, %v1321_v36  ;;  %v1331_v41 = vcombine.low %v1312_v34, %v1328_v37  ;;  %v1332_v42 = vcombine.high %v1312_v34, %v1328_v37 }
 0x60c   : > { %v1333_v21 = vpack.c.bf16 %v1329_v39, %v1329_v39  ;;  %v1334_v17 = vpack.c.bf16 %v1330_v40, %v1330_v40  ;;  %v1335_v50 = vpack.c.bf16 %v1331_v41, %v1331_v41  ;;  %v1336_v51 = vpack.c.bf16 %v1332_v42, %v1332_v42  ;;  %v4343_v41 = vld [vmem:[%s5788_s7 + $0x8] sm:$0xff]  }
 0x60e   : > { %v1589_v48 = vsel %vm1587_vm4, %v1333_v21, 0  ;;  %v1635_v49 = vsel %vm1587_vm4, %v1334_v17, 0  ;;  %v1681_v45 = vsel %vm1587_vm4, %v1335_v50, 0  ;;  %v1727_v46 = vsel %vm1587_vm4, %v1336_v51, 0 }
 0x60f   : > { %4058 = vmatpush3.bf16.msra.mxu0 %v1589_v48  ;;  %4064 = vmatpush3.bf16.msra.mxu1 %v1635_v49 }
 0x610   : > { %4069 = vmatprep.subr.bf16.mxu0 %v4759_v0  ;;  %4075 = vmatprep.subr.bf16.mxu1 %v4759_v0 }
 0x612   : > { %4060 = vmatmul.mubr.msk.bf16.vlgmr.msra.gmra.mrb[12].mxu0 %vm1337_vm3, %v1580_v52  ;;  %4066 = vmatmul.mubr.msk.bf16.vlgmr.msra.gmra.mrb[12].mxu1 %vm1337_vm3, %v1581_v55 }
 0x613   : > { %4070 = vmatpush3.bf16.msra.mxu0 %v1681_v45  ;;  %4076 = vmatpush3.bf16.msra.mxu1 %v1727_v46 }
 0x614   : > { %4071 = vmatprep.mubr.msk.bf16.mxu0 %vm4760_vm0, %v4759_v0  ;;  %4077 = vmatprep.mubr.msk.bf16.mxu1 %vm4760_vm0, %v4759_v0 }
 0x615   : > { %4081 = vmatprep.subr.bf16.mxu0 %v4759_v0  ;;  %4089 = vmatprep.subr.bf16.mxu1 %v4759_v0 }
 0x629   : > { %v1568_v23 = vpop.xlane.xlu1 %1567 }
 0x62a   : > { %4374 = vrcp.f32 %v1568_v23  ;;  %v1571_v22 = vpop.xlane.xlu0 %1570 }
 0x62b   : > { %4376 = vrcp.f32 %v1571_v22 }
 0x634   : > { %v4375_v56 = vpop.eup %4374 }
 0x635   : > { %v4377_v57 = vpop.eup %4376  ;;  %v1578_v58 = vmul.f32 %v4375_v56, %v5352_v53 }
 0x636   : > { %v1579_v59 = vmul.f32 %v4377_v57, %v5354_v54 }
 0x637   : > { %v1582_v60 = vpack.c.bf16 %v1578_v58, %v1578_v58 }
 0x638   : > { %v1583_v61 = vpack.c.bf16 %v1579_v59, %v1579_v59 }
 0x639   : > { %4072 = vmatmul.mubr.msk.bf16.vlgmr.msra.gmra.mrb[16].mxu0 %vm1337_vm3, %v1582_v60 }
 0x63a   : > { %4078 = vmatmul.mubr.msk.bf16.vlgmr.msra.gmra.mrb[16].mxu1 %vm1337_vm3, %v1583_v61  ;;  %4085 = vmatprep.mubr.msk.bf16.mxu0 %vm4760_vm0, %v4759_v0 }
 0x63b   : > { %4093 = vmatprep.mubr.msk.bf16.mxu1 %vm4760_vm0, %v4759_v0  ;;  %4082 = vmatpush3.bf16.msra.mxu0 %v4342_v31 }
 0x63c   : > { %4083 = vmatprep.subr.bf16.mxu0 %v4759_v0 }
 0x63f   : > { %4084 = vmatpush3.bf16.msra.mxu0 %v4343_v41 }
 0x640   : > { %4097 = vmatprep.subr.bf16.mxu0 %v4759_v0 }
 0x6e5   : > { %v1625_v62 = vpop.f32.mrb[12].mxu0  ;;  %v1671_v63 = vpop.f32.mrb[12].mxu1 }
 0x6e6   : > { %v4061_v1 = vpop.f32.mrb[13].mxu0  ;;  %v4067_v2 = vpop.f32.mrb[13].mxu1 }
 0x6e7   : > { %v1628_v3 = vpop.f32.mrb[14].mxu0  ;;  %v1674_v53 = vpop.f32.mrb[14].mxu1  ;;  %v3869_v1 = vld [vmem:[#allocation11] ss:$0 sm:$0xff] }
 0x6e8   : > { %v4062_v4 = vpop.f32.mrb[15].mxu0  ;;  %v4068_v54 = vpop.f32.mrb[15].mxu1 }
 0x70c   : > { %v1717_v6 = vpop.f32.mrb[16].mxu0 }
 0x70d   : > { %v1769_v7 = vcombine.low %v1625_v62, %v1717_v6  ;;  %v1770_v8 = vcombine.high %v1625_v62, %v1717_v6  ;;  %v1763_v9 = vpop.f32.mrb[16].mxu1  ;;  %v4073_v10 = vpop.f32.mrb[17].mxu0 }
 0x70e   : > { %v1785_v11 = vcombine.low %v1671_v63, %v1763_v9  ;;  %v1786_v13 = vcombine.high %v1671_v63, %v1763_v9  ;;  %v4079_v14 = vpop.f32.mrb[17].mxu1  ;;  %v1720_v15 = vpop.f32.mrb[18].mxu0 }
 0x70f   : > { %v1777_v16 = vrot.slane %v1769_v7, %v5264_v33  ;;  %v1784_v18 = vrot.slane %v1770_v8, %v5264_v33  ;;  %v1766_v19 = vpop.f32.mrb[18].mxu1  ;;  %v4074_v20 = vpop.f32.mrb[19].mxu0  ;;  %v4344_v14 = vld [vmem:[%s5865_s28] sm:$0xff]   ;;  %v4345_v15 = vld [vmem:[%s5865_s28 + $0x8] sm:$0xff]  }
 0x710   : > { %v1793_v24 = vrot.slane %v1785_v11, %v5264_v33  ;;  %v1800_v25 = vrot.slane %v1786_v13, %v5264_v33  ;;  %v4080_v26 = vpop.f32.mrb[19].mxu1  ;;  %4090 = vmatpush3.bf16.msra.mxu1 %v4344_v14 }
 0x711   : > { %4091 = vmatprep.subr.bf16.mxu1 %v4759_v0 }
 0x712   : > { %v1801_v27 = vcombine.low %v1777_v16, %v1793_v24  ;;  %v1802_v28 = vcombine.high %v1777_v16, %v1793_v24  ;;  %v1817_v29 = vcombine.low %v1784_v18, %v1800_v25  ;;  %v1818_v30 = vcombine.high %v1784_v18, %v1800_v25  ;;  %v3873_v25 = vld [vmem:[#allocation13] ss:$0 sm:$0xff] }
 0x714   : > { %v1809_v32 = vrot.slane %v1801_v27, %v5274_v43  ;;  %v1816_v34 = vrot.slane %v1802_v28, %v5274_v43  ;;  %v1825_v35 = vrot.slane %v1817_v29, %v5274_v43  ;;  %v1832_v36 = vrot.slane %v1818_v30, %v5274_v43  ;;  %4092 = vmatpush3.bf16.msra.mxu1 %v4345_v15  ;;  %v3874_v27 = vld [vmem:[#allocation14] ss:$0 sm:$0xff] }
 0x715   : > { %4109 = vmatprep.subr.bf16.mxu1 %v4759_v0 }
 0x716   : > { %v1837_v37 = vcombine.low %v1809_v32, %v1816_v34  ;;  %v3867_v38 = vcombine.high %v1809_v32, %v1816_v34  ;;  %v1853_v39 = vcombine.low %v1825_v35, %v1832_v36  ;;  %v3868_v40 = vcombine.high %v1825_v35, %v1832_v36  ;;  %v3875_v34 = vld [vmem:[#allocation16] ss:$0 sm:$0xff] }
 0x718   : > { %v1844_v42 = vrot.slane %v1837_v37, %v5264_v33  ;;  %v1852_v44 = vrot.slane %v3867_v38, %v5264_v33  ;;  %v1860_v47 = vrot.slane %v1853_v39, %v5264_v33  ;;  %v1868_v21 = vrot.slane %v3868_v40, %v5264_v33 }
 0x71a   : > { %v1870_v17 = vcombine.high %v1844_v42, %v1852_v44  ;;  %v1886_v48 = vcombine.high %v1860_v47, %v1868_v21  ;;  %v1869_v49 = vcombine.low %v1844_v42, %v1852_v44  ;;  %v1885_v50 = vcombine.low %v1860_v47, %v1868_v21  ;;  %v3879_v42 = vld [vmem:[%s5867_s23] ss:$0 sm:$0xff] }
 0x71c   : > { %v1884_v51 = vrot.slane %v1870_v17, %v5274_v43  ;;  %v1900_v52 = vrot.slane %v1886_v48, %v5274_v43  ;;  %v1877_v55 = vrot.slane %v1869_v49, %v5274_v43  ;;  %v1893_v45 = vrot.slane %v1885_v50, %v5274_v43 }
 0x71e   : > { %v1903_v46 = vcombine.low %v1884_v51, %v1900_v52  ;;  %v1902_v23 = vcombine.high %v1877_v55, %v1893_v45  ;;  %v1904_v22 = vcombine.high %v1884_v51, %v1900_v52  ;;  %v1901_v56 = vcombine.low %v1877_v55, %v1893_v45 }
 0x720   : > { %1910 = vrot.lane.b32.xlu1 %v1903_v46, %s5818_s29  ;;  %1906 = vrot.lane.b32.xlu0 %v1902_v23, %s5817_s11  ;;  %v4350_v23 = vld [vmem:[%s5786_s5 + $0x10] sm:$0xff]   ;;  %s5874_s11 = sld [smem:[#allocation38_spill]] }
 0x724   : > { %1914 = vrot.lane.b32.xlu1 %v1904_v22, %s5816_s14  ;;  %s5866_s14 = sld [smem:[#allocation34_spill]]  ;;  %v4351_v22 = vld [vmem:[%s5786_s5 + $0x18] sm:$0xff]  }
 0x72a   : > { %v4347_v16 = vld [vmem:[%s5866_s14 + $0x8] sm:$0xff]   ;;  %v4348_v31 = vld [vmem:[%s5866_s14 + $0x10] sm:$0xff]   ;;  %v4349_v32 = vld [vmem:[%s5866_s14 + $0x18] sm:$0xff]  }
 0x792   : > { %v1911_v57 = vpop.permute.xlu1 %1910  ;;  %v1907_v58 = vpop.permute.xlu0 %1906 }
 0x793   : > { %v1917_v59 = vsel %vm1337_vm3, %v1901_v56, %v1907_v58 }
 0x794   : > { %v1918_v61 = vsel %vm768_vm1, %v1917_v59, %v1911_v57 }
 0x796   : > { %v1915_v60 = vpop.permute.xlu1 %1914 }
 0x797   : > { %v1920_v62 = vsel %vm1919_vm5, %v1918_v61, %v1915_v60  ;;  %v3885_v60 = vld [vmem:[%s5868_s8] ss:$0 sm:$0xff] }
 0x798   : > { %v1925_v63 = vpack.c.bf16 %v1920_v62, %v1920_v62  ;;  %v3886_v62 = vld [vmem:[%s5869_s18] ss:$0 sm:$0xff] }
 0x79a   : > { %4086 = vmatmul.mubr.msk.bf16.vlgmr.msra.gmra.mrb[20].mxu0 %vm839_vm2, %v1925_v63 }
 0x79b   : > { %4105 = vmatprep.mubr.msk.bf16.mxu0 %vm4760_vm0, %v4759_v0 }
 0x86d   : > { %v1982_v2 = vpop.f32.mrb[20].mxu0 }
 0x86e   : > { %v1983_v3 = vadd.f32 %v3869_v1, %v1982_v2  ;;  %v4087_v53 = vpop.f32.mrb[21].mxu0 }
 0x86f   : > { %v1985_v4 = vpop.f32.mrb[22].mxu0 }
 0x870   : > { %v4088_v54 = vpop.f32.mrb[23].mxu0  ;;  %v1988_v6 = vadd.f32 %v1983_v3, %v5231_v12  ;;  %v4346_v12 = vld [vmem:[%s5866_s14] sm:$0xff]  }
 0x871   : > { %4098 = vmatpush3.bf16.msra.mxu0 %v4346_v12  ;;  %v3891_v3 = vld [vmem:[#allocation10 + $0x1] ss:$0 sm:$0xff] }
 0x872   : > { %v1991_v7 = vsel %vm839_vm2, %v1988_v6, 0.0  ;;  %4099 = vmatprep.subr.bf16.mxu0 %v4759_v0 }
 0x873   : > { %1992 = vadd.xlane.f32.xlu0 %v1991_v7 }
 0x875   : > { %4100 = vmatpush3.bf16.msra.mxu0 %v4347_v16 }
 0x876   : > { %4101 = vmatprep.subr.bf16.mxu0 %v4759_v0 }
 0x879   : > { %4102 = vmatpush3.bf16.msra.mxu0 %v4348_v31 }
 0x87a   : > { %4103 = vmatprep.subr.bf16.mxu0 %v4759_v0 }
 0x87d   : > { %4104 = vmatpush3.bf16.msra.mxu0 %v4349_v32 }
 0x87e   : > { %4123 = vmatprep.subr.bf16.mxu0 %v4759_v0 }
 0x900   : > { %v1993_v8 = vpop.xlane.xlu0 %1992 }
 0x901   : > { %v1995_v9 = vmul.f32 0.03125, %v1993_v8 }
 0x903   : > { %v1996_v10 = vsub.f32 %v1988_v6, %v1995_v9 }
 0x905   : > { %v1997_v11 = vmul.f32 %v1996_v10, %v1996_v10 }
 0x907   : > { %v1998_v13 = vsel %vm839_vm2, %v1997_v11, 0.0 }
 0x908   : > { %1999 = vadd.xlane.f32.xlu1 %v1998_v13 }
 0x995   : > { %v2000_v18 = vpop.xlane.xlu1 %1999 }
 0x996   : > { %v2001_v19 = vmul.f32 0.03125, %v2000_v18 }
 0x998   : > { %v2002_v20 = vadd.f32 1e-05, %v2001_v19 }
 0x99a   : > { %4378 = vrsqrt.f32 %v2002_v20 }
 0x9a4   : > { %v4379_v24 = vpop.eup %4378 }
 0x9a5   : > { %v2004_v26 = vmul.f32 %v4379_v24, %v1996_v10 }
 0x9a7   : > { %v2011_v28 = vmul.f32 %v3873_v25, %v2004_v26 }
 0x9a9   : > { %v2018_v29 = vadd.f32 %v3874_v27, %v2011_v28 }
 0x9ab   : > { %v2023_v30 = vpack.c.bf16 %v2018_v29, %v2018_v29 }
 0x9ad   : > { %4094 = vmatmul.mubr.msk.bf16.vlgmr.msra.gmra.mrb[20].mxu1 %vm839_vm2, %v2023_v30 }
 0x9ae   : > { %4113 = vmatprep.mubr.msk.bf16.mxu1 %vm4760_vm0, %v4759_v0  ;;  %4110 = vmatpush3.bf16.msra.mxu1 %v4350_v23 }
 0x9af   : > { %4111 = vmatprep.subr.bf16.mxu1 %v4759_v0 }
 0x9b2   : > { %4112 = vmatpush3.bf16.msra.mxu1 %v4351_v22 }
 0x9b3   : > { %4117 = vmatprep.subr.bf16.mxu1 %v4759_v0 }
 0xa80   : > { %v2080_v35 = vpop.f32.mrb[20].mxu1 }
 0xa81   : > { %v2081_v36 = vadd.f32 %v3875_v34, %v2080_v35  ;;  %v4095_v37 = vpop.f32.mrb[21].mxu1 }
 0xa82   : > { %v2083_v38 = vpop.f32.mrb[22].mxu1 }
 0xa83   : > { %v2086_v39 = vmax.f32 %v2081_v36, 0.0  ;;  %v4096_v40 = vpop.f32.mrb[23].mxu1 }
 0xa85   : > { %v2095_v41 = vpack.c.bf16 %v2086_v39, %v2086_v39 }
 0xa87   : > { %4106 = vmatmul.mubr.msk.bf16.vlgmr.msra.gmra.mrb[24].mxu0 %vm2127_vm6, %v2095_v41 }
 0xa88   : > { %4125 = vmatprep.mubr.msk.bf16.mxu0 %vm4760_vm0, %v4759_v0 }
 0xb5a   : > { %v2165_v44 = vpop.f32.mrb[24].mxu0 }
 0xb5b   : > { %v2166_v47 = vadd.f32 %v3879_v42, %v2165_v44  ;;  %v4107_v21 = vpop.f32.mrb[25].mxu0 }
 0xb5c   : > { %v2168_v17 = vpop.f32.mrb[26].mxu0 }
 0xb5d   : > { %v4108_v48 = vpop.f32.mrb[27].mxu0  ;;  %v2171_v49 = vadd.f32 %v2166_v47, %v2018_v29 }
 0xb5f   : > { %v2174_v50 = vsel %vm839_vm2, %v2171_v49, 0.0 }
 0xb60   : > { %2175 = vadd.xlane.f32.xlu0 %v2174_v50 }
 0xbed   : > { %v2176_v51 = vpop.xlane.xlu0 %2175 }
 0xbee   : > { %v2177_v52 = vmul.f32 0.03125, %v2176_v51 }
 0xbf0   : > { %v2178_v55 = vsub.f32 %v2171_v49, %v2177_v52 }
 0xbf2   : > { %v2179_v45 = vmul.f32 %v2178_v55, %v2178_v55 }
 0xbf4   : > { %v2180_v46 = vsel %vm839_vm2, %v2179_v45, 0.0 }
 0xbf5   : > { %2181 = vadd.xlane.f32.xlu0 %v2180_v46 }
 0xc82   : > { %v2182_v56 = vpop.xlane.xlu0 %2181 }
 0xc83   : > { %v2183_v57 = vmul.f32 0.03125, %v2182_v56 }
 0xc85   : > { %v2184_v58 = vadd.f32 1e-05, %v2183_v57 }
 0xc87   : > { %4380 = vrsqrt.f32 %v2184_v58 }
 0xc91   : > { %v4381_v59 = vpop.eup %4380 }
 0xc92   : > { %v2186_v61 = vmul.f32 %v4381_v59, %v2178_v55 }
 0xc94   : > { %v2193_v63 = vmul.f32 %v3885_v60, %v2186_v61 }
 0xc96   : > { %v5485_v1 = vadd.f32 %v3886_v62, %v2193_v63 }
 0xc98   : > { %v2206_v2 = vpack.c.bf16 %v5485_v1, %v5485_v1 }
 0xc9a   : > { %4114 = vmatmul.mubr.msk.bf16.vlgmr.msra.gmra.mrb[24].mxu1 %vm839_vm2, %v2206_v2 }
 0xc9b   : > { %4119 = vmatprep.mubr.msk.bf16.mxu1 %vm4760_vm0, %v4759_v0 }
 0xd6d   : > { %v2264_v53 = vpop.f32.mrb[24].mxu1 }
 0xd6e   : > { %v5492_v4 = vadd.f32 %v3891_v3, %v2264_v53  ;;  %v4115_v54 = vpop.f32.mrb[25].mxu1 }
 0xd6f   : > { %v2267_v6 = vpop.f32.mrb[26].mxu1 }
 0xd70   : > { %2274 = vrot.lane.b32.xlu0 %v5492_v4, %s4764_s4  ;;  %2271 = vrot.lane.b32.xlu1 %v5492_v4, %s4762_s15  ;;  %v4116_v7 = vpop.f32.mrb[27].mxu1  ;;  %s5875_s4 = sld [smem:[#allocation39_spill]]  ;;  %s3659_s15 = scalar_lea.sflag [#allocation4], %s5180_s9 }
 0xd74   : > { %2277 = vrot.lane.b32.xlu1 %v5492_v4, %s4761_s3  ;;  %s5870_s3 = smov 64  }
 0xd78   : > { %2420 = vrot.lane.b32.xlu1 %v5492_v4, %s4763_s19 }
 0xde2   : > { %v5502_v8 = vpop.permute.xlu0 %2274  ;;  %v5504_v9 = vpop.permute.xlu1 %2271 }
 0xde3   : > { %2424 = vrot.lane.b32.xlu1 %v5502_v8, %s4763_s19  ;;  %2422 = vrot.lane.b32.xlu0 %v5504_v9, %s4763_s19  ;;  %v2280_v14 = vcombine.low %v5492_v4, %v5502_v8  ;;  %v2281_v15 = vcombine.high %v5492_v4, %v5502_v8 }
 0xde5   : > { %v2288_v19 = vrot.slane %v2280_v14, %v5264_v33  ;;  %v2295_v20 = vrot.slane %v2281_v15, %v5264_v33 }
 0xde6   : > { %v5510_v10 = vpop.permute.xlu1 %2277 }
 0xde7   : > { %2426 = vrot.lane.b32.xlu0 %v5510_v10, %s4763_s19  ;;  %v2296_v11 = vcombine.low %v5504_v9, %v5510_v10  ;;  %v2297_v13 = vcombine.high %v5504_v9, %v5510_v10  ;;  %s4771_s19 = smov [#allocation17]  }
 0xde9   : > { %v2304_v16 = vrot.slane %v2296_v11, %v5264_v33  ;;  %v2311_v18 = vrot.slane %v2297_v13, %v5264_v33 }
 0xdea   : > { %v2421_v12 = vpop.permute.xlu1 %2420 }
 0xdeb   : > { %v2312_v26 = vcombine.low %v2288_v19, %v2304_v16  ;;  %v2313_v27 = vcombine.high %v2288_v19, %v2304_v16  ;;  %v2328_v28 = vcombine.low %v2295_v20, %v2311_v18  ;;  %v2329_v29 = vcombine.high %v2295_v20, %v2311_v18 }
 0xded   : > { %v2320_v36 = vrot.slane %v2312_v26, %v5274_v43  ;;  %v2327_v37 = vrot.slane %v2313_v27, %v5274_v43  ;;  %v2336_v38 = vrot.slane %v2328_v28, %v5274_v43  ;;  %v2343_v39 = vrot.slane %v2329_v29, %v5274_v43 }
 0xdef   : > { %v2348_v49 = vcombine.low %v2320_v36, %v2327_v37  ;;  %v3895_v50 = vcombine.high %v2320_v36, %v2327_v37  ;;  %v2364_v51 = vcombine.low %v2336_v38, %v2343_v39  ;;  %v3896_v52 = vcombine.high %v2336_v38, %v2343_v39 }
 0xdf1   : > { %v2355_v59 = vrot.slane %v2348_v49, %v5264_v33  ;;  %v2363_v60 = vrot.slane %v3895_v50, %v5264_v33  ;;  %v2371_v61 = vrot.slane %v2364_v51, %v5264_v33  ;;  %v2379_v62 = vrot.slane %v3896_v52, %v5264_v33 }
 0xdf3   : > { %v2380_v15 = vcombine.low %v2355_v59, %v2363_v60  ;;  %v2397_v36 = vcombine.high %v2371_v61, %v2379_v62 }
 0xdf5   : > { %v2388_v26 = vrot.slane %v2380_v15, %v5274_v43 }
 0xe55   : > { %v2423_v24 = vpop.permute.xlu0 %2422  ;;  %v2425_v25 = vpop.permute.xlu1 %2424 }
 0xe56   : > { %v2432_v30 = vcombine.low %v2421_v12, %v2425_v25  ;;  %v2433_v31 = vcombine.high %v2421_v12, %v2425_v25  ;;  %v2396_v12 = vcombine.low %v2371_v61, %v2379_v62 }
 0xe58   : > { %v2440_v40 = vrot.slane %v2432_v30, %v5264_v33  ;;  %v2447_v41 = vrot.slane %v2433_v31, %v5264_v33  ;;  %v2404_v27 = vrot.slane %v2396_v12, %v5274_v43 }
 0xe59   : > { %v2427_v32 = vpop.permute.xlu0 %2426 }
 0xe5a   : > { %v2448_v34 = vcombine.low %v2423_v24, %v2427_v32  ;;  %v2449_v35 = vcombine.high %v2423_v24, %v2427_v32  ;;  %v2381_v32 = vcombine.high %v2355_v59, %v2363_v60 }
 0xe5c   : > { %v2456_v42 = vrot.slane %v2448_v34, %v5264_v33  ;;  %v2463_v44 = vrot.slane %v2449_v35, %v5264_v33  ;;  %v2412_v34 = vcombine.low %v2388_v26, %v2404_v27  ;;  %v2413_v35 = vcombine.high %v2388_v26, %v2404_v27 }
 0xe5e   : > { %v2464_v47 = vcombine.low %v2440_v40, %v2456_v42  ;;  %v2465_v21 = vcombine.high %v2440_v40, %v2456_v42  ;;  %v2480_v17 = vcombine.low %v2447_v41, %v2463_v44  ;;  %v2481_v48 = vcombine.high %v2447_v41, %v2463_v44 }
 0xe5f   : > { %v2416_v39 = vpack.c.bf16 %v2412_v34, %v2412_v34  ;;  %v2417_v40 = vpack.c.bf16 %v2413_v35, %v2413_v35  ;;  %v2395_v41 = vrot.slane %v2381_v32, %v5274_v43  ;;  %v2411_v42 = vrot.slane %v2397_v36, %v5274_v43 }
 0xe60   : > { %v2472_v55 = vrot.slane %v2464_v47, %v5274_v43  ;;  %v2479_v45 = vrot.slane %v2465_v21, %v5274_v43  ;;  %v2488_v46 = vrot.slane %v2480_v17, %v5274_v43  ;;  %v2495_v23 = vrot.slane %v2481_v48, %v5274_v43 }
 0xe61   : > { %v2414_v21 = vcombine.low %v2395_v41, %v2411_v42  ;;  %v2415_v17 = vcombine.high %v2395_v41, %v2411_v42 }
 0xe62   : > { %v2500_v22 = vcombine.low %v2472_v55, %v2479_v45  ;;  %v3897_v56 = vcombine.high %v2472_v55, %v2479_v45  ;;  %v2516_v57 = vcombine.low %v2488_v46, %v2495_v23  ;;  %v3898_v58 = vcombine.high %v2488_v46, %v2495_v23 }
 0xe63   : > { %v2418_v48 = vpack.c.bf16 %v2414_v21, %v2414_v21  ;;  %v2419_v49 = vpack.c.bf16 %v2415_v17, %v2415_v17 }
 0xe64   : > { %v2507_v63 = vrot.slane %v2500_v22, %v5264_v33  ;;  %v2515_v2 = vrot.slane %v3897_v56, %v5264_v33  ;;  %v2523_v3 = vrot.slane %v2516_v57, %v5264_v33  ;;  %v2531_v53 = vrot.slane %v3898_v58, %v5264_v33 }
 0xe66   : > { %v2532_v54 = vcombine.low %v2507_v63, %v2515_v2  ;;  %v2548_v6 = vcombine.low %v2523_v3, %v2531_v53  ;;  %v2533_v7 = vcombine.high %v2507_v63, %v2515_v2  ;;  %v2549_v11 = vcombine.high %v2523_v3, %v2531_v53 }
 0xe68   : > { %v2540_v13 = vrot.slane %v2532_v54, %v5274_v43  ;;  %v2556_v14 = vrot.slane %v2548_v6, %v5274_v43  ;;  %v2547_v19 = vrot.slane %v2533_v7, %v5274_v43  ;;  %v2563_v20 = vrot.slane %v2549_v11, %v5274_v43 }
 0xe6a   : > { %v2564_v16 = vcombine.low %v2540_v13, %v2556_v14  ;;  %v2565_v18 = vcombine.high %v2540_v13, %v2556_v14  ;;  %v2566_v30 = vcombine.low %v2547_v19, %v2563_v20  ;;  %v2567_v31 = vcombine.high %v2547_v19, %v2563_v20 }
 0xe6c   : > { %v2568_v24 = vpack.c.bf16 %v2564_v16, %v2564_v16  ;;  %v2569_v25 = vpack.c.bf16 %v2565_v18, %v2565_v18  ;;  %v2570_v37 = vpack.c.bf16 %v2566_v30, %v2566_v30  ;;  %v2571_v38 = vpack.c.bf16 %v2567_v31, %v2567_v31 }
 0xe6e   : > { %v2728_v28 = vsel %vm1337_vm3, %v2568_v24, 0  ;;  %v2774_v29 = vsel %vm1337_vm3, %v2569_v25, 0  ;;  %v2820_v44 = vsel %vm1337_vm3, %v2570_v37, 0  ;;  %v2866_v47 = vsel %vm1337_vm3, %v2571_v38, 0 }
 0xe6f   : > { %4118 = vmatpush3.bf16.xpose.msra.mxu1 %v2728_v28  ;;  %4124 = vmatpush3.bf16.xpose.msra.mxu0 %v2774_v29 }
 0xe70   : > { %4129 = vmatprep.subr.bf16.mxu1 %v4759_v0  ;;  %4135 = vmatprep.subr.bf16.mxu0 %v4759_v0 }
 0xe76   : > { %4120 = vmatmul.mubr.msk.bf16.vlgmr.msra.gmra.mrb[28].mxu1 %vm1337_vm3, %v2416_v39  ;;  %4126 = vmatmul.mubr.msk.bf16.vlgmr.msra.gmra.mrb[28].mxu0 %vm1337_vm3, %v2417_v40 }
 0xe77   : > { %4130 = vmatpush3.bf16.xpose.msra.mxu1 %v2820_v44  ;;  %4136 = vmatpush3.bf16.xpose.msra.mxu0 %v2866_v47 }
 0xe78   : > { %4131 = vmatprep.mubr.msk.bf16.mxu1 %vm4760_vm0, %v4759_v0  ;;  %4137 = vmatprep.mubr.msk.bf16.mxu0 %vm4760_vm0, %v4759_v0 }
 0xe79   : > { %4141 = vmatprep.subr.bf16.mxu1 %v4759_v0  ;;  %4147 = vmatprep.subr.bf16.mxu0 %v4759_v0 }
 0xe7e   : > { %4132 = vmatmul.mubr.msk.bf16.vlgmr.msra.gmra.mrb[32].mxu1 %vm1337_vm3, %v2418_v48  ;;  %4138 = vmatmul.mubr.msk.bf16.vlgmr.msra.gmra.mrb[32].mxu0 %vm1337_vm3, %v2419_v49 }
 0xe7f   : > { %4143 = vmatprep.mubr.msk.bf16.mxu1 %vm4760_vm0, %v4759_v0  ;;  %4149 = vmatprep.mubr.msk.bf16.mxu0 %vm4760_vm0, %v4759_v0 }
 0xf49   : > { %v2764_v50 = vpop.f32.mrb[28].mxu1  ;;  %v2810_v51 = vpop.f32.mrb[28].mxu0 }
 0xf4a   : > { %v2908_v52 = vmul.f32 0.35355338, %v2764_v50  ;;  %v2909_v55 = vmul.f32 0.35355338, %v2810_v51  ;;  %v4121_v45 = vpop.f32.mrb[29].mxu1  ;;  %v4127_v46 = vpop.f32.mrb[29].mxu0 }
 0xf4b   : > { %v2767_v23 = vpop.f32.mrb[30].mxu1  ;;  %v2813_v22 = vpop.f32.mrb[30].mxu0 }
 0xf4c   : > { %v4122_v56 = vpop.f32.mrb[31].mxu1  ;;  %v4128_v57 = vpop.f32.mrb[31].mxu0  ;;  %v2912_v58 = vadd.f32 %v5326_v5, %v2908_v52  ;;  %v2913_v59 = vadd.f32 %v5326_v5, %v2909_v55 }
 0xf4e   : > { %v2916_v60 = vsel %vm1337_vm3, %v2912_v58, -inf  ;;  %v2919_v61 = vsel %vm1337_vm3, %v2913_v59, -inf }
 0xf4f   : > { %2917 = vmax.xlane.f32.xlu1 %v2916_v60  ;;  %2920 = vmax.xlane.f32.xlu0 %v2919_v61 }
 0xf51   : > { %v2856_v62 = vpop.f32.mrb[32].mxu1  ;;  %v2902_v63 = vpop.f32.mrb[32].mxu0 }
 0xf52   : > { %v2910_v2 = vmul.f32 0.35355338, %v2856_v62  ;;  %v2911_v3 = vmul.f32 0.35355338, %v2902_v63  ;;  %v4133_v53 = vpop.f32.mrb[33].mxu1  ;;  %v4139_v54 = vpop.f32.mrb[33].mxu0 }
 0xf53   : > { %v2859_v6 = vpop.f32.mrb[34].mxu1  ;;  %v2905_v7 = vpop.f32.mrb[34].mxu0 }
 0xf54   : > { %v4134_v11 = vpop.f32.mrb[35].mxu1  ;;  %v4140_v13 = vpop.f32.mrb[35].mxu0  ;;  %v2914_v14 = vadd.f32 %v5326_v5, %v2910_v2  ;;  %v2915_v15 = vadd.f32 %v5326_v5, %v2911_v3 }
 0xf56   : > { %v2922_v12 = vsel %vm1337_vm3, %v2914_v14, -inf  ;;  %v2925_v16 = vsel %vm1337_vm3, %v2915_v15, -inf }
 0xf57   : > { %2923 = vmax.xlane.f32.xlu0 %v2922_v12  ;;  %2926 = vmax.xlane.f32.xlu1 %v2925_v16 }
 0xf68   : > { %2574 = vrot.lane.b32.xlu1 %v5504_v9, %s5870_s3 }
 0xf6d   : > { %2572 = vrot.lane.b32.xlu0 %v5492_v4, %s5870_s3 }
 0xfdc   : > { %v2918_v18 = vpop.xlane.xlu1 %2917  ;;  %v2921_v19 = vpop.xlane.xlu0 %2920 }
 0xfdd   : > { %v2928_v20 = vsub.f32 %v2912_v58, %v2918_v18  ;;  %v2929_v24 = vsub.f32 %v2913_v59, %v2921_v19 }
 0xfdf   : > { %v2932_v25 = vmul.f32 1.442695, %v2928_v20  ;;  %v2934_v26 = vmul.f32 1.442695, %v2929_v24 }
 0xfe1   : > { %4382 = vpow2.f32 %v2932_v25 }
 0xfe2   : > { %4384 = vpow2.f32 %v2934_v26 }
 0xfe4   : > { %v2927_v4 = vpop.xlane.xlu1 %2926  ;;  %v2924_v29 = vpop.xlane.xlu0 %2923 }
 0xfe5   : > { %v2931_v30 = vsub.f32 %v2915_v15, %v2927_v4  ;;  %v2930_v31 = vsub.f32 %v2914_v14, %v2924_v29 }
 0xfe7   : > { %v2938_v32 = vmul.f32 1.442695, %v2931_v30  ;;  %v2936_v34 = vmul.f32 1.442695, %v2930_v31 }
 0xfe8   : > { %v2575_v38 = vpop.permute.xlu1 %2574 }
 0xfe9   : > { %4386 = vpow2.f32 %v2938_v32 }
 0xfea   : > { %4388 = vpow2.f32 %v2936_v34 }
 0xfeb   : > { %v5586_v5 = vpop.eup %4382 }
 0xfec   : > { %v5588_v27 = vpop.eup %4384  ;;  %v2940_v28 = vsel %vm1337_vm3, %v5586_v5, 0.0 }
 0xfed   : > { %2941 = vadd.xlane.f32.xlu0 %v2940_v28  ;;  %v2943_v9 = vsel %vm1337_vm3, %v5588_v27, 0.0 }
 0xfee   : > { %2944 = vadd.xlane.f32.xlu1 %v2943_v9 }
 0xff3   : > { %v5598_v35 = vpop.eup %4386 }
 0xff4   : > { %v5600_v36 = vpop.eup %4388  ;;  %v2949_v37 = vsel %vm1337_vm3, %v5598_v35, 0.0 }
 0xfff   : > { %2576 = vrot.lane.b32.xlu1 %v5502_v8, %s5870_s3  ;;  %v2946_v8 = vsel %vm1337_vm3, %v5600_v36, 0.0 }
0x1003   : > { %2578 = vrot.lane.b32.xlu0 %v5510_v10, %s5870_s3  ;;  %v2573_v10 = vpop.permute.xlu0 %2572  ;;  %s5876_s3 = sld [smem:[#allocation40_spill]] }
0x1022   : > { %2950 = vadd.xlane.f32.xlu0 %v2949_v37 }
0x1023   : > { %2947 = vadd.xlane.f32.xlu1 %v2946_v8 }
0x107a   : > { %v2942_v39 = vpop.xlane.xlu0 %2941 }
0x107b   : > { %v2945_v40 = vpop.xlane.xlu1 %2944  ;;  %4390 = vrcp.f32 %v2942_v39 }
0x107c   : > { %4392 = vrcp.f32 %v2945_v40 }
0x107e   : > { %v2579_v41 = vpop.permute.xlu0 %2578 }
0x107f   : > { %v2600_v42 = vcombine.low %v2575_v38, %v2579_v41  ;;  %v2601_v44 = vcombine.high %v2575_v38, %v2579_v41  ;;  %v2577_v47 = vpop.permute.xlu1 %2576 }
0x1080   : > { %v2584_v21 = vcombine.low %v2573_v10, %v2577_v47  ;;  %v2585_v17 = vcombine.high %v2573_v10, %v2577_v47 }
0x1081   : > { %v2608_v48 = vrot.slane %v2600_v42, %v5264_v33  ;;  %v2615_v49 = vrot.slane %v2601_v44, %v5264_v33 }
0x1082   : > { %v2592_v50 = vrot.slane %v2584_v21, %v5264_v33  ;;  %v2599_v51 = vrot.slane %v2585_v17, %v5264_v33 }
0x1084   : > { %v2616_v52 = vcombine.low %v2592_v50, %v2608_v48  ;;  %v2617_v55 = vcombine.high %v2592_v50, %v2608_v48  ;;  %v2632_v45 = vcombine.low %v2599_v51, %v2615_v49  ;;  %v2633_v46 = vcombine.high %v2599_v51, %v2615_v49 }
0x1085   : > { %v4391_v14 = vpop.eup %4390 }
0x1086   : > { %v2624_v23 = vrot.slane %v2616_v52, %v5274_v43  ;;  %v2631_v22 = vrot.slane %v2617_v55, %v5274_v43  ;;  %v2640_v56 = vrot.slane %v2632_v45, %v5274_v43  ;;  %v2647_v57 = vrot.slane %v2633_v46, %v5274_v43  ;;  %v4393_v16 = vpop.eup %4392 }
0x1087   : > { %v2956_v25 = vmul.f32 %v4391_v14, %v5586_v5  ;;  %v2957_v26 = vmul.f32 %v4393_v16, %v5588_v27 }
0x1088   : > { %v2652_v58 = vcombine.low %v2624_v23, %v2631_v22  ;;  %v3899_v59 = vcombine.high %v2624_v23, %v2631_v22  ;;  %v2668_v60 = vcombine.low %v2640_v56, %v2647_v57  ;;  %v3900_v61 = vcombine.high %v2640_v56, %v2647_v57 }
0x1089   : > { %v2960_v32 = vpack.c.bf16 %v2956_v25, %v2956_v25  ;;  %v2961_v34 = vpack.c.bf16 %v2957_v26, %v2957_v26 }
0x108a   : > { %v2659_v62 = vrot.slane %v2652_v58, %v5264_v33  ;;  %v2667_v63 = vrot.slane %v3899_v59, %v5264_v33  ;;  %v2675_v2 = vrot.slane %v2668_v60, %v5264_v33  ;;  %v2683_v3 = vrot.slane %v3900_v61, %v5264_v33 }
0x108c   : > { %v2684_v53 = vcombine.low %v2659_v62, %v2667_v63  ;;  %v2685_v54 = vcombine.high %v2659_v62, %v2667_v63  ;;  %v2700_v6 = vcombine.low %v2675_v2, %v2683_v3  ;;  %v2701_v7 = vcombine.high %v2675_v2, %v2683_v3 }
0x108e   : > { %v2692_v11 = vrot.slane %v2684_v53, %v5274_v43  ;;  %v2699_v13 = vrot.slane %v2685_v54, %v5274_v43  ;;  %v2708_v15 = vrot.slane %v2700_v6, %v5274_v43  ;;  %v2715_v12 = vrot.slane %v2701_v7, %v5274_v43  ;;  %v4352_v6 = vld [vmem:[%s5788_s7 + $0x10] sm:$0xff]  }
0x1090   : > { %v2716_v18 = vcombine.low %v2692_v11, %v2708_v15  ;;  %v2717_v19 = vcombine.high %v2692_v11, %v2708_v15  ;;  %v2718_v20 = vcombine.low %v2699_v13, %v2715_v12  ;;  %v2719_v24 = vcombine.high %v2699_v13, %v2715_v12 }
0x1092   : > { %v2720_v28 = vpack.c.bf16 %v2716_v18, %v2716_v18  ;;  %v2721_v9 = vpack.c.bf16 %v2717_v19, %v2717_v19  ;;  %v2722_v30 = vpack.c.bf16 %v2718_v20, %v2718_v20  ;;  %v2723_v31 = vpack.c.bf16 %v2719_v24, %v2719_v24  ;;  %v4353_v19 = vld [vmem:[%s5788_s7 + $0x18] sm:$0xff]  }
0x1094   : > { %v2968_v4 = vsel %vm1587_vm4, %v2720_v28, 0  ;;  %v3014_v29 = vsel %vm1587_vm4, %v2721_v9, 0  ;;  %v3060_v5 = vsel %vm1587_vm4, %v2722_v30, 0  ;;  %v3106_v27 = vsel %vm1587_vm4, %v2723_v31, 0 }
0x1095   : > { %4142 = vmatpush3.bf16.msra.mxu1 %v2968_v4  ;;  %4148 = vmatpush3.bf16.msra.mxu0 %v3014_v29 }
0x1096   : > { %4153 = vmatprep.subr.bf16.mxu1 %v4759_v0  ;;  %4159 = vmatprep.subr.bf16.mxu0 %v4759_v0 }
0x1098   : > { %4144 = vmatmul.mubr.msk.bf16.vlgmr.msra.gmra.mrb[36].mxu1 %vm1337_vm3, %v2960_v32  ;;  %4150 = vmatmul.mubr.msk.bf16.vlgmr.msra.gmra.mrb[36].mxu0 %vm1337_vm3, %v2961_v34 }
0x1099   : > { %4154 = vmatpush3.bf16.msra.mxu1 %v3060_v5  ;;  %4160 = vmatpush3.bf16.msra.mxu0 %v3106_v27 }
0x109a   : > { %4155 = vmatprep.mubr.msk.bf16.mxu1 %vm4760_vm0, %v4759_v0  ;;  %4161 = vmatprep.mubr.msk.bf16.mxu0 %vm4760_vm0, %v4759_v0 }
0x109b   : > { %4165 = vmatprep.subr.bf16.mxu1 %v4759_v0  ;;  %4173 = vmatprep.subr.bf16.mxu0 %v4759_v0 }
0x10af   : > { %v2951_v37 = vpop.xlane.xlu0 %2950 }
0x10b0   : > { %4394 = vrcp.f32 %v2951_v37  ;;  %v2948_v8 = vpop.xlane.xlu1 %2947 }
0x10b1   : > { %4396 = vrcp.f32 %v2948_v8 }
0x10ba   : > { %v4395_v10 = vpop.eup %4394 }
0x10bb   : > { %v4397_v38 = vpop.eup %4396  ;;  %v2959_v39 = vmul.f32 %v4395_v10, %v5598_v35 }
0x10bc   : > { %v2958_v40 = vmul.f32 %v4397_v38, %v5600_v36 }
0x10bd   : > { %v2963_v41 = vpack.c.bf16 %v2959_v39, %v2959_v39 }
0x10be   : > { %v2962_v42 = vpack.c.bf16 %v2958_v40, %v2958_v40 }
0x10bf   : > { %4162 = vmatmul.mubr.msk.bf16.vlgmr.msra.gmra.mrb[40].mxu0 %vm1337_vm3, %v2963_v41 }
0x10c0   : > { %4156 = vmatmul.mubr.msk.bf16.vlgmr.msra.gmra.mrb[40].mxu1 %vm1337_vm3, %v2962_v42  ;;  %4177 = vmatprep.mubr.msk.bf16.mxu0 %vm4760_vm0, %v4759_v0  ;;  %v3915_v42 = vld [vmem:[#allocation11 + $0x1] ss:$0 sm:$0xff] }
0x10c1   : > { %4169 = vmatprep.mubr.msk.bf16.mxu1 %vm4760_vm0, %v4759_v0  ;;  %4166 = vmatpush3.bf16.msra.mxu1 %v4352_v6 }
0x10c2   : > { %4167 = vmatprep.subr.bf16.mxu1 %v4759_v0 }
0x10c5   : > { %4168 = vmatpush3.bf16.msra.mxu1 %v4353_v19 }
0x10c6   : > { %4181 = vmatprep.subr.bf16.mxu1 %v4759_v0 }
0x116b   : > { %v3004_v44 = vpop.f32.mrb[36].mxu1  ;;  %v3050_v47 = vpop.f32.mrb[36].mxu0 }
0x116c   : > { %v4145_v21 = vpop.f32.mrb[37].mxu1  ;;  %v4151_v17 = vpop.f32.mrb[37].mxu0 }
0x116d   : > { %v3007_v48 = vpop.f32.mrb[38].mxu1  ;;  %v3053_v35 = vpop.f32.mrb[38].mxu0 }
0x116e   : > { %v4146_v49 = vpop.f32.mrb[39].mxu1  ;;  %v4152_v36 = vpop.f32.mrb[39].mxu0 }
0x1192   : > { %v3142_v50 = vpop.f32.mrb[40].mxu0 }
0x1193   : > { %v3096_v51 = vpop.f32.mrb[40].mxu1  ;;  %v3164_v52 = vcombine.low %v3050_v47, %v3142_v50  ;;  %v3165_v55 = vcombine.high %v3050_v47, %v3142_v50  ;;  %v4163_v45 = vpop.f32.mrb[41].mxu0 }
0x1194   : > { %v3148_v46 = vcombine.low %v3004_v44, %v3096_v51  ;;  %v3149_v23 = vcombine.high %v3004_v44, %v3096_v51  ;;  %v4157_v22 = vpop.f32.mrb[41].mxu1  ;;  %v3145_v56 = vpop.f32.mrb[42].mxu0  ;;  %v4354_v45 = vld [vmem:[%s5865_s28 + $0x10] sm:$0xff]  }
0x1195   : > { %v3172_v57 = vrot.slane %v3164_v52, %v5264_v33  ;;  %v3179_v58 = vrot.slane %v3165_v55, %v5264_v33  ;;  %v3099_v59 = vpop.f32.mrb[42].mxu1  ;;  %v4164_v60 = vpop.f32.mrb[43].mxu0  ;;  %4174 = vmatpush3.bf16.msra.mxu0 %v4354_v45 }
0x1196   : > { %v3156_v61 = vrot.slane %v3148_v46, %v5264_v33  ;;  %v3163_v62 = vrot.slane %v3149_v23, %v5264_v33  ;;  %v4158_v63 = vpop.f32.mrb[43].mxu1  ;;  %v4355_v46 = vld [vmem:[%s5865_s28 + $0x18] sm:$0xff]   ;;  %4175 = vmatprep.subr.bf16.mxu0 %v4759_v0  ;;  %v4357_v23 = vld [vmem:[%s5866_s14 + $0x28] sm:$0xff]   ;;  %v3919_v59 = vld [vmem:[#allocation13 + $0x1] ss:$0 sm:$0xff] }
0x1198   : > { %v3180_v2 = vcombine.low %v3156_v61, %v3172_v57  ;;  %v3181_v3 = vcombine.high %v3156_v61, %v3172_v57  ;;  %v3196_v53 = vcombine.low %v3163_v62, %v3179_v58  ;;  %v3197_v54 = vcombine.high %v3163_v62, %v3179_v58  ;;  %v3920_v61 = vld [vmem:[#allocation14 + $0x1] ss:$0 sm:$0xff] }
0x1199   : > { %4176 = vmatpush3.bf16.msra.mxu0 %v4355_v46 }
0x119a   : > { %v3188_v7 = vrot.slane %v3180_v2, %v5274_v43  ;;  %v3195_v11 = vrot.slane %v3181_v3, %v5274_v43  ;;  %v3204_v13 = vrot.slane %v3196_v53, %v5274_v43  ;;  %v3211_v14 = vrot.slane %v3197_v54, %v5274_v43  ;;  %4193 = vmatprep.subr.bf16.mxu0 %v4759_v0  ;;  %v4358_v3 = vld [vmem:[%s5866_s14 + $0x30] sm:$0xff]   ;;  %v4359_v53 = vld [vmem:[%s5866_s14 + $0x38] sm:$0xff]   ;;  %v3925_v54 = vld [vmem:[#allocation16 + $0x1] ss:$0 sm:$0xff] }
0x119c   : > { %v3216_v15 = vcombine.low %v3188_v7, %v3195_v11  ;;  %v3909_v12 = vcombine.high %v3188_v7, %v3195_v11  ;;  %v3232_v16 = vcombine.low %v3204_v13, %v3211_v14  ;;  %v3910_v18 = vcombine.high %v3204_v13, %v3211_v14 }
0x119e   : > { %v3223_v20 = vrot.slane %v3216_v15, %v5264_v33  ;;  %v3231_v24 = vrot.slane %v3909_v12, %v5264_v33  ;;  %v3239_v25 = vrot.slane %v3232_v16, %v5264_v33  ;;  %v3247_v26 = vrot.slane %v3910_v18, %v5264_v33  ;;  %v3938_v16 = vld [vmem:[%s5867_s23 + $0x1] ss:$0 sm:$0xff] }
0x11a0   : > { %v3249_v28 = vcombine.high %v3223_v20, %v3231_v24  ;;  %v3265_v9 = vcombine.high %v3239_v25, %v3247_v26  ;;  %v3248_v4 = vcombine.low %v3223_v20, %v3231_v24  ;;  %v3264_v29 = vcombine.low %v3239_v25, %v3247_v26 }
0x11a2   : > { %v3263_v30 = vrot.slane %v3249_v28, %v5274_v43  ;;  %v3279_v31 = vrot.slane %v3265_v9, %v5274_v43  ;;  %v3256_v32 = vrot.slane %v3248_v4, %v5274_v43  ;;  %v3272_v34 = vrot.slane %v3264_v29, %v5274_v43 }
0x11a4   : > { %v3282_v5 = vcombine.low %v3263_v30, %v3279_v31  ;;  %v3281_v27 = vcombine.high %v3256_v32, %v3272_v34  ;;  %v3283_v37 = vcombine.high %v3263_v30, %v3279_v31  ;;  %v3280_v8 = vcombine.low %v3256_v32, %v3272_v34  ;;  %v4360_v32 = vld [vmem:[%s5874_s11] sm:$0xff]   ;;  %v4361_v34 = vld [vmem:[%s5874_s11 + $0x8] sm:$0xff]  }
0x11a6   : > { %3289 = vrot.lane.b32.xlu1 %v3282_v5, %s5871_s13  ;;  %3285 = vrot.lane.b32.xlu0 %v3281_v27, %s5872_s22  ;;  %s3951_s13 = sshll.u32 %s4893_s2, 4  ;;  %s749_s22 = scalar_lea.vmem [#allocation17], %s5180_s9 }
0x11a7   : > { %s5737_s1 = scalar_lea.hbm %s5876_s3, %s3951_s13 }
0x11aa   : > { %3293 = vrot.lane.b32.xlu1 %v3283_v37, %s5873_s6  ;;  %s3671_s6 = sshll.u32 %s749_s22, 4  ;;  %s5739_s6 = int_to_ptr.vmem [resolvable:$true] %s3671_s6 }
0x11ab   : > { %s4658_s2 = scalar_lea.vmem %s5739_s6, 16 }
0x11ac   : > { %p4659_p6 = scmp.ne.s32.totalorder %s5739_s6, %s4658_s2 }
0x11ae   : > { %p4660_p0 = pnand %p4659_p6, %p5877_p9 }
0x11b0   : > { %p4661_p5 = pneg %p4660_p0 }
0x1218   : > { %v3290_v33 = vpop.permute.xlu1 %3289  ;;  %v3286_v10 = vpop.permute.xlu0 %3285 }
0x1219   : > { %v3296_v38 = vsel %vm1337_vm3, %v3280_v8, %v3286_v10 }
0x121a   : > { %v3297_v40 = vsel %vm768_vm1, %v3296_v38, %v3290_v33  ;;  %v3946_v33 = vld [vmem:[%s5868_s8 + $0x1] ss:$0 sm:$0xff] }
0x121b   : > { %v3947_v38 = vld [vmem:[%s5869_s18 + $0x1] ss:$0 sm:$0xff] }
0x121c   : > { %v3294_v39 = vpop.permute.xlu1 %3293 }
0x121d   : > { %v3298_v41 = vsel %vm1919_vm5, %v3297_v40, %v3294_v39 }
0x121e   : > { %v3304_v43 = vpack.c.bf16 %v3298_v41, %v3298_v41 }
0x1220   : > { %4170 = vmatmul.mubr.msk.bf16.vlgmr.msra.gmra.mrb[44].mxu1 %vm839_vm2, %v3304_v43 }
0x1221   : > { %4189 = vmatprep.mubr.msk.bf16.mxu1 %vm4760_vm0, %v4759_v0 }
0x12f3   : > { %v3362_v44 = vpop.f32.mrb[44].mxu1 }
0x12f4   : > { %v3363_v47 = vadd.f32 %v3915_v42, %v3362_v44  ;;  %v4171_v21 = vpop.f32.mrb[45].mxu1 }
0x12f5   : > { %v3365_v17 = vpop.f32.mrb[46].mxu1 }
0x12f6   : > { %v4172_v48 = vpop.f32.mrb[47].mxu1  ;;  %v3368_v35 = vadd.f32 %v3363_v47, %v5485_v1  ;;  %v4356_v1 = vld [vmem:[%s5866_s14 + $0x20] sm:$0xff]  }
0x12f7   : > { %4182 = vmatpush3.bf16.msra.mxu1 %v4356_v1 }
0x12f8   : > { %v3373_v49 = vsel %vm839_vm2, %v3368_v35, 0.0  ;;  %4183 = vmatprep.subr.bf16.mxu1 %v4759_v0 }
0x12f9   : > { %3374 = vadd.xlane.f32.xlu0 %v3373_v49 }
0x12fb   : > { %4184 = vmatpush3.bf16.msra.mxu1 %v4357_v23 }
0x12fc   : > { %4185 = vmatprep.subr.bf16.mxu1 %v4759_v0 }
0x12ff   : > { %4186 = vmatpush3.bf16.msra.mxu1 %v4358_v3 }
0x1300   : > { %4187 = vmatprep.subr.bf16.mxu1 %v4759_v0 }
0x1303   : > { %4188 = vmatpush3.bf16.msra.mxu1 %v4359_v53 }
0x1386   : > { %v3375_v36 = vpop.xlane.xlu0 %3374 }
0x1387   : > { %v3376_v50 = vmul.f32 0.03125, %v3375_v36 }
0x1389   : > { %v3377_v51 = vsub.f32 %v3368_v35, %v3376_v50  ;;  %v3601_v35 = vld [vmem:[%s5875_s4] sm:$0x1]  ;;  %s4662_s4 = sshll.u32 %s4771_s19, 4  ;;  %s4663_s4 = int_to_ptr.vmem [resolvable:$false] %s4662_s4 }
0x138a   : > { %s4664_s25 = scalar_lea.vmem %s4663_s4, 32  ;;  %p4665_p3 = scmp.lt.s32.totalorder %s5739_s6, %s4663_s4 }
0x138b   : > { %v3378_v52 = vmul.f32 %v3377_v51, %v3377_v51  ;;  %p4666_p8 = scmp.lt.s32.totalorder %s4664_s25, %s4658_s2 }
0x138d   : > { %v3379_v55 = vsel %vm839_vm2, %v3378_v52, 0.0  ;;  %p4667_p2 = por %p4666_p8, %p4665_p3 }
0x138e   : > { %3380 = vadd.xlane.f32.xlu1 %v3379_v55 }
0x138f   : > { %p4668_p4 = pnand %p4667_p2, %p4661_p5 }
0x141b   : > { %v3381_v22 = vpop.xlane.xlu1 %3380 }
0x141c   : > { %v3382_v56 = vmul.f32 0.03125, %v3381_v22 }
0x141e   : > { %v3383_v57 = vadd.f32 1e-05, %v3382_v56 }
0x1420   : > { %4398 = vrsqrt.f32 %v3383_v57 }
0x142a   : > { %v4399_v58 = vpop.eup %4398 }
0x142b   : > { %v3385_v60 = vmul.f32 %v4399_v58, %v3377_v51 }
0x142d   : > { %v3392_v62 = vmul.f32 %v3919_v59, %v3385_v60 }
0x142f   : > { %v3399_v63 = vadd.f32 %v3920_v61, %v3392_v62 }
0x1431   : > { %v3405_v2 = vpack.c.bf16 %v3399_v63, %v3399_v63 }
0x1433   : > { %4178 = vmatmul.mubr.msk.bf16.vlgmr.msra.gmra.mrb[44].mxu0 %vm839_vm2, %v3405_v2 }
0x1434   : > { %4197 = vmatprep.mubr.msk.bf16.mxu0 %vm4760_vm0, %v4759_v0  ;;  %4194 = vmatpush3.bf16.msra.mxu0 %v4360_v32 }
0x1435   : > { %4195 = vmatprep.subr.bf16.mxu0 %v4759_v0 }
0x1438   : > { %4196 = vmatpush3.bf16.msra.mxu0 %v4361_v34 }
0x1506   : > { %v3463_v6 = vpop.f32.mrb[44].mxu0 }
0x1507   : > { %v3464_v7 = vadd.f32 %v3925_v54, %v3463_v6  ;;  %v4179_v11 = vpop.f32.mrb[45].mxu0 }
0x1508   : > { %v3466_v13 = vpop.f32.mrb[46].mxu0 }
0x1509   : > { %v3469_v14 = vmax.f32 %v3464_v7, 0.0  ;;  %v4180_v15 = vpop.f32.mrb[47].mxu0 }
0x150b   : > { %v3479_v12 = vpack.c.bf16 %v3469_v14, %v3469_v14 }
0x150d   : > { %4190 = vmatmul.mubr.msk.bf16.vlgmr.msra.gmra.mrb[48].mxu1 %vm2127_vm6, %v3479_v12 }
0x15e0   : > { %v3549_v18 = vpop.f32.mrb[48].mxu1 }
0x15e1   : > { %v3550_v19 = vadd.f32 %v3938_v16, %v3549_v18  ;;  %v4191_v20 = vpop.f32.mrb[49].mxu1 }
0x15e2   : > { %v3552_v24 = vpop.f32.mrb[50].mxu1 }
0x15e3   : > { %v4192_v25 = vpop.f32.mrb[51].mxu1  ;;  %v3555_v26 = vadd.f32 %v3550_v19, %v3399_v63 }
0x15e5   : > { %v3560_v28 = vsel %vm839_vm2, %v3555_v26, 0.0 }
0x15e6   : > { %3561 = vadd.xlane.f32.xlu0 %v3560_v28 }
0x1673   : > { %v3562_v9 = vpop.xlane.xlu0 %3561 }
0x1674   : > { %v3563_v4 = vmul.f32 0.03125, %v3562_v9 }
0x1676   : > { %v3564_v29 = vsub.f32 %v3555_v26, %v3563_v4 }
0x1678   : > { %v3565_v30 = vmul.f32 %v3564_v29, %v3564_v29 }
0x167a   : > { %v3566_v31 = vsel %vm839_vm2, %v3565_v30, 0.0 }
0x167b   : > { %3567 = vadd.xlane.f32.xlu0 %v3566_v31 }
0x1708   : > { %v3568_v5 = vpop.xlane.xlu0 %3567 }
0x1709   : > { %v3569_v27 = vmul.f32 0.03125, %v3568_v5 }
0x170b   : > { %v3570_v37 = vadd.f32 1e-05, %v3569_v27 }
0x170d   : > { %4400 = vrsqrt.f32 %v3570_v37 }
0x1717   : > { %v4401_v8 = vpop.eup %4400 }
0x1718   : > { %v3572_v10 = vmul.f32 %v4401_v8, %v3564_v29 }
0x171a   : > { %v3579_v39 = vmul.f32 %v3946_v33, %v3572_v10 }
0x171c   : > { %v3586_v40 = vadd.f32 %v3947_v38, %v3579_v39 }
0x171e   : > { %v3587_v0 = vsel %vm839_vm2, %v3586_v40, 0.0 }
0x171f   : > { %v3588_v41 = vrot.slane %v3587_v0, 4 }
0x1721   : > { %v3589_v43 = vadd.f32 %v3588_v41, %v3587_v0 }
0x1723   : > { %v3590_v42 = vrot.slane %v3589_v43, 2 }
0x1725   : > { %v3591_v44 = vadd.f32 %v3590_v42, %v3589_v43 }
0x1727   : > { %v3592_v47 = vrot.slane %v3591_v44, 1 }
0x1729   : > { %v3593_v21 = vadd.f32 %v3592_v47, %v3591_v44 }
0x172b   : > { %v3595_v17 = vmul.f32 0.125, %v3593_v21 }
0x172d   : > { %v3600_v48 = vpack.c.bf16 %v3595_v17, %v3595_v17 }
0x172f   : > { %4198 = vmatmul.mubr.msk.bf16.vlgmr.msra.gmra.mrb[48].mxu0 %vm839_vm2, %v3600_v48 }
0x1802   : > { %v3651_v49 = vpop.f32.mrb[48].mxu0 }
0x1803   : > { %v3652_v36 = vadd.f32 %v3651_v49, %v3601_v35  ;;  %v4199_v50 = vpop.f32.mrb[49].mxu0 }
0x1804   : > { %v3654_v51 = vpop.f32.mrb[50].mxu0 }
0x1805   : > { %3657 = vst [vmem:[%s749_s22] sm:$0x1] %v3652_v36  ;;  %v4200_v52 = vpop.f32.mrb[51].mxu0 }
0x1806   : > { %4671 = shalt.err (!%p4668_p4)
}
0x1807   : > { %s4672_s9 = scalar_lea.hbm %s5737_s1, 16  ;;  %s4676_s29 = scalar_lea.hbm %s5876_s3, 32 }
0x1808   : > { %p4673_p7 = scmp.ne.s32.totalorder %s5737_s1, %s4672_s9  ;;  %p4677_p11 = scmp.lt.u32.totalorder %s5737_s1, %s5876_s3 }
0x1809   : > { %p4678_p12 = scmp.lt.u32.totalorder %s4676_s29, %s4672_s9  ;;  %p4680_p6 = scmp.lt.u32.totalorder %s4672_s9, %s5737_s1 }
0x180a   : > { %p4674_p10 = pnand %p4673_p7, %p5877_p9 }
0x180b   : > { %p4679_p13 = por %p4678_p12, %p4677_p11 }
0x180c   : > { %p4675_p1 = pneg %p4674_p10 }
0x180d   : > { %p4681_p0 = por %p4680_p6, %p4679_p13 }
0x180f   : > { %p4682_p5 = pnand %p4681_p0, %p4675_p1 }
0x1811   : > { %4685 = shalt.err (!%p4682_p5)
}
0x1812   : > { %4233 = dma.vmem_to_hbm [thread:$0]  (%p5877_p9), %s5739_s6, 16, %s5737_s1, %s3659_s15  }
0x1813 PF: > { %s3683_s2 = sand.u32 1, %s4732_s0   ;;  %p5878_p3 = scmp.ne.s32.totalorder %s5849_s27, 0 }
0x1814   : > { %p5879_p8 = scmp.ge.s32.totalorder %s4744_s21, 2  ;;  %s3684_s25 = scalar_lea.sflag [#allocation4], %s3683_s2 }
0x1816   : > { %p4265_p2 = pnand %p5879_p8, %p5878_p3 }
0x1818   : > { %4727 = dma.done.wait (!%p4265_p2), %s3684_s25, 16  }
0x1819   : > { %4729 = vsyncadd (!%p4265_p2), %s3684_s25, 4294967280  ;;  %p38_p4 = scmp.ge.s32.totalorder %s5077_s24, 4   ;;  %s5880_s0 = smov %s4736_s30 }
0x181a   : > { %s5881_s30 = smov %s4740_s20  ;;  %s5882_s20 = smov %s5089_s26 }
0x181b   : > { %s5883_s21 = smov %s5077_s24  ;;  %40 = sbr.rel (!%p38_p4) target bundleno = 27 (0x1b), region = 194 }
0x1822   :  { %3688 = vsyncpa [#allocation3], 1 }
0x1823   :  { %3690 = vsyncpa [#allocation3 + $0x1], 1 }
0x1824   :  { %3691 = vsyncpa [#allocation6], 1 }
0x1825   :  { %3693 = vsyncpa [#allocation6 + $0x1], 1 }
0x1826   :  { %3694 = vsyncpa [#allocation9], 1 }
0x1827   :  { %3695 = vsyncpa [#allocation12], 1 }
0x1828   :  { %3696 = vsyncpa [#allocation15], 1 }
0x1829   :  { %3697 = vsyncpa [#allocation4], 1 }
0x182a   :  { %3699 = vsyncpa [#allocation4 + $0x1], 1 }

</bundles_post_ra>
